<compile_context>
chip_gen: v7x
topology: tpu7x:2x2x1
jax: 0.10.0
libtpu: 0.0.40
codegen_flags: <defaults>
</compile_context>

<pallas_src>
import math
from functools import partial

import jax
import jax.numpy as jnp
from jax.experimental import pallas as pl
from jax.experimental.pallas import tpu as pltpu


# ------------------------------ Pallas kernel -------------------------------

def _conv3x3_block_kernel(*refs, KH, KW, dilation, stride,
                          has_residual, apply_relu):
    """One grid step = one (TH, Wo, Cout) output slab of a 3x3 conv.

    refs = [x, w, (residual), out, xp_scratch]
      x:        (1, H, W, Cin)        input image (f32 or bf16), whole image
      w:        (KH*KW*Cin, Cout)     bf16 weights, flattened (kh, kw, cin)
      residual: (1, TH, Wo, Cout)     optional residual slab
      out:      (1, TH, Wo, Cout)     output slab (bf16 or f32)
      xp:       (Hp, Wp, Cin) bf16    VMEM scratch for the zero-padded image
    """
    refs = list(refs)
    x_ref = refs.pop(0)
    w_ref = refs.pop(0)
    res_ref = refs.pop(0) if has_residual else None
    o_ref = refs.pop(0)
    xp_ref = refs.pop(0)

    _, H, W, Cin = x_ref.shape
    _, TH, Wo, Cout = o_ref.shape
    pad = dilation
    hb = pl.program_id(1)

    # Zero-padded image slab built in VMEM (no XLA pad pass, no extra HBM trip).
    xp_ref[...] = jnp.zeros_like(xp_ref)
    xp_ref[pad:pad + H, pad:pad + W, :] = x_ref[0].astype(jnp.bfloat16)

    row0 = hb * (TH * stride)
    taps = []
    for kh in range(KH):
        r0 = row0 + kh * dilation
        if stride == 1:
            rows = xp_ref[pl.ds(r0, TH), :, :]                       # (TH, Wp, Cin)
        else:
            rows = xp_ref[pl.ds(r0, TH, stride=stride), :, :]
        for kw in range(KW):
            c0 = kw * dilation                                       # static int
            if stride == 1:
                taps.append(rows[:, c0:c0 + Wo, :])                  # (TH, Wo, Cin)
            else:
                taps.append(rows[:, c0:c0 + (Wo - 1) * stride + 1:stride, :])

    # (TH, Wo, 9*Cin) -> (TH*Wo, 9*Cin): one fat bf16 MXU matmul, f32 accumulate.
    lhs = jnp.concatenate(taps, axis=-1).reshape(TH * Wo, KH * KW * Cin)
    acc = jnp.dot(lhs, w_ref[...], preferred_element_type=jnp.float32)

    if has_residual:
        acc = acc + res_ref[0].reshape(TH * Wo, Cout).astype(jnp.float32)
    if apply_relu:
        acc = jnp.maximum(acc, 0.0)
    o_ref[0] = acc.reshape(TH, Wo, Cout).astype(o_ref.dtype)


# ------------------------------ conv wrapper --------------------------------

def _pick_th(Ho, Wo, target_m=512):
    """Largest divisor of Ho with TH*Wo <= target_m (MXU M-fill vs vreg budget)."""
    best = 1
    for cand in range(1, Ho + 1):
        if Ho % cand == 0 and cand * Wo <= target_m:
            best = cand
    return best


def conv3x3_pallas(x, w, *, stride=1, dilation=1, residual=None, relu=False,
                   out_dtype=jnp.float32):
    """conv3x3 (bias=False, padding=dilation) on NHWC with fused residual+ReLU."""
    N, H, W, Cin = x.shape
    Cout, Cin_w, KH, KW = w.shape
    assert Cin == Cin_w and KH == 3 and KW == 3
    pad = dilation
    Ho = (H + 2 * pad - dilation * (KH - 1) - 1) // stride + 1
    Wo = (W + 2 * pad - dilation * (KW - 1) - 1) // stride + 1
    Hp, Wp = H + 2 * pad, W + 2 * pad

    TH = _pick_th(Ho, Wo)
    HB = Ho // TH

    # Weights flattened to (kh*KW + kw)*Cin + cin along K; bf16 (MXU native).
    wt = jnp.transpose(w, (2, 3, 1, 0)).reshape(KH * KW * Cin, Cout)
    wt = wt.astype(jnp.bfloat16)

    in_specs = [
        # whole image, constant across the row-block axis => DMA'd once per n
        pl.BlockSpec((1, H, W, Cin), lambda n, hb: (n, 0, 0, 0)),
        # whole weight, VMEM resident
        pl.BlockSpec((KH * KW * Cin, Cout), lambda n, hb: (0, 0)),
    ]
    inputs = [x, wt]
    if residual is not None:
        assert residual.shape == (N, Ho, Wo, Cout), (
            "identity shortcut requires stride=1 and Cin == Cout")
        in_specs.append(pl.BlockSpec((1, TH, Wo, Cout),
                                     lambda n, hb: (n, hb, 0, 0)))
        inputs.append(residual)
    out_spec = pl.BlockSpec((1, TH, Wo, Cout), lambda n, hb: (n, hb, 0, 0))

    kern = partial(_conv3x3_block_kernel, KH=KH, KW=KW, dilation=dilation,
                   stride=stride, has_residual=residual is not None,
                   apply_relu=relu)
    return pl.pallas_call(
        kern,
        out_shape=jax.ShapeDtypeStruct((N, Ho, Wo, Cout), out_dtype),
        grid=(N, HB),
        in_specs=in_specs,
        out_specs=out_spec,
        scratch_shapes=[pltpu.VMEM((Hp, Wp, Cin), jnp.bfloat16)],
        compiler_params=pltpu.CompilerParams(
            dimension_semantics=("parallel", "parallel")),
    )(*inputs)


# ------------------------------ BasicBlock ----------------------------------

def basic_block_forward(x_nchw, params, *, stride=1, dilation=1):
    """BasicBlock.forward with the PyTorch-facing NCHW layout."""
    # TODO(synk): `downsample` is an arbitrary user-supplied nn.Module; only the
    # default downsample=None (identity shortcut => stride must be 1) is implemented.
    assert stride == 1, "identity shortcut (downsample=None) requires stride == 1"
    x = jnp.transpose(x_nchw, (0, 2, 3, 1))                     # NCHW -> NHWC
    # conv1 -> ReLU, intermediate kept in bf16 (halves its HBM write/read)
    out = conv3x3_pallas(x, params["conv1_w"], stride=stride, dilation=dilation,
                         relu=True, out_dtype=jnp.bfloat16)
    # conv2 -> +residual -> ReLU, fused epilogue, f32 output
    out = conv3x3_pallas(out, params["conv2_w"], stride=1, dilation=dilation,
                         residual=x, relu=True, out_dtype=jnp.float32)
    return jnp.transpose(out, (0, 3, 1, 2))                     # NHWC -> NCHW


# --------------------------- pure-JAX reference -----------------------------

def _conv3x3_ref(x_nhwc, w, stride, dilation):
    # mirror the kernel's bf16 operand rounding, accumulate in f32
    xb = x_nhwc.astype(jnp.bfloat16).astype(jnp.float32)
    wb = w.astype(jnp.bfloat16).astype(jnp.float32)
    return jax.lax.conv_general_dilated(
        xb, wb, window_strides=(stride, stride),
        padding=((dilation, dilation), (dilation, dilation)),
        rhs_dilation=(dilation, dilation),
        dimension_numbers=("NHWC", "OIHW", "NHWC"),
        precision=jax.lax.Precision.HIGHEST)


def basic_block_ref(x_nhwc, params, stride, dilation):
    out = jnp.maximum(_conv3x3_ref(x_nhwc, params["conv1_w"], stride, dilation), 0.0)
    out = out.astype(jnp.bfloat16).astype(jnp.float32)   # kernel's bf16 intermediate
    out = _conv3x3_ref(out, params["conv2_w"], 1, dilation) + x_nhwc
    return jnp.maximum(out, 0.0)


# ----------------------------------- main ------------------------------------

if __name__ == "__main__":
    key = jax.random.PRNGKey(0)
    kx, k1, k2 = jax.random.split(key, 3)

    # batch=2, inplanes=planes=128 (lane-dense), 16x16 spatial
    N, C, H, W = 2, 128, 16, 16
    x = jax.random.normal(kx, (N, C, H, W), jnp.float32)
    fan = 3 * 3 * C
    params = {
        "conv1_w": jax.random.normal(k1, (C, C, 3, 3), jnp.float32) * math.sqrt(2.0 / fan),
        "conv2_w": jax.random.normal(k2, (C, C, 3, 3), jnp.float32) * math.sqrt(2.0 / fan),
    }

    fwd = jax.jit(partial(basic_block_forward, stride=1, dilation=1))
    out = jax.block_until_ready(fwd(x, params))
    assert out.shape == (N, C, H, W), out.shape
    assert bool(jnp.isfinite(out).all())

    # correctness cross-check against a pure-JAX reference
    x_nhwc = jnp.transpose(x, (0, 2, 3, 1))
    ref = jnp.transpose(basic_block_ref(x_nhwc, params, 1, 1), (0, 3, 1, 2))
    max_err = float(jnp.abs(out - ref).max())
    assert bool(jnp.allclose(out, ref, atol=5e-2, rtol=5e-2)), max_err

    # dilated variant (as used by the deeper layers of the extractor)
    fwd_d2 = jax.jit(partial(basic_block_forward, stride=1, dilation=2))
    out_d2 = jax.block_until_ready(fwd_d2(x, params))
    assert out_d2.shape == (N, C, H, W), out_d2.shape
    assert bool(jnp.isfinite(out_d2).all())

    print("KERNEL_OK")
</pallas_src>

<mosaic_0001>
module attributes {stable_mosaic.version = 11 : i64} {
  func.func @_conv3x3_block_kernel(%arg0: i32, %arg1: i32, %arg2: memref<1x16x16x128xf32, #tpu.memory_space<vmem>>, %arg3: memref<1152x128xbf16, #tpu.memory_space<vmem>>, %arg4: memref<1x16x16x128xbf16, #tpu.memory_space<vmem>>, %arg5: memref<18x18x128xbf16, #tpu.memory_space<vmem>>) attributes {dimension_semantics = [#tpu.dimension_semantics<parallel>, #tpu.dimension_semantics<parallel>], iteration_bounds = array<i64: 2, 1>, scalar_prefetch = 0 : i64, scratch_operands = 1 : i64, tpu.core_type = #tpu.core_type<tc>, window_params = [{transform_indices = @transform_0, window_bounds = array<i64: 1, 16, 16, 128>}, {pipeline_mode = #tpu.pipeline_mode<synchronous>, transform_indices = @transform_1, window_bounds = array<i64: 1152, 128>}, {transform_indices = @transform_2, window_bounds = array<i64: 1, 16, 16, 128>}]} {
    %cst = arith.constant 0.000000e+00 : bf16
    %0 = vector.broadcast %cst : bf16 to vector<18x18x128xbf16>
    %c0 = arith.constant 0 : index
    %c0_0 = arith.constant 0 : index
    %c0_1 = arith.constant 0 : index
    %1 = vector.load %arg5[%c0, %c0_0, %c0_1] : memref<18x18x128xbf16, #tpu.memory_space<vmem>>, vector<18x18x128xbf16>
    tpu.vector_store %arg5[%c0, %c0_0, %c0_1], %0 {strides = array<i32>} : memref<18x18x128xbf16, #tpu.memory_space<vmem>>, vector<18x18x128xbf16>,
    %c0_2 = arith.constant 0 : index
    %c0_3 = arith.constant 0 : index
    %c0_4 = arith.constant 0 : index
    %c0_5 = arith.constant 0 : index
    %2 = vector.load %arg2[%c0_2, %c0_3, %c0_4, %c0_5] : memref<1x16x16x128xf32, #tpu.memory_space<vmem>>, vector<1x16x16x128xf32>
    %3 = vector.shape_cast %2 : vector<1x16x16x128xf32> to vector<16x16x128xf32>
    %4 = arith.truncf %3 : vector<16x16x128xf32> to vector<16x16x128xbf16>
    %c1 = arith.constant 1 : index
    %c1_6 = arith.constant 1 : index
    %c0_7 = arith.constant 0 : index
    %5 = vector.load %arg5[%c1, %c1_6, %c0_7] : memref<18x18x128xbf16, #tpu.memory_space<vmem>>, vector<16x16x128xbf16>
    tpu.vector_store %arg5[%c1, %c1_6, %c0_7], %4 {strides = array<i32>} : memref<18x18x128xbf16, #tpu.memory_space<vmem>>, vector<16x16x128xbf16>,
    %c16_i32 = arith.constant 16 : i32
    %6 = arith.muli %arg1, %c16_i32 : i32
    %c0_i32 = arith.constant 0 : i32
    %7 = arith.addi %6, %c0_i32 : i32
    %8 = arith.index_cast %7 : i32 to index
    %c0_8 = arith.constant 0 : index
    %c0_9 = arith.constant 0 : index
    %9 = vector.load %arg5[%8, %c0_8, %c0_9] : memref<18x18x128xbf16, #tpu.memory_space<vmem>>, vector<16x18x128xbf16>
    %10 = vector.extract_strided_slice %9 {offsets = [0, 0, 0], sizes = [16, 16, 128], strides = [1, 1, 1]} : vector<16x18x128xbf16> to vector<16x16x128xbf16>
    %11 = vector.extract_strided_slice %9 {offsets = [0, 1, 0], sizes = [16, 16, 128], strides = [1, 1, 1]} : vector<16x18x128xbf16> to vector<16x16x128xbf16>
    %12 = vector.extract_strided_slice %9 {offsets = [0, 2, 0], sizes = [16, 16, 128], strides = [1, 1, 1]} : vector<16x18x128xbf16> to vector<16x16x128xbf16>
    %c1_i32 = arith.constant 1 : i32
    %13 = arith.addi %6, %c1_i32 : i32
    %14 = arith.index_cast %13 : i32 to index
    %c0_10 = arith.constant 0 : index
    %c0_11 = arith.constant 0 : index
    %15 = vector.load %arg5[%14, %c0_10, %c0_11] : memref<18x18x128xbf16, #tpu.memory_space<vmem>>, vector<16x18x128xbf16>
    %16 = vector.extract_strided_slice %15 {offsets = [0, 0, 0], sizes = [16, 16, 128], strides = [1, 1, 1]} : vector<16x18x128xbf16> to vector<16x16x128xbf16>
    %17 = vector.extract_strided_slice %15 {offsets = [0, 1, 0], sizes = [16, 16, 128], strides = [1, 1, 1]} : vector<16x18x128xbf16> to vector<16x16x128xbf16>
    %18 = vector.extract_strided_slice %15 {offsets = [0, 2, 0], sizes = [16, 16, 128], strides = [1, 1, 1]} : vector<16x18x128xbf16> to vector<16x16x128xbf16>
    %c2_i32 = arith.constant 2 : i32
    %19 = arith.addi %6, %c2_i32 : i32
    %20 = arith.index_cast %19 : i32 to index
    %c0_12 = arith.constant 0 : index
    %c0_13 = arith.constant 0 : index
    %21 = vector.load %arg5[%20, %c0_12, %c0_13] : memref<18x18x128xbf16, #tpu.memory_space<vmem>>, vector<16x18x128xbf16>
    %22 = vector.extract_strided_slice %21 {offsets = [0, 0, 0], sizes = [16, 16, 128], strides = [1, 1, 1]} : vector<16x18x128xbf16> to vector<16x16x128xbf16>
    %23 = vector.extract_strided_slice %21 {offsets = [0, 1, 0], sizes = [16, 16, 128], strides = [1, 1, 1]} : vector<16x18x128xbf16> to vector<16x16x128xbf16>
    %24 = vector.extract_strided_slice %21 {offsets = [0, 2, 0], sizes = [16, 16, 128], strides = [1, 1, 1]} : vector<16x18x128xbf16> to vector<16x16x128xbf16>
    %25 = tpu.concatenate %10, %11, %12, %16, %17, %18, %22, %23, %24 in 2 : vector<16x16x128xbf16>, vector<16x16x128xbf16>, vector<16x16x128xbf16>, vector<16x16x128xbf16>, vector<16x16x128xbf16>, vector<16x16x128xbf16>, vector<16x16x128xbf16>, vector<16x16x128xbf16>, vector<16x16x128xbf16> -> vector<16x16x1152xbf16>
    %26 = vector.shape_cast %25 : vector<16x16x1152xbf16> to vector<256x1152xbf16>
    %c0_14 = arith.constant 0 : index
    %c0_15 = arith.constant 0 : index
    %27 = vector.load %arg3[%c0_14, %c0_15] : memref<1152x128xbf16, #tpu.memory_space<vmem>>, vector<1152x128xbf16>
    %cst_16 = arith.constant dense<0.000000e+00> : vector<256x128xf32>
    %28 = tpu.matmul %26, %27, %cst_16 {dimension_numbers = #tpu.dot_dimension_numbers<[1], [0], [0], [1], [0, 0, 1, 1], [], []>} : vector<256x1152xbf16>, vector<1152x128xbf16>, vector<256x128xf32> -> vector<256x128xf32>
    %cst_17 = arith.constant 0.000000e+00 : f32
    %29 = vector.broadcast %cst_17 : f32 to vector<256x128xf32>
    %30 = arith.maximumf %28, %29 : vector<256x128xf32>
    %31 = vector.shape_cast %30 : vector<256x128xf32> to vector<16x16x128xf32>
    %32 = arith.truncf %31 : vector<16x16x128xf32> to vector<16x16x128xbf16>
    %c0_18 = arith.constant 0 : index
    %c0_19 = arith.constant 0 : index
    %c0_20 = arith.constant 0 : index
    %c0_21 = arith.constant 0 : index
    %33 = vector.load %arg4[%c0_18, %c0_19, %c0_20, %c0_21] : memref<1x16x16x128xbf16, #tpu.memory_space<vmem>>, vector<1x16x16x128xbf16>
    %34 = vector.shape_cast %33 : vector<1x16x16x128xbf16> to vector<16x16x128xbf16>
    %35 = vector.shape_cast %32 : vector<16x16x128xbf16> to vector<1x16x16x128xbf16>
    tpu.vector_store %arg4[%c0_18, %c0_19, %c0_20, %c0_21], %35 {strides = array<i32>} : memref<1x16x16x128xbf16, #tpu.memory_space<vmem>>, vector<1x16x16x128xbf16>,
    return
  }
  func.func @transform_0(%arg0: i32, %arg1: i32) -> (i32, i32, i32, i32) {
    %c0_i32 = arith.constant 0 : i32
    %c0_i32_0 = arith.constant 0 : i32
    %c0_i32_1 = arith.constant 0 : i32
    %c0_i32_2 = arith.constant 0 : i32
    return %arg0, %c0_i32, %c0_i32_0, %c0_i32_1 : i32, i32, i32, i32
  }
  func.func @transform_1(%arg0: i32, %arg1: i32) -> (i32, i32) {
    %c0_i32 = arith.constant 0 : i32
    %c0_i32_0 = arith.constant 0 : i32
    %c0_i32_1 = arith.constant 0 : i32
    return %c0_i32, %c0_i32_0 : i32, i32
  }
  func.func @transform_2(%arg0: i32, %arg1: i32) -> (i32, i32, i32, i32) {
    %c0_i32 = arith.constant 0 : i32
    %c0_i32_0 = arith.constant 0 : i32
    %c0_i32_1 = arith.constant 0 : i32
    return %arg0, %arg1, %c0_i32, %c0_i32_0 : i32, i32, i32, i32
  }
}

module attributes {stable_mosaic.version = 11 : i64} {
  func.func @_conv3x3_block_kernel(%arg0: i32, %arg1: i32, %arg2: memref<1x16x16x128xbf16, #tpu.memory_space<vmem>>, %arg3: memref<1152x128xbf16, #tpu.memory_space<vmem>>, %arg4: memref<1x16x16x128xf32, #tpu.memory_space<vmem>>, %arg5: memref<1x16x16x128xf32, #tpu.memory_space<vmem>>, %arg6: memref<18x18x128xbf16, #tpu.memory_space<vmem>>) attributes {dimension_semantics = [#tpu.dimension_semantics<parallel>, #tpu.dimension_semantics<parallel>], iteration_bounds = array<i64: 2, 1>, scalar_prefetch = 0 : i64, scratch_operands = 1 : i64, tpu.core_type = #tpu.core_type<tc>, window_params = [{transform_indices = @transform_0, window_bounds = array<i64: 1, 16, 16, 128>}, {pipeline_mode = #tpu.pipeline_mode<synchronous>, transform_indices = @transform_1, window_bounds = array<i64: 1152, 128>}, {transform_indices = @transform_2, window_bounds = array<i64: 1, 16, 16, 128>}, {transform_indices = @transform_3, window_bounds = array<i64: 1, 16, 16, 128>}]} {
    %cst = arith.constant 0.000000e+00 : bf16
    %0 = vector.broadcast %cst : bf16 to vector<18x18x128xbf16>
    %c0 = arith.constant 0 : index
    %c0_0 = arith.constant 0 : index
    %c0_1 = arith.constant 0 : index
    %1 = vector.load %arg6[%c0, %c0_0, %c0_1] : memref<18x18x128xbf16, #tpu.memory_space<vmem>>, vector<18x18x128xbf16>
    tpu.vector_store %arg6[%c0, %c0_0, %c0_1], %0 {strides = array<i32>} : memref<18x18x128xbf16, #tpu.memory_space<vmem>>, vector<18x18x128xbf16>,
    %c0_2 = arith.constant 0 : index
    %c0_3 = arith.constant 0 : index
    %c0_4 = arith.constant 0 : index
    %c0_5 = arith.constant 0 : index
    %2 = vector.load %arg2[%c0_2, %c0_3, %c0_4, %c0_5] : memref<1x16x16x128xbf16, #tpu.memory_space<vmem>>, vector<1x16x16x128xbf16>
    %3 = vector.shape_cast %2 : vector<1x16x16x128xbf16> to vector<16x16x128xbf16>
    %c1 = arith.constant 1 : index
    %c1_6 = arith.constant 1 : index
    %c0_7 = arith.constant 0 : index
    %4 = vector.load %arg6[%c1, %c1_6, %c0_7] : memref<18x18x128xbf16, #tpu.memory_space<vmem>>, vector<16x16x128xbf16>
    tpu.vector_store %arg6[%c1, %c1_6, %c0_7], %3 {strides = array<i32>} : memref<18x18x128xbf16, #tpu.memory_space<vmem>>, vector<16x16x128xbf16>,
    %c16_i32 = arith.constant 16 : i32
    %5 = arith.muli %arg1, %c16_i32 : i32
    %c0_i32 = arith.constant 0 : i32
    %6 = arith.addi %5, %c0_i32 : i32
    %7 = arith.index_cast %6 : i32 to index
    %c0_8 = arith.constant 0 : index
    %c0_9 = arith.constant 0 : index
    %8 = vector.load %arg6[%7, %c0_8, %c0_9] : memref<18x18x128xbf16, #tpu.memory_space<vmem>>, vector<16x18x128xbf16>
    %9 = vector.extract_strided_slice %8 {offsets = [0, 0, 0], sizes = [16, 16, 128], strides = [1, 1, 1]} : vector<16x18x128xbf16> to vector<16x16x128xbf16>
    %10 = vector.extract_strided_slice %8 {offsets = [0, 1, 0], sizes = [16, 16, 128], strides = [1, 1, 1]} : vector<16x18x128xbf16> to vector<16x16x128xbf16>
    %11 = vector.extract_strided_slice %8 {offsets = [0, 2, 0], sizes = [16, 16, 128], strides = [1, 1, 1]} : vector<16x18x128xbf16> to vector<16x16x128xbf16>
    %c1_i32 = arith.constant 1 : i32
    %12 = arith.addi %5, %c1_i32 : i32
    %13 = arith.index_cast %12 : i32 to index
    %c0_10 = arith.constant 0 : index
    %c0_11 = arith.constant 0 : index
    %14 = vector.load %arg6[%13, %c0_10, %c0_11] : memref<18x18x128xbf16, #tpu.memory_space<vmem>>, vector<16x18x128xbf16>
    %15 = vector.extract_strided_slice %14 {offsets = [0, 0, 0], sizes = [16, 16, 128], strides = [1, 1, 1]} : vector<16x18x128xbf16> to vector<16x16x128xbf16>
    %16 = vector.extract_strided_slice %14 {offsets = [0, 1, 0], sizes = [16, 16, 128], strides = [1, 1, 1]} : vector<16x18x128xbf16> to vector<16x16x128xbf16>
    %17 = vector.extract_strided_slice %14 {offsets = [0, 2, 0], sizes = [16, 16, 128], strides = [1, 1, 1]} : vector<16x18x128xbf16> to vector<16x16x128xbf16>
    %c2_i32 = arith.constant 2 : i32
    %18 = arith.addi %5, %c2_i32 : i32
    %19 = arith.index_cast %18 : i32 to index
    %c0_12 = arith.constant 0 : index
    %c0_13 = arith.constant 0 : index
    %20 = vector.load %arg6[%19, %c0_12, %c0_13] : memref<18x18x128xbf16, #tpu.memory_space<vmem>>, vector<16x18x128xbf16>
    %21 = vector.extract_strided_slice %20 {offsets = [0, 0, 0], sizes = [16, 16, 128], strides = [1, 1, 1]} : vector<16x18x128xbf16> to vector<16x16x128xbf16>
    %22 = vector.extract_strided_slice %20 {offsets = [0, 1, 0], sizes = [16, 16, 128], strides = [1, 1, 1]} : vector<16x18x128xbf16> to vector<16x16x128xbf16>
    %23 = vector.extract_strided_slice %20 {offsets = [0, 2, 0], sizes = [16, 16, 128], strides = [1, 1, 1]} : vector<16x18x128xbf16> to vector<16x16x128xbf16>
    %24 = tpu.concatenate %9, %10, %11, %15, %16, %17, %21, %22, %23 in 2 : vector<16x16x128xbf16>, vector<16x16x128xbf16>, vector<16x16x128xbf16>, vector<16x16x128xbf16>, vector<16x16x128xbf16>, vector<16x16x128xbf16>, vector<16x16x128xbf16>, vector<16x16x128xbf16>, vector<16x16x128xbf16> -> vector<16x16x1152xbf16>
    %25 = vector.shape_cast %24 : vector<16x16x1152xbf16> to vector<256x1152xbf16>
    %c0_14 = arith.constant 0 : index
    %c0_15 = arith.constant 0 : index
    %26 = vector.load %arg3[%c0_14, %c0_15] : memref<1152x128xbf16, #tpu.memory_space<vmem>>, vector<1152x128xbf16>
    %cst_16 = arith.constant dense<0.000000e+00> : vector<256x128xf32>
    %27 = tpu.matmul %25, %26, %cst_16 {dimension_numbers = #tpu.dot_dimension_numbers<[1], [0], [0], [1], [0, 0, 1, 1], [], []>} : vector<256x1152xbf16>, vector<1152x128xbf16>, vector<256x128xf32> -> vector<256x128xf32>
    %c0_17 = arith.constant 0 : index
    %c0_18 = arith.constant 0 : index
    %c0_19 = arith.constant 0 : index
    %c0_20 = arith.constant 0 : index
    %28 = vector.load %arg4[%c0_17, %c0_18, %c0_19, %c0_20] : memref<1x16x16x128xf32, #tpu.memory_space<vmem>>, vector<1x16x16x128xf32>
    %29 = vector.shape_cast %28 : vector<1x16x16x128xf32> to vector<16x16x128xf32>
    %30 = vector.shape_cast %29 : vector<16x16x128xf32> to vector<256x128xf32>
    %31 = arith.addf %27, %30 : vector<256x128xf32>
    %cst_21 = arith.constant 0.000000e+00 : f32
    %32 = vector.broadcast %cst_21 : f32 to vector<256x128xf32>
    %33 = arith.maximumf %31, %32 : vector<256x128xf32>
    %34 = vector.shape_cast %33 : vector<256x128xf32> to vector<16x16x128xf32>
    %c0_22 = arith.constant 0 : index
    %c0_23 = arith.constant 0 : index
    %c0_24 = arith.constant 0 : index
    %c0_25 = arith.constant 0 : index
    %35 = vector.load %arg5[%c0_22, %c0_23, %c0_24, %c0_25] : memref<1x16x16x128xf32, #tpu.memory_space<vmem>>, vector<1x16x16x128xf32>
    %36 = vector.shape_cast %35 : vector<1x16x16x128xf32> to vector<16x16x128xf32>
    %37 = vector.shape_cast %34 : vector<16x16x128xf32> to vector<1x16x16x128xf32>
    tpu.vector_store %arg5[%c0_22, %c0_23, %c0_24, %c0_25], %37 {strides = array<i32>} : memref<1x16x16x128xf32, #tpu.memory_space<vmem>>, vector<1x16x16x128xf32>,
    return
  }
  func.func @transform_0(%arg0: i32, %arg1: i32) -> (i32, i32, i32, i32) {
    %c0_i32 = arith.constant 0 : i32
    %c0_i32_0 = arith.constant 0 : i32
    %c0_i32_1 = arith.constant 0 : i32
    %c0_i32_2 = arith.constant 0 : i32
    return %arg0, %c0_i32, %c0_i32_0, %c0_i32_1 : i32, i32, i32, i32
  }
  func.func @transform_1(%arg0: i32, %arg1: i32) -> (i32, i32) {
    %c0_i32 = arith.constant 0 : i32
    %c0_i32_0 = arith.constant 0 : i32
    %c0_i32_1 = arith.constant 0 : i32
    return %c0_i32, %c0_i32_0 : i32, i32
  }
  func.func @transform_2(%arg0: i32, %arg1: i32) -> (i32, i32, i32, i32) {
    %c0_i32 = arith.constant 0 : i32
    %c0_i32_0 = arith.constant 0 : i32
    %c0_i32_1 = arith.constant 0 : i32
    return %arg0, %arg1, %c0_i32, %c0_i32_0 : i32, i32, i32, i32
  }
  func.func @transform_3(%arg0: i32, %arg1: i32) -> (i32, i32, i32, i32) {
    %c0_i32 = arith.constant 0 : i32
    %c0_i32_0 = arith.constant 0 : i32
    %c0_i32_1 = arith.constant 0 : i32
    return %arg0, %arg1, %c0_i32, %c0_i32_0 : i32, i32, i32, i32
  }
}

</mosaic_0001>

<bundles_post_ra>
// kernel: basic_block_forward.2
= control target key start
LH: loop header
LB: loop body
LE: loop exit
PB: predicated region body
PF: predicated region fallthrough
CT: control target
= control target key end

     0   :  { %s5146_s9 = smov 0   ;;  %s5148_s10 = smov 0   ;;  %s6384_s0 = inlined_call_operand.vmem [shape: f32[2,16,16,128], index: 0, kind: input, shape index: {}]   ;;  %s6385_s1 = inlined_call_operand.vmem [shape: bf16[1152,128], index: 1, kind: input, shape index: {}]   ;;  %s6386_s2 = inlined_call_operand.vmem [shape: bf16[2,16,16,128], index: 2, kind: output, shape index: {}]  }
   0x1   :  { %s5150_s11 = smov 0  }
   0x2 LB: > { %s24_s12 = sadd.s32 1, %s5124_s10  ;;  %p3873_p0 = scmp.ge.s32.totalorder %s5128_s11, 1  ;;  %s5128_s11 = sphi %s5150_s11, %s12_s11   ;;  %s5124_s10 = sphi %s5148_s10, %s6394_s10   ;;  %s5120_s9 = sphi %s5146_s9, %s6393_s9  }
   0x3   : > { %p26_p1 = scmp.ge.s32.totalorder %s24_s12, 2  ;;  %p126_p2 = scmp.lt.s32.totalorder %s5128_s11, 3 }
   0x5   : > { %s6396_s12 = smov (%p26_p1, %s24_s12), 0  ;;  %p127_p3 = pnand %p3873_p0, %p126_p2 }
   0x6   : > { %v4930_v0 = vld [vmem:[%s6385_s1 + $0x40] sm:$0xff] (!%p127_p3)   ;;  %v5130_v2 = vmov (!%p127_p3), 0   ;;  %v4932_v3 = vld [vmem:[%s6385_s1 + $0x48] sm:$0xff] (!%p127_p3)   ;;  %v4934_v5 = vld [vmem:[%s6385_s1 + $0x50] sm:$0xff] (!%p127_p3)   ;;  %p153_p4 = scmp.lt.s32.totalorder (!%p127_p3), %s5120_s9, 1  ;;  %vm676_vm0 = vcmask (!%p127_p3), 1043456  }
   0x7   : > { %130 = sbr.rel (%p127_p3) target bundleno = 568 (0x238), region = 28  ;;  %v4931_v1 = vld [vmem:[%s6385_s1] sm:$0xff] (!%p127_p3)   ;;  %170 = vst [vmem:[#allocation2] sm:$0xf] (!%p127_p3), %v5130_v2  ;;  %171 = vst [vmem:[#allocation2 + $0x4] sm:$0xf] (!%p127_p3), %v5130_v2  ;;  %4369 = vmatprep.subr.bf16.mxu0 (!%p127_p3), %v4930_v0  ;;  %4889 = vmatprep.subr.bf16.mxu1 (!%p127_p3), %v4930_v0 }
   0x8   : > { %172 = vst [vmem:[#allocation2 + $0x8] sm:$0x1] (!%p127_p3), %v5130_v2  ;;  %173 = vst [vmem:[#allocation2 + $0xc] sm:$0xf] (!%p127_p3), %v5130_v2  ;;  %4370 = vmatpush3.bf16.msra.mxu0 (!%p127_p3), %v4931_v1  ;;  %4897 = vmatpush3.bf16.msra.mxu1 (!%p127_p3), %v4931_v1  ;;  %v4933_v4 = vld [vmem:[%s6385_s1 + $0x8] sm:$0xff] (!%p127_p3)   ;;  %v4935_v6 = vld [vmem:[%s6385_s1 + $0x10] sm:$0xff] (!%p127_p3)  }
   0x9   : > { %174 = vst [vmem:[#allocation2 + $0x10] sm:$0xf] (!%p127_p3), %v5130_v2  ;;  %175 = vst [vmem:[#allocation2 + $0x14] sm:$0x1] (!%p127_p3), %v5130_v2  ;;  %4371 = vmatprep.subr.bf16.mxu0 (!%p127_p3), %v4932_v3  ;;  %4890 = vmatprep.subr.bf16.mxu1 (!%p127_p3), %v4932_v3  ;;  %v4936_v7 = vld [vmem:[%s6385_s1 + $0x58] sm:$0xff] (!%p127_p3)   ;;  %v4938_v9 = vld [vmem:[%s6385_s1 + $0x60] sm:$0xff] (!%p127_p3)  }
   0xa   : > { %176 = vst [vmem:[#allocation2 + $0x18] sm:$0xf] (!%p127_p3), %v5130_v2  ;;  %177 = vst [vmem:[#allocation2 + $0x1c] sm:$0xf] (!%p127_p3), %v5130_v2  ;;  %v4937_v8 = vld [vmem:[%s6385_s1 + $0x18] sm:$0xff] (!%p127_p3)   ;;  %v4939_v10 = vld [vmem:[%s6385_s1 + $0x20] sm:$0xff] (!%p127_p3)  }
   0xb   : > { %178 = vst [vmem:[#allocation2 + $0x20] sm:$0x1] (!%p127_p3), %v5130_v2  ;;  %179 = vst [vmem:[#allocation2 + $0x24] sm:$0xf] (!%p127_p3), %v5130_v2  ;;  %v4940_v11 = vld [vmem:[%s6385_s1 + $0x68] sm:$0xff] (!%p127_p3)   ;;  %vm683_vm1 = vcmask (!%p127_p3), 1040384  }
   0xc   : > { %180 = vst [vmem:[#allocation2 + $0x28] sm:$0xf] (!%p127_p3), %v5130_v2  ;;  %181 = vst [vmem:[#allocation2 + $0x2c] sm:$0x1] (!%p127_p3), %v5130_v2  ;;  %4372 = vmatpush3.bf16.msra.mxu0 (!%p127_p3), %v4933_v4  ;;  %4898 = vmatpush3.bf16.msra.mxu1 (!%p127_p3), %v4933_v4  ;;  %vm1302_vm2 = vcmask (!%p127_p3), 1046528   ;;  %v4941_v16 = vld [vmem:[%s6385_s1 + $0x28] sm:$0xff] (!%p127_p3)  }
   0xd   : > { %182 = vst [vmem:[#allocation2 + $0x30] sm:$0xf] (!%p127_p3), %v5130_v2  ;;  %183 = vst [vmem:[#allocation2 + $0x34] sm:$0xf] (!%p127_p3), %v5130_v2  ;;  %4373 = vmatprep.subr.bf16.mxu0 (!%p127_p3), %v4934_v5  ;;  %4891 = vmatprep.subr.bf16.mxu1 (!%p127_p3), %v4934_v5  ;;  %vm352_vm3 = vsmask.f32 (!%p127_p3), 256 }
   0xe   : > { %184 = vst [vmem:[#allocation2 + $0x38] sm:$0x1] %v5130_v2  ;;  %185 = vst [vmem:[#allocation2 + $0x3c] sm:$0xf] %v5130_v2  ;;  %s6398_s9 = smov (!%p153_p4, %s5120_s9), 1  ;;  %v5209_v12 = vld [vmem:[#allocation2] sm:$0xff]  }
   0xf   : > { %186 = vst [vmem:[#allocation2 + $0x40] sm:$0xf] %v5130_v2  ;;  %187 = vst [vmem:[#allocation2 + $0x44] sm:$0x1] %v5130_v2  ;;  %s4208_s3 = sshll.u32 %s6398_s9, 8  ;;  %v4942_v17 = vld [vmem:[%s6385_s1 + $0x70] sm:$0xff]  }
  0x10   : > { %188 = vst [vmem:[#allocation2 + $0x48] sm:$0xf] %v5130_v2  ;;  %189 = vst [vmem:[#allocation2 + $0x4c] sm:$0xf] %v5130_v2  ;;  %4374 = vmatpush3.bf16.msra.mxu0 %v4935_v6  ;;  %4899 = vmatpush3.bf16.msra.mxu1 %v4935_v6  ;;  %s5207_s14 = scalar_lea.vmem %s6384_s0, %s4208_s3  ;;  %vm353_vm4 = vsmask.f32 4368 }
  0x11   : > { %190 = vst [vmem:[#allocation2 + $0x50] sm:$0x1] %v5130_v2  ;;  %191 = vst [vmem:[#allocation2 + $0x54] sm:$0xf] %v5130_v2  ;;  %4375 = vmatprep.subr.bf16.mxu0 %v4936_v7  ;;  %4892 = vmatprep.subr.bf16.mxu1 %v4936_v7  ;;  %v246_v14 = vld [vmem:[%s5207_s14 + $0xb0] sm:$0xff]  ;;  %v247_v15 = vld [vmem:[%s5207_s14 + $0xb8] sm:$0xff] }
  0x12   : > { %192 = vst [vmem:[#allocation2 + $0x58] sm:$0xf] %v5130_v2  ;;  %193 = vst [vmem:[#allocation2 + $0x5c] sm:$0x1] %v5130_v2  ;;  %v1095_v18 = vshrl.u32 %v5209_v12, 16  ;;  %v1097_v19 = vshll.u32 %v5209_v12, 16  ;;  %v4232_v22 = vpack.c.bf16 %v246_v14, %v246_v14  ;;  %v4233_v23 = vpack.c.bf16 %v247_v15, %v247_v15 }
  0x13   : > { %194 = vst [vmem:[#allocation2 + $0x60] sm:$0xf] %v5130_v2  ;;  %195 = vst [vmem:[#allocation2 + $0x64] sm:$0xf] %v5130_v2  ;;  %vm1093_vm5 = vsmask.f32 7424 }
  0x14   : > { %196 = vst [vmem:[#allocation2 + $0x68] sm:$0x1] %v5130_v2  ;;  %197 = vst [vmem:[#allocation2 + $0x6c] sm:$0xf] %v5130_v2  ;;  %4376 = vmatpush3.bf16.msra.mxu0 %v4937_v8  ;;  %4900 = vmatpush3.bf16.msra.mxu1 %v4937_v8  ;;  %vm677_vm6 = vsmask.f32 7938 }
  0x15   : > { %198 = vst [vmem:[#allocation2 + $0x70] sm:$0xf] %v5130_v2  ;;  %199 = vst [vmem:[#allocation2 + $0x74] sm:$0x1] %v5130_v2  ;;  %4377 = vmatprep.subr.bf16.mxu0 %v4938_v9  ;;  %4893 = vmatprep.subr.bf16.mxu1 %v4938_v9  ;;  %v4943_v24 = vld [vmem:[%s6385_s1 + $0x30] sm:$0xff]   ;;  %v1099_v25 = vrot.slane %v1097_v19, 1 }
  0x16   : > { %200 = vst [vmem:[#allocation2 + $0x78] sm:$0xf] %v5130_v2  ;;  %201 = vst [vmem:[#allocation2 + $0x7c] sm:$0xf] %v5130_v2  ;;  %v1303_v27 = vrot.slane %v5209_v12, 1  ;;  %v4944_v28 = vld [vmem:[%s6385_s1 + $0x78] sm:$0xff]  }
  0x17   : > { %202 = vst [vmem:[#allocation2 + $0x80] sm:$0x1] %v5130_v2  ;;  %203 = vst [vmem:[#allocation2 + $0x84] sm:$0xf] %v5130_v2  ;;  %v543_v30 = vshrl.u32 %v4232_v22, 16  ;;  %v546_v31 = vshll.u32 %v4232_v22, 16  ;;  %v1100_v34 = vor.u32 %v1099_v25, %v1095_v18 }
  0x18   : > { %204 = vst [vmem:[#allocation2 + $0x88] sm:$0xf] %v5130_v2  ;;  %205 = vst [vmem:[#allocation2 + $0x8c] sm:$0x1] %v5130_v2  ;;  %4378 = vmatpush3.bf16.msra.mxu0 %v4939_v10  ;;  %4901 = vmatpush3.bf16.msra.mxu1 %v4939_v10  ;;  %v551_v32 = vshrl.u32 %v4233_v23, 16  ;;  %v554_v33 = vshll.u32 %v4233_v23, 16 }
  0x19   : > { %206 = vst [vmem:[#allocation2 + $0x90] sm:$0xf] %v5130_v2  ;;  %207 = vst [vmem:[#allocation2 + $0x94] sm:$0xf] %v5130_v2  ;;  %4379 = vmatprep.subr.bf16.mxu0 %v4940_v11  ;;  %4894 = vmatprep.subr.bf16.mxu1 %v4940_v11  ;;  %v545_v38 = vrot.slane %v543_v30, 7  ;;  %v4945_v43 = vld [vmem:[%s6385_s1 + $0x38] sm:$0xff]  }
  0x1a   : > { %208 = vst [vmem:[#allocation2 + $0x98] sm:$0x1] %v5130_v2  ;;  %209 = vst [vmem:[#allocation2 + $0x9c] sm:$0xf] %v5130_v2  ;;  %v553_v39 = vrot.slane %v551_v32, 7  ;;  %v224_v48 = vld [vmem:[%s5207_s14] sm:$0xff] }
  0x1b   : > { %210 = vst [vmem:[#allocation2 + $0xa0] sm:$0xf] %v5130_v2  ;;  %211 = vst [vmem:[#allocation2 + $0xa4] sm:$0x1] %v5130_v2  ;;  %v548_v44 = vor.u32 %v546_v31, %v545_v38  ;;  %v549_v45 = vrot.slane %v545_v38, 4  ;;  %v4950_v52 = vld [vmem:[%s6385_s1 + $0xc0] sm:$0xff]   ;;  %v4210_v55 = vpack.c.bf16 %v224_v48, %v224_v48 }
  0x1c   : > { %212 = vst [vmem:[#allocation2 + $0xa8] sm:$0xf] %v5130_v2  ;;  %213 = vst [vmem:[#allocation2 + $0xac] sm:$0xf] %v5130_v2  ;;  %4380 = vmatpush3.bf16.msra.mxu0 %v4941_v16  ;;  %4902 = vmatpush3.bf16.msra.mxu1 %v4941_v16  ;;  %v556_v46 = vor.u32 %v554_v33, %v553_v39  ;;  %v558_v47 = vrot.slane %v553_v39, 4  ;;  %v4953_v53 = vld [vmem:[%s6385_s1 + $0x140] sm:$0xff]  }
  0x1d   : > { %214 = vst [vmem:[#allocation2 + $0xb0] sm:$0x1] %v5130_v2  ;;  %215 = vst [vmem:[#allocation2 + $0xb4] sm:$0xf] %v5130_v2  ;;  %4381 = vmatprep.subr.bf16.mxu0 %v4942_v17  ;;  %4895 = vmatprep.subr.bf16.mxu1 %v4942_v17  ;;  %v225_v54 = vld [vmem:[%s5207_s14 + $0x8] sm:$0xff]  ;;  %v248_v57 = vld [vmem:[%s5207_s14 + $0xc0] sm:$0xff] }
  0x1e   : > { %216 = vst [vmem:[#allocation2 + $0xb8] sm:$0xf] %v5130_v2  ;;  %217 = vst [vmem:[#allocation2 + $0xbc] sm:$0x1] %v5130_v2  ;;  %v4211_v56 = vpack.c.bf16 %v225_v54, %v225_v54  ;;  %v249_v58 = vld [vmem:[%s5207_s14 + $0xc8] sm:$0xff]  ;;  %v4234_v59 = vpack.c.bf16 %v248_v57, %v248_v57  ;;  %v4955_v61 = vld [vmem:[%s6385_s1 + $0x100] sm:$0xff]  }
  0x1f   : > { %218 = vst [vmem:[#allocation2 + $0xc0] sm:$0xf] %v5130_v2  ;;  %219 = vst [vmem:[#allocation2 + $0xc4] sm:$0xf] %v5130_v2  ;;  %v4235_v60 = vpack.c.bf16 %v249_v58, %v249_v58  ;;  %v356_v62 = vshrl.u32 %v4210_v55, 16  ;;  %v359_v63 = vshll.u32 %v4210_v55, 16 }
  0x20   : > { %220 = vst [vmem:[#allocation2 + $0xc8] sm:$0x1] %v5130_v2  ;;  %221 = vst [vmem:[#allocation2 + $0xcc] sm:$0xf] %v5130_v2  ;;  %v758_v36 = vld [vmem:[#allocation2 + $0x90] sm:$0xf]  ;;  %4382 = vmatpush3.bf16.msra.mxu0 %v4943_v24  ;;  %4903 = vmatpush3.bf16.msra.mxu1 %v4943_v24 }
  0x21   : > { %222 = vst [vmem:[#allocation2 + $0xd0] sm:$0xf] %v5130_v2  ;;  %223 = vst [vmem:[#allocation2 + $0xd4] sm:$0x1] %v5130_v2  ;;  %v762_v41 = vld [vmem:[#allocation2 + $0x98] sm:$0x1]  ;;  %4383 = vmatprep.subr.bf16.mxu0 %v4944_v28  ;;  %4896 = vmatprep.subr.bf16.mxu1 %v4944_v28 }
  0x22   : > { %v4947_v13 = vld [vmem:[#allocation2 + $0x8] ss:$0 sps:$4 sm:$0x11]   ;;  %vm5230_vm7 = vmor %vm352_vm3, %vm353_vm4  ;;  %v364_v0 = vshrl.u32 %v4211_v56, 16  ;;  %v367_v1 = vshll.u32 %v4211_v56, 16  ;;  %v560_v4 = vshrl.u32 %v4234_v59, 16 }
  0x23   : > { %v1102_v20 = vshll.u32 %v4947_v13, 16  ;;  %v1304_v21 = vrot.slane %v4947_v13, 1  ;;  %vm5236_vm8 = vmand %vm683_vm1, %vm352_vm3  ;;  %v557_v49 = vsel %vm5230_vm7, %v549_v45, %v556_v46  ;;  %v679_v2 = vld [vmem:[#allocation2 + $0xc] sm:$0xf]  ;;  %v685_v3 = vld [vmem:[#allocation2 + $0x14] sm:$0x1] }
  0x24   : > { %vm5245_vm9 = vmand %vm676_vm0, %vm677_vm6  ;;  %v763_v51 = vsel %vm5236_vm8, %v558_v47, %v762_v41  ;;  %761 = vst [vmem:[#allocation2 + $0x94] sm:$0xf] %v557_v49  ;;  %4384 = vmatpush3.bf16.msra.mxu0 %v4945_v43  ;;  %4904 = vmatpush3.bf16.msra.mxu1 %v4945_v43  ;;  %v563_v5 = vshll.u32 %v4234_v59, 16  ;;  %v568_v6 = vshrl.u32 %v4235_v60, 16  ;;  %v571_v7 = vshll.u32 %v4235_v60, 16  ;;  %v227_v30 = vld [vmem:[%s5207_s14 + $0x18] sm:$0xff] }
  0x25   : > { %v1104_v26 = vrot.slane %v1102_v20, 1  ;;  %v5241_v37 = vsel %vm1302_vm2, %v1303_v27, %v1304_v21  ;;  %v759_v50 = vsel %vm5245_vm9, %v548_v44, %v758_v36  ;;  %764 = vst [vmem:[#allocation2 + $0x98] sm:$0x1] %v763_v51  ;;  %4481 = vmatprep.subr.bf16.mxu1 %v4950_v52  ;;  %4593 = vmatprep.subr.bf16.mxu0 %v4953_v53  ;;  %v358_v8 = vrot.slane %v356_v62, 7  ;;  %v765_v13 = vld [vmem:[#allocation2 + $0x9c] sm:$0xf] }
  0x26   : > { %760 = vst [vmem:[#allocation2 + $0x90] sm:$0xf] %v759_v50  ;;  %v366_v9 = vrot.slane %v364_v0, 7  ;;  %v562_v10 = vrot.slane %v560_v4, 7  ;;  %v570_v11 = vrot.slane %v568_v6, 7  ;;  %v250_v38 = vld [vmem:[%s5207_s14 + $0xd0] sm:$0xff] }
  0x27   : > { %v1105_v42 = vsel %vm1093_vm5, %v1100_v34, %v1104_v26  ;;  %v361_v14 = vor.u32 %v359_v63, %v358_v8  ;;  %v362_v15 = vrot.slane %v358_v8, 4  ;;  %v769_v18 = vld [vmem:[#allocation2 + $0xa4] sm:$0x1]  ;;  %v226_v26 = vld [vmem:[%s5207_s14 + $0x10] sm:$0xff]  ;;  %v251_v39 = vld [vmem:[%s5207_s14 + $0xd8] sm:$0xff]  ;;  %v4236_v48 = vpack.c.bf16 %v250_v38, %v250_v38  ;;  %s4209_s21 = sshll.u32 %s6398_s9, 7 }
  0x28   : > { %2807 = vmatprep.mubr.bf16.mxu0 %v1105_v42  ;;  %v369_v16 = vor.u32 %v367_v1, %v366_v9  ;;  %v371_v17 = vrot.slane %v366_v9, 4  ;;  %v565_v19 = vor.u32 %v563_v5, %v562_v10  ;;  %v573_v20 = vor.u32 %v571_v7, %v570_v11  ;;  %v688_v47 = vld [vmem:[#allocation2 + $0x18] sm:$0xf]  ;;  %v4951_v50 = vld [vmem:[%s6385_s1 + $0x80] sm:$0xff]   ;;  %v4969_v54 = vld [vmem:[%s6385_s1 + $0x148] sm:$0xff]   ;;  %s6317_s24 = scalar_lea.vmem %s6386_s2, %s4209_s21 }
  0x29   : > { %2808 = vmatmul.mubr.bf16.vlgmr.msra.gmra.mrb[0].mxu0 %v5209_v12  ;;  %v680_v12 = vsel %vm5245_vm9, %v361_v14, %v679_v2  ;;  %v566_v25 = vrot.slane %v562_v10, 4  ;;  %v575_v27 = vrot.slane %v570_v11, 4  ;;  %v4212_v31 = vpack.c.bf16 %v226_v26, %v226_v26  ;;  %v4952_v56 = vld [vmem:[%s6385_s1 + $0xc8] sm:$0xff]   ;;  %v692_v63 = vld [vmem:[#allocation2 + $0x20] sm:$0x1]  ;;  %v4961_v38 = vld [vmem:[%s6385_s1 + $0x90] sm:$0xff]  }
  0x2a   : > { %4594 = vmatpush3.bf16.msra.mxu0 %v4955_v61  ;;  %v370_v23 = vsel %vm5230_vm7, %v362_v15, %v369_v16  ;;  %v686_v24 = vsel %vm5236_vm8, %v371_v17, %v685_v3  ;;  %681 = vst [vmem:[#allocation2 + $0xc] sm:$0xf] %v680_v12  ;;  %v766_v28 = vsel %vm5245_vm9, %v565_v19, %v765_v13  ;;  %v577_v57 = vshrl.u32 %v4236_v48, 16  ;;  %v4971_v1 = vld [vmem:[%s6385_s1 + $0x108] sm:$0xff]  }
  0x2b   : > { %682 = vst [vmem:[#allocation2 + $0x10] sm:$0xf] %v370_v23  ;;  %687 = vst [vmem:[#allocation2 + $0x14] sm:$0x1] %v686_v24  ;;  %v574_v36 = vsel %vm5230_vm7, %v566_v25, %v573_v20  ;;  %v770_v41 = vsel %vm5236_vm8, %v575_v27, %v769_v18  ;;  %v4213_v42 = vpack.c.bf16 %v227_v30, %v227_v30  ;;  %v373_v43 = vshrl.u32 %v4212_v31, 16  ;;  %v4954_v13 = vld [vmem:[%s6385_s1 + $0x88] sm:$0xff]  }
  0x2c   : > { %v4949_v22 = vld [vmem:[#allocation2 + $0x98] ss:$0 sps:$4 sm:$0x11]   ;;  %767 = vst [vmem:[#allocation2 + $0x9c] sm:$0xf] %v766_v28  ;;  %v376_v44 = vshll.u32 %v4212_v31, 16  ;;  %v4237_v49 = vpack.c.bf16 %v251_v39, %v251_v39  ;;  %4595 = vmatprep.subr.bf16.mxu0 %v4969_v54 }
  0x2d   : > { %v4948_v21 = vld [vmem:[#allocation2 + $0x90] sm:$0xff]   ;;  %v1246_v34 = vshll.u32 %v4949_v22, 16  ;;  %768 = vst [vmem:[#allocation2 + $0xa0] sm:$0xf] %v574_v36  ;;  %771 = vst [vmem:[#allocation2 + $0xa4] sm:$0x1] %v770_v41 }
  0x2e   : > { %v1239_v32 = vshrl.u32 %v4948_v21, 16  ;;  %v1241_v33 = vshll.u32 %v4948_v21, 16  ;;  %v375_v51 = vrot.slane %v373_v43, 7  ;;  %v381_v52 = vshrl.u32 %v4213_v42, 16  ;;  %v772_v7 = vld [vmem:[#allocation2 + $0xa8] sm:$0xf]  ;;  %4596 = vmatpush3.bf16.msra.mxu0 %v4971_v1 }
  0x2f   : > { %v1248_v46 = vrot.slane %v1246_v34, 1  ;;  %v384_v53 = vshll.u32 %v4213_v42, 16  ;;  %v580_v58 = vshll.u32 %v4236_v48, 16  ;;  %v585_v59 = vshrl.u32 %v4237_v49, 16  ;;  %v776_v18 = vld [vmem:[#allocation2 + $0xb0] sm:$0x1] }
  0x30   : > { %v1243_v45 = vrot.slane %v1241_v33, 1  ;;  %v378_v60 = vor.u32 %v376_v44, %v375_v51  ;;  %v379_v61 = vrot.slane %v375_v51, 4  ;;  %v383_v62 = vrot.slane %v381_v52, 7  ;;  %v4960_v22 = vld [vmem:[%s6385_s1 + $0xd0] sm:$0xff]   ;;  %v228_v28 = vld [vmem:[%s5207_s14 + $0x20] sm:$0xff]  ;;  %v229_v34 = vld [vmem:[%s5207_s14 + $0x28] sm:$0xff] }
  0x31   : > { %v588_v0 = vshll.u32 %v4237_v49, 16  ;;  %v579_v10 = vrot.slane %v577_v57, 7  ;;  %v587_v11 = vrot.slane %v585_v59, 7  ;;  %v4214_v41 = vpack.c.bf16 %v228_v28, %v228_v28  ;;  %v253_v51 = vld [vmem:[%s5207_s14 + $0xe8] sm:$0xff]  ;;  %v4963_v57 = vld [vmem:[%s6385_s1 + $0x98] sm:$0xff]   ;;  %v5098_v40 = vld [vmem:[#allocation2 + $0x90] sm:$0xff]  }
  0x32   : > { %v1244_v55 = vor.u32 %v1243_v45, %v1239_v32  ;;  %v5302_v3 = vld [vmem:[#allocation2 + $0xc] sm:$0xff]   ;;  %v5304_v4 = vld [vmem:[#allocation2 + $0x14] ss:$0 sps:$4 sm:$0x11]   ;;  %v386_v5 = vor.u32 %v384_v53, %v383_v62  ;;  %v689_v6 = vsel %vm5245_vm9, %v378_v60, %v688_v47  ;;  %v388_v9 = vrot.slane %v383_v62, 4  ;;  %v4962_v53 = vld [vmem:[%s6385_s1 + $0xd8] sm:$0xff]  }
  0x33   : > { %690 = vst [vmem:[#allocation2 + $0x18] sm:$0xf] %v689_v6  ;;  %v1107_v14 = vshrl.u32 %v5302_v3, 16  ;;  %v1109_v15 = vshll.u32 %v5302_v3, 16  ;;  %v1114_v16 = vshll.u32 %v5304_v4, 16  ;;  %v582_v12 = vor.u32 %v580_v58, %v579_v10 }
  0x34   : > { %v1249_v2 = vsel %vm1093_vm5, %v1244_v55, %v1248_v46  ;;  %v5308_v8 = vld [vmem:[#allocation2 + $0x9c] sm:$0xff]   ;;  %v387_v17 = vsel %vm5230_vm7, %v379_v61, %v386_v5  ;;  %v4959_v19 = vld [vmem:[#allocation2 + $0xa4] ss:$0 sps:$4 sm:$0x11]   ;;  %v693_v23 = vsel %vm5236_vm8, %v388_v9, %v692_v63  ;;  %v583_v26 = vrot.slane %v579_v10, 4 }
  0x35   : > { %2903 = vmatprep.mubr.bf16.mxu1 %v1249_v2  ;;  %v1251_v20 = vshrl.u32 %v5308_v8, 16  ;;  %691 = vst [vmem:[#allocation2 + $0x1c] sm:$0xf] %v387_v17  ;;  %v1111_v24 = vrot.slane %v1109_v15, 1  ;;  %v1116_v25 = vrot.slane %v1114_v16, 1  ;;  %v590_v27 = vor.u32 %v588_v0, %v587_v11  ;;  %v252_v46 = vld [vmem:[%s5207_s14 + $0xe0] sm:$0xff] }
  0x36   : > { %2904 = vmatmul.mubr.bf16.vlgmr.msra.gmra.mrb[0].mxu1 %v4948_v21  ;;  %v1253_v21 = vshll.u32 %v5308_v8, 16  ;;  %694 = vst [vmem:[#allocation2 + $0x20] sm:$0x1] %v693_v23  ;;  %v1258_v31 = vshll.u32 %v4959_v19, 16  ;;  %v592_v32 = vrot.slane %v587_v11, 4  ;;  %v773_v33 = vsel %vm5245_vm9, %v582_v12, %v772_v7  ;;  %v4968_v2 = vld [vmem:[%s6385_s1 + $0xe0] sm:$0xff]  }
  0x37   : > { %4482 = vmatpush3.bf16.msra.mxu1 %v4951_v50  ;;  %v1112_v36 = vor.u32 %v1111_v24, %v1107_v14  ;;  %v591_v39 = vsel %vm5230_vm7, %v583_v26, %v590_v27  ;;  %774 = vst [vmem:[#allocation2 + $0xa8] sm:$0xf] %v773_v33  ;;  %v4215_v42 = vpack.c.bf16 %v229_v34, %v229_v34  ;;  %v390_v48 = vshrl.u32 %v4214_v41, 16  ;;  %v695_v55 = vld [vmem:[#allocation2 + $0x24] sm:$0xf]  ;;  %v4981_v14 = vld [vmem:[%s6385_s1 + $0x150] sm:$0xff]  }
  0x38   : > { %4483 = vmatprep.subr.bf16.mxu1 %v4952_v56  ;;  %v1255_v30 = vrot.slane %v1253_v21, 1  ;;  %v1260_v44 = vrot.slane %v1258_v31, 1  ;;  %775 = vst [vmem:[#allocation2 + $0xac] sm:$0xf] %v591_v39  ;;  %v777_v45 = vsel %vm5236_vm8, %v592_v32, %v776_v18  ;;  %v393_v49 = vshll.u32 %v4214_v41, 16  ;;  %v4970_v17 = vld [vmem:[%s6385_s1 + $0xa0] sm:$0xff]   ;;  %4597 = vmatprep.subr.bf16.mxu0 %v4981_v14 }
  0x39   : > { %v1117_v47 = vsel %vm1093_vm5, %v1112_v36, %v1116_v25  ;;  %778 = vst [vmem:[#allocation2 + $0xb0] sm:$0x1] %v777_v45  ;;  %v398_v50 = vshrl.u32 %v4215_v42, 16  ;;  %v401_v54 = vshll.u32 %v4215_v42, 16  ;;  %v4238_v56 = vpack.c.bf16 %v252_v46, %v252_v46  ;;  %v699_v7 = vld [vmem:[#allocation2 + $0x2c] sm:$0x1] }
  0x3a   : > { %v1256_v43 = vor.u32 %v1255_v30, %v1251_v20  ;;  %2815 = vmatprep.mubr.bf16.mxu0 %v1117_v47  ;;  %v392_v59 = vrot.slane %v390_v48, 7  ;;  %v4239_v61 = vpack.c.bf16 %v253_v51, %v253_v51  ;;  %v4972_v23 = vld [vmem:[%s6385_s1 + $0xe8] sm:$0xff]   ;;  %v783_v30 = vld [vmem:[#allocation2 + $0xbc] sm:$0x1]  ;;  %v4978_v46 = vld [vmem:[%s6385_s1 + $0xf0] sm:$0xff]  }
  0x3b   : > { %4484 = vmatpush3.bf16.msra.mxu1 %v4954_v13  ;;  %2816 = vmatmul.mubr.bf16.gmra.mrb[4].mxu0 %v5302_v3  ;;  %v400_v60 = vrot.slane %v398_v50, 7  ;;  %v594_v63 = vshrl.u32 %v4238_v56, 16  ;;  %v779_v13 = vld [vmem:[#allocation2 + $0xb4] sm:$0xf]  ;;  %v597_v19 = vshll.u32 %v4238_v56, 16  ;;  %v4973_v42 = vld [vmem:[%s6385_s1 + $0xa8] sm:$0xff]  }
  0x3c   : > { %4485 = vmatprep.subr.bf16.mxu1 %v4960_v22  ;;  %v1261_v52 = vsel %vm1093_vm5, %v1256_v43, %v1260_v44  ;;  %v5347_v58 = vld [vmem:[#allocation2 + $0x18] sm:$0xff]   ;;  %v395_v5 = vor.u32 %v393_v49, %v392_v59  ;;  %v396_v6 = vrot.slane %v392_v59, 4  ;;  %v602_v20 = vshrl.u32 %v4239_v61, 16  ;;  %v4983_v50 = vld [vmem:[%s6385_s1 + $0x110] sm:$0xff]  }
  0x3d   : > { %2911 = vmatprep.mubr.bf16.mxu1 %v1261_v52  ;;  %v5350_v62 = vld [vmem:[#allocation2 + $0x20] ss:$0 sps:$4 sm:$0x11]   ;;  %v1119_v0 = vshrl.u32 %v5347_v58, 16  ;;  %v1121_v1 = vshll.u32 %v5347_v58, 16  ;;  %v403_v10 = vor.u32 %v401_v54, %v400_v60  ;;  %v596_v11 = vrot.slane %v594_v63, 7  ;;  %4598 = vmatpush3.bf16.msra.mxu0 %v4983_v50 }
  0x3e   : > { %2912 = vmatmul.mubr.bf16.gmra.mrb[4].mxu1 %v5308_v8  ;;  %v1126_v9 = vshll.u32 %v5350_v62, 16  ;;  %v405_v8 = vrot.slane %v400_v60, 4  ;;  %v696_v18 = vsel %vm5245_vm9, %v395_v5, %v695_v55  ;;  %v604_v33 = vrot.slane %v602_v20, 7  ;;  %v230_v51 = vld [vmem:[%s5207_s14 + $0x30] sm:$0xff]  ;;  %v231_v55 = vld [vmem:[%s5207_s14 + $0x38] sm:$0xff] }
  0x3f   : > { %4486 = vmatpush3.bf16.msra.mxu1 %v4961_v38  ;;  %v1123_v15 = vrot.slane %v1121_v1, 1  ;;  %v4966_v16 = vld [vmem:[#allocation2 + $0xa8] sm:$0xff]   ;;  %v404_v12 = vsel %vm5230_vm7, %v396_v6, %v403_v10  ;;  %697 = vst [vmem:[#allocation2 + $0x24] sm:$0xf] %v696_v18  ;;  %v599_v28 = vor.u32 %v597_v19, %v596_v11  ;;  %v600_v32 = vrot.slane %v596_v11, 4  ;;  %v4979_v59 = vld [vmem:[%s6385_s1 + $0xb0] sm:$0xff]  }
  0x40   : > { %4487 = vmatprep.subr.bf16.mxu1 %v4962_v53  ;;  %v1128_v21 = vrot.slane %v1126_v9, 1  ;;  %v4967_v22 = vld [vmem:[#allocation2 + $0xb0] ss:$0 sps:$4 sm:$0x11]   ;;  %v700_v24 = vsel %vm5236_vm8, %v405_v8, %v699_v7  ;;  %v1263_v26 = vshrl.u32 %v4966_v16, 16  ;;  %v1265_v27 = vshll.u32 %v4966_v16, 16 }
  0x41   : > { %v1124_v25 = vor.u32 %v1123_v15, %v1119_v0  ;;  %698 = vst [vmem:[#allocation2 + $0x28] sm:$0xf] %v404_v12  ;;  %701 = vst [vmem:[#allocation2 + $0x2c] sm:$0x1] %v700_v24  ;;  %v1270_v31 = vshll.u32 %v4967_v22, 16  ;;  %v605_v34 = vshll.u32 %v4239_v61, 16  ;;  %v780_v39 = vsel %vm5245_vm9, %v599_v28, %v779_v13 }
  0x42   : > { %v1267_v38 = vrot.slane %v1265_v27, 1  ;;  %v609_v44 = vrot.slane %v604_v33, 4  ;;  %781 = vst [vmem:[#allocation2 + $0xb4] sm:$0xf] %v780_v39  ;;  %v4216_v53 = vpack.c.bf16 %v230_v51, %v230_v51  ;;  %v4980_v60 = vld [vmem:[%s6385_s1 + $0xf8] sm:$0xff]   ;;  %v4217_v61 = vpack.c.bf16 %v231_v55, %v231_v55  ;;  %v4987_v11 = vld [vmem:[%s6385_s1 + $0x1c0] sm:$0xff]  }
  0x43   : > { %4488 = vmatpush3.bf16.msra.mxu1 %v4963_v57  ;;  %v1129_v36 = vsel %vm1093_vm5, %v1124_v25, %v1128_v21  ;;  %v1272_v41 = vrot.slane %v1270_v31, 1  ;;  %v607_v43 = vor.u32 %v605_v34, %v604_v33  ;;  %v4982_v6 = vld [vmem:[%s6385_s1 + $0xb8] sm:$0xff]   ;;  %v232_v12 = vld [vmem:[%s5207_s14 + $0x40] sm:$0xff]  ;;  %v233_v27 = vld [vmem:[%s5207_s14 + $0x48] sm:$0xff] }
  0x44   : > { %4489 = vmatprep.subr.bf16.mxu1 %v4968_v2  ;;  %2823 = vmatprep.mubr.bf16.mxu0 %v1129_v36  ;;  %v1268_v45 = vor.u32 %v1267_v38, %v1263_v26  ;;  %v784_v48 = vsel %vm5236_vm8, %v609_v44, %v783_v30  ;;  %v407_v63 = vshrl.u32 %v4216_v53, 16  ;;  %v410_v1 = vshll.u32 %v4216_v53, 16  ;;  %v702_v2 = vld [vmem:[#allocation2 + $0x30] sm:$0xf]  ;;  %v4992_v33 = vld [vmem:[%s6385_s1 + $0x158] sm:$0xff]  }
  0x45   : > { %2824 = vmatmul.mubr.bf16.gmra.mrb[8].mxu0 %v5347_v58  ;;  %v608_v47 = vsel %vm5230_vm7, %v600_v32, %v607_v43  ;;  %785 = vst [vmem:[#allocation2 + $0xbc] sm:$0x1] %v784_v48  ;;  %v415_v9 = vshrl.u32 %v4217_v61, 16  ;;  %v418_v10 = vshll.u32 %v4217_v61, 16  ;;  %v4218_v28 = vpack.c.bf16 %v232_v12, %v232_v12  ;;  %v5426_v39 = vld [vmem:[#allocation2 + $0xc] sm:$0xff]   ;;  %4599 = vmatprep.subr.bf16.mxu0 %v4992_v33  ;;  %v235_v55 = vld [vmem:[%s5207_s14 + $0x58] sm:$0xff] }
  0x46   : > { %v1273_v49 = vsel %vm1093_vm5, %v1268_v45, %v1272_v41  ;;  %782 = vst [vmem:[#allocation2 + $0xb8] sm:$0xf] %v608_v47  ;;  %v409_v7 = vrot.slane %v407_v63, 7  ;;  %v4219_v31 = vpack.c.bf16 %v233_v27, %v233_v27  ;;  %v1306_v32 = vrot.slane %v5302_v3, 1  ;;  %v234_v48 = vld [vmem:[%s5207_s14 + $0x50] sm:$0xff] }
  0x47   : > { %4490 = vmatpush3.bf16.msra.mxu1 %v4970_v17  ;;  %2919 = vmatprep.mubr.bf16.mxu1 %v1273_v49  ;;  %v706_v17 = vld [vmem:[#allocation2 + $0x38] sm:$0x1]  ;;  %v417_v19 = vrot.slane %v415_v9, 7  ;;  %v424_v41 = vshrl.u32 %v4218_v28, 16  ;;  %v427_v43 = vshll.u32 %v4218_v28, 16  ;;  %v4221_v61 = vpack.c.bf16 %v235_v55, %v235_v55 }
  0x48   : > { %4491 = vmatprep.subr.bf16.mxu1 %v4972_v23  ;;  %v5392_v52 = vld [vmem:[#allocation2 + $0x24] sm:$0xff]   ;;  %2920 = vmatmul.mubr.bf16.gmra.mrb[8].mxu1 %v4966_v16  ;;  %v5394_v54 = vld [vmem:[#allocation2 + $0x2c] ss:$0 sps:$4 sm:$0x11]   ;;  %v412_v15 = vor.u32 %v410_v1, %v409_v7  ;;  %v413_v16 = vrot.slane %v409_v7, 4  ;;  %v432_v44 = vshrl.u32 %v4219_v31, 16 }
  0x49   : > { %v1131_v56 = vshrl.u32 %v5392_v52, 16  ;;  %v1133_v57 = vshll.u32 %v5392_v52, 16  ;;  %v1138_v0 = vshll.u32 %v5394_v54, 16  ;;  %v420_v25 = vor.u32 %v418_v10, %v417_v19  ;;  %v709_v51 = vld [vmem:[#allocation2 + $0x3c] sm:$0xf] }
  0x4a   : > { %v703_v23 = vsel %vm5245_vm9, %v412_v15, %v702_v2  ;;  %v422_v26 = vrot.slane %v417_v19, 4  ;;  %v435_v45 = vshll.u32 %v4219_v31, 16  ;;  %v426_v47 = vrot.slane %v424_v41, 7  ;;  %v713_v53 = vld [vmem:[#allocation2 + $0x44] sm:$0x1] }
  0x4b   : > { %4492 = vmatpush3.bf16.msra.mxu1 %v4973_v42  ;;  %v1135_v5 = vrot.slane %v1133_v57, 1  ;;  %v1140_v8 = vrot.slane %v1138_v0, 1  ;;  %704 = vst [vmem:[#allocation2 + $0x30] sm:$0xf] %v703_v23  ;;  %v421_v36 = vsel %vm5230_vm7, %v413_v16, %v420_v25  ;;  %v434_v50 = vrot.slane %v432_v44, 7  ;;  %v4988_v16 = vld [vmem:[%s6385_s1 + $0x180] sm:$0xff]  }
  0x4c   : > { %4493 = vmatprep.subr.bf16.mxu1 %v4978_v46  ;;  %v4977_v18 = vld [vmem:[#allocation2 + $0xbc] ss:$0 sps:$4 sm:$0x11]   ;;  %v707_v38 = vsel %vm5236_vm8, %v422_v26, %v706_v17  ;;  %705 = vst [vmem:[#allocation2 + $0x34] sm:$0xf] %v421_v36  ;;  %v429_v57 = vor.u32 %v427_v43, %v426_v47  ;;  %v452_v7 = vshll.u32 %v4221_v61, 16 }
  0x4d   : > { %v1136_v13 = vor.u32 %v1135_v5, %v1131_v56  ;;  %v4976_v14 = vld [vmem:[#allocation2 + $0xb4] sm:$0xff]   ;;  %v1282_v24 = vshll.u32 %v4977_v18, 16  ;;  %708 = vst [vmem:[#allocation2 + $0x38] sm:$0x1] %v707_v38  ;;  %v4220_v56 = vpack.c.bf16 %v234_v48, %v234_v48  ;;  %v437_v63 = vor.u32 %v435_v45, %v434_v50  ;;  %v716_v9 = vld [vmem:[#allocation2 + $0x48] sm:$0xf] }
  0x4e   : > { %v1275_v21 = vshrl.u32 %v4976_v14, 16  ;;  %v1277_v22 = vshll.u32 %v4976_v14, 16  ;;  %v4993_v46 = vld [vmem:[%s6385_s1 + $0x118] sm:$0xff]   ;;  %v439_v0 = vrot.slane %v434_v50, 4  ;;  %v710_v5 = vsel %vm5245_vm9, %v429_v57, %v709_v51  ;;  %v5000_v26 = vld [vmem:[%s6385_s1 + $0x120] sm:$0xff]   ;;  %v237_v36 = vld [vmem:[%s5207_s14 + $0x68] sm:$0xff] }
  0x4f   : > { %4494 = vmatpush3.bf16.msra.mxu1 %v4979_v59  ;;  %v1141_v20 = vsel %vm1093_vm5, %v1136_v13, %v1140_v8  ;;  %v1284_v34 = vrot.slane %v1282_v24, 1  ;;  %4600 = vmatpush3.bf16.msra.mxu0 %v4993_v46  ;;  %v430_v59 = vrot.slane %v426_v47, 4  ;;  %v441_v1 = vshrl.u32 %v4220_v56, 16  ;;  %711 = vst [vmem:[#allocation2 + $0x3c] sm:$0xf] %v710_v5  ;;  %v5450_v17 = vld [vmem:[#allocation2 + $0x18] sm:$0xff]  }
  0x50   : > { %4495 = vmatprep.subr.bf16.mxu1 %v4980_v60  ;;  %2831 = vmatprep.mubr.bf16.mxu0 %v1141_v20  ;;  %v1279_v30 = vrot.slane %v1277_v22, 1  ;;  %v1307_v60 = vrot.slane %v5304_v4, 1  ;;  %v444_v2 = vshll.u32 %v4220_v56, 16  ;;  %v714_v8 = vsel %vm5236_vm8, %v439_v0, %v713_v53  ;;  %v720_v13 = vld [vmem:[#allocation2 + $0x50] sm:$0x1]  ;;  %v4997_v22 = vld [vmem:[%s6385_s1 + $0x1c8] sm:$0xff]  }
  0x51   : > { %2832 = vmatmul.mubr.bf16.gmra.mrb[12].mxu0 %v5392_v52  ;;  %v438_v10 = vsel %vm5230_vm7, %v430_v59, %v437_v63  ;;  %715 = vst [vmem:[#allocation2 + $0x44] sm:$0x1] %v714_v8  ;;  %v4998_v43 = vld [vmem:[%s6385_s1 + $0x188] sm:$0xff]   ;;  %v4223_v44 = vpack.c.bf16 %v237_v36, %v237_v36  ;;  %v238_v0 = vld [vmem:[%s5207_s14 + $0x70] sm:$0xff] }
  0x52   : > { %v1280_v42 = vor.u32 %v1279_v30, %v1275_v21  ;;  %712 = vst [vmem:[#allocation2 + $0x40] sm:$0xf] %v438_v10  ;;  %v236_v30 = vld [vmem:[%s5207_s14 + $0x60] sm:$0xff]  ;;  %v1308_v53 = vsel %vm1302_vm2, %v1306_v32, %v1307_v60  ;;  %v727_v60 = vld [vmem:[#allocation2 + $0x5c] sm:$0x1]  ;;  %v4224_v5 = vpack.c.bf16 %v238_v0, %v238_v0 }
  0x53   : > { %4496 = vmatpush3.bf16.msra.mxu1 %v4982_v6  ;;  %v449_v6 = vshrl.u32 %v4221_v61, 16  ;;  %v5445_v15 = vld [vmem:[#allocation2 + $0x30] sm:$0xff]   ;;  %v4222_v38 = vpack.c.bf16 %v236_v30, %v236_v30  ;;  %v469_v56 = vshll.u32 %v4223_v44, 16  ;;  %v1310_v61 = vrot.slane %v5350_v62, 1 }
  0x54   : > { %4705 = vmatprep.subr.bf16.mxu1 %v4987_v11  ;;  %v1285_v49 = vsel %vm1093_vm5, %v1280_v42, %v1284_v34  ;;  %v443_v11 = vrot.slane %v441_v1, 7  ;;  %v5452_v19 = vld [vmem:[#allocation2 + $0x38] ss:$0 sps:$4 sm:$0x11]   ;;  %v1143_v23 = vshrl.u32 %v5445_v15, 16  ;;  %v1145_v12 = vshll.u32 %v5445_v15, 16 }
  0x55   : > { %2927 = vmatprep.mubr.bf16.mxu1 %v1285_v49  ;;  %v451_v18 = vrot.slane %v449_v6, 7  ;;  %v1150_v27 = vshll.u32 %v5452_v19, 16  ;;  %v1309_v42 = vrot.slane %v5347_v58, 1  ;;  %v458_v46 = vshrl.u32 %v4222_v38, 16  ;;  %v723_v49 = vld [vmem:[#allocation2 + $0x54] sm:$0xf] }
  0x56   : > { %2928 = vmatmul.mubr.bf16.gmra.mrb[12].mxu1 %v4976_v14  ;;  %v4999_v14 = vld [vmem:[%s6385_s1 + $0x160] sm:$0xff]   ;;  %v446_v20 = vor.u32 %v444_v2, %v443_v11  ;;  %v447_v21 = vrot.slane %v443_v11, 4  ;;  %v1147_v31 = vrot.slane %v1145_v12, 1  ;;  %v461_v47 = vshll.u32 %v4222_v38, 16  ;;  %v239_v1 = vld [vmem:[%s5207_s14 + $0x78] sm:$0xff] }
  0x57   : > { %2968 = vmatprep.mubr.bf16.mxu1 %v5426_v39  ;;  %4601 = vmatprep.subr.bf16.mxu0 %v4999_v14  ;;  %v454_v24 = vor.u32 %v452_v7, %v451_v18  ;;  %v456_v25 = vrot.slane %v451_v18, 4  ;;  %v1152_v41 = vrot.slane %v1150_v27, 1  ;;  %v460_v55 = vrot.slane %v458_v46, 7  ;;  %v5494_v2 = vld [vmem:[#allocation2 + $0x24] sm:$0xff]  }
  0x58   : > { %v717_v28 = vsel %vm5245_vm9, %v446_v20, %v716_v9  ;;  %4602 = vmatpush3.bf16.msra.mxu0 %v5000_v26  ;;  %v1148_v45 = vor.u32 %v1147_v31, %v1143_v23  ;;  %v5480_v51 = vld [vmem:[#allocation2 + $0x44] ss:$0 sps:$4 sm:$0x11]   ;;  %v4225_v11 = vpack.c.bf16 %v239_v1, %v239_v1  ;;  %v475_v20 = vshrl.u32 %v4224_v5, 16  ;;  %v5008_v31 = vld [vmem:[%s6385_s1 + $0x1d0] sm:$0xff]  }
  0x59   : > { %v455_v33 = vsel %vm5230_vm7, %v447_v21, %v454_v24  ;;  %718 = vst [vmem:[#allocation2 + $0x48] sm:$0xf] %v717_v28  ;;  %v721_v34 = vsel %vm5236_vm8, %v456_v25, %v720_v13  ;;  %v5477_v48 = vld [vmem:[#allocation2 + $0x3c] sm:$0xff]   ;;  %v1162_v4 = vshll.u32 %v5480_v51, 16  ;;  %v463_v3 = vor.u32 %v461_v47, %v460_v55  ;;  %v5007_v25 = vld [vmem:[%s6385_s1 + $0x168] sm:$0xff]  }
  0x5a   : > { %719 = vst [vmem:[#allocation2 + $0x4c] sm:$0xf] %v455_v33  ;;  %722 = vst [vmem:[#allocation2 + $0x50] sm:$0x1] %v721_v34  ;;  %v1153_v50 = vsel %vm1093_vm5, %v1148_v45, %v1152_v41  ;;  %v1155_v57 = vshrl.u32 %v5477_v48, 16  ;;  %v1157_v59 = vshll.u32 %v5477_v48, 16  ;;  %4603 = vmatprep.subr.bf16.mxu0 %v5007_v25  ;;  %v1311_v46 = vsel %vm1302_vm2, %v1309_v42, %v1310_v61 }
  0x5b   : > { %2839 = vmatprep.mubr.bf16.mxu0 %v1153_v50  ;;  %v464_v32 = vrot.slane %v460_v55, 4  ;;  %v1164_v10 = vrot.slane %v1162_v4, 1  ;;  %v724_v62 = vsel %vm5245_vm9, %v463_v3, %v723_v49  ;;  %v478_v23 = vshll.u32 %v4224_v5, 16  ;;  %v730_v24 = vld [vmem:[#allocation2 + $0x60] sm:$0xf]  ;;  %v5517_v34 = vld [vmem:[#allocation2 + $0x30] sm:$0xff]  }
  0x5c   : > { %2840 = vmatmul.mubr.bf16.gmra.mrb[16].mxu0 %v5445_v15  ;;  %v1159_v6 = vrot.slane %v1157_v59, 1  ;;  %725 = vst [vmem:[#allocation2 + $0x54] sm:$0xf] %v724_v62  ;;  %v483_v12 = vshrl.u32 %v4225_v11, 16  ;;  %v477_v28 = vrot.slane %v475_v20, 7  ;;  %v486_v30 = vshll.u32 %v4225_v11, 16 }
  0x5d   : > { %v734_v38 = vld [vmem:[#allocation2 + $0x68] sm:$0x1]  ;;  %v1312_v1 = vrot.slane %v5392_v52, 1  ;;  %v1313_v4 = vrot.slane %v5394_v54, 1  ;;  %v1315_v3 = vrot.slane %v5445_v15, 1  ;;  %v5014_v52 = vld [vmem:[%s6385_s1 + $0x170] sm:$0xff]  }
  0x5e   : > { %2969 = vmatmul.mubr.bf16.vlgmr.msra.gmra.mrb[16].mxu1 %v5241_v37  ;;  %v466_v37 = vshrl.u32 %v4223_v44, 16  ;;  %v1160_v13 = vor.u32 %v1159_v6, %v1155_v57  ;;  %v485_v36 = vrot.slane %v483_v12, 7  ;;  %v481_v44 = vrot.slane %v477_v28, 4  ;;  %v5009_v49 = vld [vmem:[%s6385_s1 + $0x128] sm:$0xff]   ;;  %v5015_v12 = vld [vmem:[%s6385_s1 + $0x130] sm:$0xff]  }
  0x5f   : > { %4706 = vmatpush3.bf16.msra.mxu1 %v4988_v16  ;;  %2976 = vmatprep.mubr.bf16.mxu1 %v5450_v17  ;;  %v241_v57 = vld [vmem:[%s5207_s14 + $0x88] sm:$0xff] }
  0x60   : > { %4707 = vmatprep.subr.bf16.mxu1 %v4997_v22  ;;  %v468_v63 = vrot.slane %v466_v37, 7  ;;  %v1165_v26 = vsel %vm1093_vm5, %v1160_v13, %v1164_v10  ;;  %v488_v47 = vor.u32 %v486_v30, %v485_v36  ;;  %v490_v37 = vrot.slane %v485_v36, 4  ;;  %4604 = vmatpush3.bf16.msra.mxu0 %v5009_v49  ;;  %v737_v11 = vld [vmem:[#allocation2 + $0x6c] sm:$0xf]  ;;  %v741_v13 = vld [vmem:[#allocation2 + $0x74] sm:$0x1] }
  0x61   : > { %v5496_v8 = vld [vmem:[#allocation2 + $0x48] sm:$0xff]   ;;  %v5500_v14 = vld [vmem:[#allocation2 + $0x50] ss:$0 sps:$4 sm:$0x11]   ;;  %2847 = vmatprep.mubr.bf16.mxu0 %v1165_v26  ;;  %4605 = vmatprep.subr.bf16.mxu0 %v5014_v52  ;;  %v1316_v30 = vrot.slane %v5452_v19, 1  ;;  %v243_v36 = vld [vmem:[%s5207_s14 + $0x98] sm:$0xff] }
  0x62   : > { %v471_v7 = vor.u32 %v469_v56, %v468_v63  ;;  %v473_v9 = vrot.slane %v468_v63, 4  ;;  %v1167_v21 = vshrl.u32 %v5496_v8, 16  ;;  %v1169_v22 = vshll.u32 %v5496_v8, 16  ;;  %v240_v56 = vld [vmem:[%s5207_s14 + $0x80] sm:$0xff]  ;;  %v5019_v49 = vld [vmem:[%s6385_s1 + $0x1d8] sm:$0xff]  }
  0x63   : > { %4708 = vmatpush3.bf16.msra.mxu1 %v4998_v43  ;;  %v1174_v27 = vshll.u32 %v5500_v14, 16  ;;  %v480_v43 = vor.u32 %v478_v23, %v477_v28  ;;  %v489_v58 = vsel %vm5230_vm7, %v481_v44, %v488_v47  ;;  %v735_v42 = vsel %vm5236_vm8, %v490_v37, %v734_v38  ;;  %v5577_v37 = vld [vmem:[#allocation2 + $0x48] sm:$0xff]  }
  0x64   : > { %v472_v16 = vsel %vm5230_vm7, %v464_v32, %v471_v7  ;;  %v728_v18 = vsel %vm5236_vm8, %v473_v9, %v727_v60  ;;  %v1171_v33 = vrot.slane %v1169_v22, 1  ;;  %4709 = vmatprep.subr.bf16.mxu1 %v5008_v31  ;;  %2848 = vmatmul.mubr.bf16.gmra.mrb[20].mxu0 %v5477_v48  ;;  %733 = vst [vmem:[#allocation2 + $0x64] sm:$0xf] %v489_v58  ;;  %736 = vst [vmem:[#allocation2 + $0x68] sm:$0x1] %v735_v42  ;;  %v5549_v9 = vld [vmem:[#allocation2 + $0x3c] sm:$0xff]  }
  0x65   : > { %726 = vst [vmem:[#allocation2 + $0x58] sm:$0xf] %v472_v16  ;;  %729 = vst [vmem:[#allocation2 + $0x5c] sm:$0x1] %v728_v18  ;;  %v1176_v41 = vrot.slane %v1174_v27, 1  ;;  %v731_v50 = vsel %vm5245_vm9, %v480_v43, %v730_v24  ;;  %v4226_v61 = vpack.c.bf16 %v240_v56, %v240_v56  ;;  %v4227_v63 = vpack.c.bf16 %v241_v57, %v241_v57 }
  0x66   : > { %2977 = vmatmul.mubr.bf16.gmra.mrb[20].mxu1 %v1308_v53  ;;  %v1172_v45 = vor.u32 %v1171_v33, %v1167_v21  ;;  %v5010_v53 = vld [vmem:[%s6385_s1 + $0x190] sm:$0xff]   ;;  %732 = vst [vmem:[#allocation2 + $0x60] sm:$0xf] %v731_v50  ;;  %v1314_v18 = vsel %vm1302_vm2, %v1312_v1, %v1313_v4  ;;  %4606 = vmatpush3.bf16.msra.mxu0 %v5015_v12  ;;  %v1318_v57 = vrot.slane %v5477_v48, 1  ;;  %v244_v1 = vld [vmem:[%s5207_s14 + $0xa0] sm:$0xff]  ;;  %v1319_v4 = vrot.slane %v5480_v51, 1 }
  0x67   : > { %2984 = vmatprep.mubr.bf16.mxu1 %v5494_v2  ;;  %4710 = vmatpush3.bf16.msra.mxu1 %v5010_v53  ;;  %v492_v5 = vshrl.u32 %v4226_v61, 16  ;;  %v495_v6 = vshll.u32 %v4226_v61, 16  ;;  %v500_v10 = vshrl.u32 %v4227_v63, 16  ;;  %v503_v62 = vshll.u32 %v4227_v63, 16  ;;  %v242_v33 = vld [vmem:[%s5207_s14 + $0x90] sm:$0xff]  ;;  %v5020_v63 = vld [vmem:[%s6385_s1 + $0x198] sm:$0xff]  }
  0x68   : > { %v1177_v55 = vsel %vm1093_vm5, %v1172_v45, %v1176_v41  ;;  %v4228_v45 = vpack.c.bf16 %v242_v33, %v242_v33  ;;  %v1317_v56 = vsel %vm1302_vm2, %v1315_v3, %v1316_v30  ;;  %4711 = vmatprep.subr.bf16.mxu1 %v5019_v49  ;;  %v5024_v30 = vld [vmem:[%s6385_s1 + $0x178] sm:$0xff]   ;;  %v1731_v29 = vrot.slane %v5549_v9, 1 }
  0x69   : > { %2855 = vmatprep.mubr.bf16.mxu0 %v1177_v55  ;;  %v494_v15 = vrot.slane %v492_v5, 7  ;;  %v502_v20 = vrot.slane %v500_v10, 7  ;;  %v744_v5 = vld [vmem:[#allocation2 + $0x78] sm:$0xf]  ;;  %4607 = vmatprep.subr.bf16.mxu0 %v5024_v30  ;;  %v1719_v30 = vrot.slane %v5426_v39, 1 }
  0x6a   : > { %v509_v53 = vshrl.u32 %v4228_v45, 16  ;;  %v512_v55 = vshll.u32 %v4228_v45, 16 }
  0x6b   : > { %v497_v22 = vor.u32 %v495_v6, %v494_v15  ;;  %v498_v23 = vrot.slane %v494_v15, 4  ;;  %v505_v25 = vor.u32 %v503_v62, %v502_v20  ;;  %v507_v26 = vrot.slane %v502_v20, 4  ;;  %v5562_v28 = vld [vmem:[#allocation2 + $0x68] ss:$0 sps:$4 sm:$0x11]   ;;  %4712 = vmatpush3.bf16.msra.mxu1 %v5020_v63  ;;  %v5029_v63 = vld [vmem:[%s6385_s1 + $0x1a0] sm:$0xff]  }
  0x6c   : > { %v5538_v59 = vld [vmem:[#allocation2 + $0x54] sm:$0xff]   ;;  %v5540_v0 = vld [vmem:[#allocation2 + $0x5c] ss:$0 sps:$4 sm:$0x11]   ;;  %2856 = vmatmul.mubr.bf16.gmra.mrb[24].mxu0 %v5496_v8  ;;  %v1198_v44 = vshll.u32 %v5562_v28, 16  ;;  %v245_v6 = vld [vmem:[%s5207_s14 + $0xa8] sm:$0xff] }
  0x6d   : > { %v1179_v32 = vshrl.u32 %v5538_v59, 16  ;;  %v1181_v60 = vshll.u32 %v5538_v59, 16  ;;  %v1186_v7 = vshll.u32 %v5540_v0, 16  ;;  %v5559_v24 = vld [vmem:[#allocation2 + $0x60] sm:$0xff]   ;;  %v738_v31 = vsel %vm5245_vm9, %v497_v22, %v737_v11 }
  0x6e   : > { %2985 = vmatmul.mubr.bf16.gmra.mrb[24].mxu1 %v1311_v46  ;;  %v1191_v38 = vshrl.u32 %v5559_v24, 16  ;;  %v1193_v41 = vshll.u32 %v5559_v24, 16  ;;  %v506_v43 = vsel %vm5230_vm7, %v498_v23, %v505_v25  ;;  %739 = vst [vmem:[#allocation2 + $0x6c] sm:$0xf] %v738_v31  ;;  %v742_v19 = vsel %vm5236_vm8, %v507_v26, %v741_v13  ;;  %v748_v62 = vld [vmem:[#allocation2 + $0x80] sm:$0x1] }
  0x6f   : > { %2992 = vmatprep.mubr.bf16.mxu1 %v5517_v34  ;;  %v1183_v54 = vrot.slane %v1181_v60, 1  ;;  %v1188_v16 = vrot.slane %v1186_v7, 1  ;;  %740 = vst [vmem:[#allocation2 + $0x70] sm:$0xf] %v506_v43  ;;  %743 = vst [vmem:[#allocation2 + $0x74] sm:$0x1] %v742_v19  ;;  %v4229_v46 = vpack.c.bf16 %v243_v36, %v243_v36  ;;  %v4230_v7 = vpack.c.bf16 %v244_v1, %v244_v1 }
  0x70   : > { %v1195_v47 = vrot.slane %v1193_v41, 1  ;;  %v1200_v50 = vrot.slane %v1198_v44, 1  ;;  %v4231_v3 = vpack.c.bf16 %v245_v6, %v245_v6  ;;  %v751_v22 = vld [vmem:[#allocation2 + $0x84] sm:$0xf]  ;;  %v5605_v25 = vld [vmem:[#allocation2 + $0x54] sm:$0xff]   ;;  %v1320_v36 = vsel %vm1302_vm2, %v1318_v57, %v1319_v4 }
  0x71   : > { %v1184_v21 = vor.u32 %v1183_v54, %v1179_v32  ;;  %v517_v58 = vshrl.u32 %v4229_v46, 16  ;;  %v520_v61 = vshll.u32 %v4229_v46, 16  ;;  %v511_v32 = vrot.slane %v509_v53, 7  ;;  %v5025_v31 = vld [vmem:[%s6385_s1 + $0x138] sm:$0xff]   ;;  %v755_v41 = vld [vmem:[#allocation2 + $0x8c] sm:$0x1] }
  0x72   : > { %v1196_v42 = vor.u32 %v1195_v47, %v1191_v38  ;;  %v526_v51 = vshrl.u32 %v4230_v7, 16  ;;  %v537_v38 = vshll.u32 %v4231_v3, 16  ;;  %v5028_v46 = vld [vmem:[%s6385_s1 + $0x1e0] sm:$0xff]   ;;  %4608 = vmatpush3.bf16.msra.mxu0 %v5025_v31 }
  0x73   : > { %v1189_v27 = vsel %vm1093_vm5, %v1184_v21, %v1188_v16  ;;  %v519_v60 = vrot.slane %v517_v58, 7  ;;  %v514_v48 = vor.u32 %v512_v55, %v511_v32  ;;  %v515_v11 = vrot.slane %v511_v32, 4  ;;  %4713 = vmatprep.subr.bf16.mxu1 %v5028_v46  ;;  %v5646_v6 = vld [vmem:[#allocation2 + $0x60] sm:$0xff]  }
  0x74   : > { %2863 = vmatprep.mubr.bf16.mxu0 %v1189_v27  ;;  %v1201_v10 = vsel %vm1093_vm5, %v1196_v42, %v1200_v50  ;;  %v529_v21 = vshll.u32 %v4230_v7, 16  ;;  %v528_v26 = vrot.slane %v526_v51, 7  ;;  %v534_v27 = vshrl.u32 %v4231_v3, 16  ;;  %4714 = vmatpush3.bf16.msra.mxu1 %v5029_v63 }
  0x75   : > { %2864 = vmatmul.mubr.bf16.gmra.mrb[28].mxu0 %v5538_v59  ;;  %v522_v52 = vor.u32 %v520_v61, %v519_v60  ;;  %v524_v54 = vrot.slane %v519_v60, 4  ;;  %v1321_v58 = vrot.slane %v5496_v8, 1 }
  0x76   : > { %2993 = vmatmul.mubr.bf16.gmra.mrb[28].mxu1 %v1314_v18  ;;  %2871 = vmatprep.mubr.bf16.mxu0 %v1201_v10  ;;  %v5592_v15 = vld [vmem:[#allocation2 + $0x6c] sm:$0xff]   ;;  %v5595_v13 = vld [vmem:[#allocation2 + $0x74] ss:$0 sps:$4 sm:$0x11]   ;;  %v745_v18 = vsel %vm5245_vm9, %v514_v48, %v744_v5  ;;  %v531_v19 = vor.u32 %v529_v21, %v528_v26  ;;  %v532_v44 = vrot.slane %v528_v26, 4  ;;  %v536_v45 = vrot.slane %v534_v27, 7 }
  0x77   : > { %3000 = vmatprep.mubr.bf16.mxu1 %v5549_v9  ;;  %v523_v16 = vsel %vm5230_vm7, %v515_v11, %v522_v52  ;;  %v749_v20 = vsel %vm5236_vm8, %v524_v54, %v748_v62  ;;  %v1203_v23 = vshrl.u32 %v5592_v15, 16  ;;  %v1205_v12 = vshll.u32 %v5592_v15, 16  ;;  %746 = vst [vmem:[#allocation2 + $0x78] sm:$0xf] %v745_v18  ;;  %v5036_v26 = vld [vmem:[%s6385_s1 + $0x1a8] sm:$0xff]  }
  0x78   : > { %747 = vst [vmem:[#allocation2 + $0x7c] sm:$0xf] %v523_v16  ;;  %750 = vst [vmem:[#allocation2 + $0x80] sm:$0x1] %v749_v20  ;;  %v1210_v33 = vshll.u32 %v5595_v13, 16  ;;  %v539_v50 = vor.u32 %v537_v38, %v536_v45  ;;  %v541_v53 = vrot.slane %v536_v45, 4  ;;  %v752_v55 = vsel %vm5245_vm9, %v531_v19, %v751_v22 }
  0x79   : > { %v1207_v43 = vrot.slane %v1205_v12, 1  ;;  %753 = vst [vmem:[#allocation2 + $0x84] sm:$0xf] %v752_v55  ;;  %v1324_v62 = vrot.slane %v5538_v59, 1  ;;  %v1325_v11 = vrot.slane %v5540_v0, 1  ;;  %v5035_v59 = vld [vmem:[%s6385_s1 + $0x1e8] sm:$0xff]  }
  0x7a   : > { %v1212_v47 = vrot.slane %v1210_v33, 1  ;;  %v540_v57 = vsel %vm5230_vm7, %v532_v44, %v539_v50  ;;  %v756_v61 = vsel %vm5236_vm8, %v541_v53, %v755_v41  ;;  %v5027_v54 = vld [vmem:[#allocation2 + $0x14] ss:$0 sps:$4 sm:$0x11]   ;;  %v5665_v22 = vld [vmem:[#allocation2 + $0x6c] sm:$0xff]   ;;  %v1514_v12 = vshll.u32 %v5426_v39, 16  ;;  %4715 = vmatprep.subr.bf16.mxu1 %v5035_v59 }
  0x7b   : > { %v1208_v49 = vor.u32 %v1207_v43, %v1203_v23  ;;  %754 = vst [vmem:[#allocation2 + $0x88] sm:$0xf] %v540_v57  ;;  %757 = vst [vmem:[#allocation2 + $0x8c] sm:$0x1] %v756_v61  ;;  %v1326_v0 = vsel %vm1302_vm2, %v1324_v62, %v1325_v11  ;;  %v1720_v31 = vrot.slane %v5027_v54, 1  ;;  %v1327_v33 = vrot.slane %v5559_v24, 1  ;;  %4716 = vmatpush3.bf16.msra.mxu1 %v5036_v26 }
  0x7c   : > { %v1328_v38 = vrot.slane %v5562_v28, 1  ;;  %v1512_v41 = vshrl.u32 %v5426_v39, 16  ;;  %v1519_v43 = vshll.u32 %v5027_v54, 16  ;;  %v1516_v19 = vrot.slane %v1514_v12, 1  ;;  %v5049_v11 = vld [vmem:[%s6385_s1 + $0x1f8] sm:$0xff]  }
  0x7d   : > { %2872 = vmatmul.mubr.bf16.gmra.mrb[32].mxu0 %v5559_v24  ;;  %v1213_v42 = vsel %vm1093_vm5, %v1208_v49, %v1212_v47  ;;  %v1721_v44 = vsel %vm1302_vm2, %v1719_v30, %v1720_v31  ;;  %v5032_v45 = vld [vmem:[#allocation2 + $0x20] ss:$0 sps:$4 sm:$0x11]   ;;  %v5042_v47 = vld [vmem:[%s6385_s1 + $0x1f0] sm:$0xff]   ;;  %v1526_v49 = vshll.u32 %v5450_v17, 16  ;;  %v1722_v50 = vrot.slane %v5450_v17, 1 }
  0x7e   : > { %3001 = vmatmul.mubr.bf16.gmra.mrb[32].mxu1 %v1317_v56  ;;  %v1322_v56 = vrot.slane %v5500_v14, 1  ;;  %2879 = vmatprep.mubr.bf16.mxu0 %v1213_v42  ;;  %v5639_v14 = vld [vmem:[%s6385_s1 + $0x200] sm:$0xff]   ;;  %v1329_v46 = vsel %vm1302_vm2, %v1327_v33, %v1328_v38  ;;  %v1517_v28 = vor.u32 %v1516_v19, %v1512_v41  ;;  %v1521_v39 = vrot.slane %v1519_v43, 1  ;;  %v5050_v59 = vld [vmem:[%s6385_s1 + $0x1b8] sm:$0xff]   ;;  %v5726_v31 = vld [vmem:[#allocation2 + $0x90] sm:$0xff]  }
  0x7f   : > { %3008 = vmatprep.mubr.bf16.mxu1 %v5577_v37  ;;  %v5632_v8 = vld [vmem:[#allocation2 + $0x78] sm:$0xff]   ;;  %v5634_v1 = vld [vmem:[#allocation2 + $0x80] ss:$0 sps:$4 sm:$0x11]   ;;  %4841 = vmatprep.subr.bf16.mxu0 %v5639_v14  ;;  %v1723_v53 = vrot.slane %v5032_v45, 1  ;;  %v1330_v55 = vrot.slane %v5592_v15, 1 }
  0x80   : > { %v1215_v4 = vshrl.u32 %v5632_v8, 16  ;;  %v1217_v32 = vshll.u32 %v5632_v8, 16  ;;  %v1222_v60 = vshll.u32 %v5634_v1, 16  ;;  %v1323_v5 = vsel %vm1302_vm2, %v1321_v58, %v1322_v56  ;;  %v5680_v24 = vld [vmem:[#allocation2 + $0x78] sm:$0xff]   ;;  %4717 = vmatprep.subr.bf16.mxu1 %v5042_v47  ;;  %v5043_v56 = vld [vmem:[%s6385_s1 + $0x1b0] sm:$0xff]  }
  0x81   : > { %v1331_v58 = vrot.slane %v5595_v13, 1  ;;  %v1524_v42 = vshrl.u32 %v5450_v17, 16  ;;  %v1522_v57 = vsel %vm1093_vm5, %v1517_v28, %v1521_v39  ;;  %v1528_v61 = vrot.slane %v1526_v49, 1  ;;  %4718 = vmatpush3.bf16.msra.mxu1 %v5043_v56 }
  0x82   : > { %v1219_v7 = vrot.slane %v1217_v32, 1  ;;  %v1224_v10 = vrot.slane %v1222_v60, 1  ;;  %v5650_v48 = vld [vmem:[#allocation2 + $0x84] sm:$0xff]   ;;  %v5654_v52 = vld [vmem:[#allocation2 + $0x8c] ss:$0 sps:$4 sm:$0x11]   ;;  %4719 = vmatprep.subr.bf16.mxu1 %v5049_v11 }
  0x83   : > { %v1227_v16 = vshrl.u32 %v5650_v48, 16  ;;  %v1229_v18 = vshll.u32 %v5650_v48, 16  ;;  %v1234_v20 = vshll.u32 %v5654_v52, 16  ;;  %v1531_v63 = vshll.u32 %v5032_v45, 16  ;;  %v5700_v17 = vld [vmem:[#allocation2 + $0x84] sm:$0xff]  }
  0x84   : > { %v1220_v3 = vor.u32 %v1219_v7, %v1215_v4  ;;  %v1724_v4 = vsel %vm1302_vm2, %v1722_v50, %v1723_v53  ;;  %v5034_v32 = vld [vmem:[#allocation2 + $0x2c] ss:$0 sps:$4 sm:$0x11]   ;;  %v1332_v13 = vsel %vm1302_vm2, %v1330_v55, %v1331_v58  ;;  %v1538_v60 = vshll.u32 %v5494_v2, 16  ;;  %v786_v53 = vld [vmem:[#allocation2 + $0xc0] sm:$0xf] }
  0x85   : > { %2880 = vmatmul.mubr.bf16.gmra.mrb[36].mxu0 %v5592_v15  ;;  %v1231_v21 = vrot.slane %v1229_v18, 1  ;;  %v1236_v23 = vrot.slane %v1234_v20, 1  ;;  %v5037_v15 = vld [vmem:[%s6385_s1 + $0x208] sm:$0xff]   ;;  %v1533_v7 = vrot.slane %v1531_v63, 1  ;;  %v1726_v62 = vrot.slane %v5034_v32, 1  ;;  %4720 = vmatpush3.bf16.msra.mxu1 %v5050_v59 }
  0x86   : > { %3009 = vmatmul.mubr.bf16.gmra.mrb[36].mxu1 %v1320_v36  ;;  %v1225_v51 = vsel %vm1093_vm5, %v1220_v3, %v1224_v10  ;;  %v1725_v10 = vrot.slane %v5494_v2, 1  ;;  %v5044_v3 = vld [vmem:[%s6385_s1 + $0x210] sm:$0xff]   ;;  %v1333_v54 = vrot.slane %v5632_v8, 1  ;;  %v1540_v18 = vrot.slane %v1538_v60, 1 }
  0x87   : > { %3016 = vmatprep.mubr.bf16.mxu1 %v5605_v25  ;;  %2887 = vmatprep.mubr.bf16.mxu0 %v1225_v51  ;;  %v1232_v27 = vor.u32 %v1231_v21, %v1227_v16  ;;  %v1536_v51 = vshrl.u32 %v5494_v2, 16  ;;  %v1543_v16 = vshll.u32 %v5034_v32, 16  ;;  %v5039_v20 = vld [vmem:[#allocation2 + $0x38] ss:$0 sps:$4 sm:$0x11]   ;;  %v1550_v33 = vshll.u32 %v5517_v34, 16 }
  0x88   : > { %v5051_v2 = vld [vmem:[%s6385_s1 + $0x218] sm:$0xff]   ;;  %v1728_v43 = vrot.slane %v5517_v34, 1  ;;  %v1729_v19 = vrot.slane %v5039_v20, 1  ;;  %v1336_v45 = vrot.slane %v5650_v48, 1  ;;  %v1548_v49 = vshrl.u32 %v5517_v34, 16 }
  0x89   : > { %v1237_v36 = vsel %vm1093_vm5, %v1232_v27, %v1236_v23  ;;  %v1541_v27 = vor.u32 %v1540_v18, %v1536_v51  ;;  %v1545_v30 = vrot.slane %v1543_v16, 1  ;;  %v1552_v50 = vrot.slane %v1550_v33, 1  ;;  %v5046_v51 = vld [vmem:[#allocation2 + $0x50] ss:$0 sps:$4 sm:$0x11]   ;;  %v5756_v18 = vld [vmem:[#allocation2 + $0xa8] sm:$0xff]  }
  0x8a   : > { %v1555_v55 = vshll.u32 %v5039_v20, 16  ;;  %v1579_v33 = vshll.u32 %v5046_v51, 16 }
  0x8b   : > { %v1546_v39 = vsel %vm1093_vm5, %v1541_v27, %v1545_v30  ;;  %v1553_v32 = vor.u32 %v1552_v50, %v1548_v49  ;;  %v1572_v27 = vshrl.u32 %v5577_v37, 16  ;;  %v5102_v49 = vld [vmem:[#allocation2 + $0xa8] sm:$0xff]  }
  0x8c   : > { %v1345_v50 = vrot.slane %v5102_v49, 1  ;;  %v5063_v49 = vld [vmem:[#allocation2 + $0x38] ss:$0 sps:$4 sm:$0x11]  }
  0x8d   : > { %2888 = vmatmul.mubr.bf16.gmra.mrb[40].mxu0 %v5632_v8  ;;  %v1727_v8 = vsel %vm1302_vm2, %v1725_v10, %v1726_v62  ;;  %v1560_v62 = vshrl.u32 %v5549_v9, 16 }
  0x8e   : > { %3017 = vmatmul.mubr.bf16.gmra.mrb[40].mxu1 %v1323_v5  ;;  %2895 = vmatprep.mubr.bf16.mxu0 %v1237_v36  ;;  %v1529_v5 = vor.u32 %v1528_v61, %v1524_v42 }
  0x8f   : > { %3024 = vmatprep.mubr.bf16.mxu1 %v5646_v6 }
  0x90   : > { %v1534_v21 = vsel %vm1093_vm5, %v1529_v5, %v1533_v7  ;;  %v1339_v5 = vrot.slane %v5098_v40, 1  ;;  %v5099_v7 = vld [vmem:[#allocation2 + $0x98] ss:$0 sps:$4 sm:$0x11]  }
  0x91   : > { %v1340_v10 = vrot.slane %v5099_v7, 1  ;;  %v1740_v7 = vrot.slane %v5646_v6, 1 }
  0x93   : > { %v1341_v16 = vsel %vm1302_vm2, %v1339_v5, %v1340_v10 }
  0x95   : > { %2896 = vmatmul.mubr.bf16.gmra.mrb[44].mxu0 %v5650_v48  ;;  %v1730_v48 = vsel %vm1302_vm2, %v1728_v43, %v1729_v19  ;;  %v5768_v43 = vld [vmem:[#allocation2 + $0xb4] sm:$0xff]  }
  0x96   : > { %3025 = vmatmul.mubr.bf16.gmra.mrb[44].mxu1 %v1326_v0  ;;  %3129 = vmatprep.mubr.bf16.mxu0 %v1721_v44  ;;  %v255_v0 = vld [vmem:[%s5207_s14 + $0xf8] sm:$0xff] }
  0x97   : > { %3032 = vmatprep.mubr.bf16.mxu1 %v5665_v22  ;;  %v4241_v12 = vpack.c.bf16 %v255_v0, %v255_v0 }
  0x99   : > { %v619_v41 = vshrl.u32 %v4241_v12, 16  ;;  %v622_v44 = vshll.u32 %v4241_v12, 16 }
  0x9b   : > { %v5732_v28 = vrot.slane %v619_v41, 7 }
  0x9d   : > { %3130 = vmatmul.mubr.bf16.vlgmr.msra.gmra.mrb[48].mxu0 %v1522_v57  ;;  %v624_v56 = vor.u32 %v622_v44, %v5732_v28  ;;  %v5057_v57 = vld [vmem:[%s6385_s1 + $0x220] sm:$0xff]   ;;  %v1581_v44 = vrot.slane %v1579_v33, 1 }
  0x9e   : > { %3033 = vmatmul.mubr.bf16.gmra.mrb[48].mxu1 %v1329_v46  ;;  %4842 = vmatpush3.bf16.msra.mxu0 %v5639_v14  ;;  %v1334_v14 = vrot.slane %v5634_v1, 1  ;;  %v254_v1 = vld [vmem:[%s5207_s14 + $0xf0] sm:$0xff]  ;;  %v1337_v46 = vrot.slane %v5654_v52, 1  ;;  %v5041_v52 = vld [vmem:[#allocation2 + $0x44] ss:$0 sps:$4 sm:$0x11]  }
  0x9f   : > { %3040 = vmatprep.mubr.bf16.mxu1 %v5680_v24  ;;  %3137 = vmatprep.mubr.bf16.mxu0 %v1724_v4  ;;  %v4240_v23 = vpack.c.bf16 %v254_v1, %v254_v1  ;;  %v5747_v4 = vld [vmem:[#allocation2 + $0x9c] sm:$0xff]   ;;  %v1732_v60 = vrot.slane %v5041_v52, 1 }
  0xa0   : > { %4843 = vmatprep.subr.bf16.mxu0 %v5037_v15  ;;  %v1335_v26 = vsel %vm1302_vm2, %v1333_v54, %v1334_v14  ;;  %v1338_v63 = vsel %vm1302_vm2, %v1336_v45, %v1337_v46  ;;  %v1567_v54 = vshll.u32 %v5041_v52, 16  ;;  %v5100_v1 = vld [vmem:[#allocation2 + $0x9c] sm:$0xff]   ;;  %v1586_v45 = vshll.u32 %v5605_v25, 16 }
  0xa1   : > { %v611_v36 = vshrl.u32 %v4240_v23, 16  ;;  %v614_v38 = vshll.u32 %v4240_v23, 16  ;;  %v1733_v14 = vsel %vm1302_vm2, %v1731_v29, %v1732_v60  ;;  %v1342_v0 = vrot.slane %v5100_v1, 1  ;;  %v5101_v23 = vld [vmem:[#allocation2 + $0xa4] ss:$0 sps:$4 sm:$0x11]  }
  0xa2   : > { %4844 = vmatpush3.bf16.msra.mxu0 %v5037_v15  ;;  %v1557_v15 = vrot.slane %v1555_v55, 1  ;;  %v1569_v59 = vrot.slane %v1567_v54, 1  ;;  %v1343_v12 = vrot.slane %v5101_v23, 1  ;;  %v5771_v46 = vld [vmem:[#allocation2 + $0x18] sm:$0xff]   ;;  %v1588_v52 = vrot.slane %v1586_v45, 1 }
  0xa3   : > { %4845 = vmatprep.subr.bf16.mxu0 %v5044_v3  ;;  %v613_v47 = vrot.slane %v611_v36, 7  ;;  %v1928_v60 = vshrl.u32 %v5771_v46, 16  ;;  %v790_v1 = vld [vmem:[#allocation2 + $0xc8] sm:$0x1]  ;;  %v626_v23 = vrot.slane %v5732_v28, 4  ;;  %v2135_v28 = vrot.slane %v5771_v46, 1 }
  0xa4   : > { %v1344_v41 = vsel %vm1302_vm2, %v1342_v0, %v1343_v12  ;;  %v1743_v45 = vrot.slane %v5665_v22, 1 }
  0xa5   : > { %3138 = vmatmul.mubr.bf16.gmra.mrb[52].mxu0 %v1534_v21  ;;  %v616_v58 = vor.u32 %v614_v38, %v613_v47  ;;  %v617_v42 = vrot.slane %v613_v47, 4  ;;  %v1574_v21 = vshll.u32 %v5577_v37, 16  ;;  %v5048_v38 = vld [vmem:[#allocation2 + $0x5c] ss:$0 sps:$4 sm:$0x11]   ;;  %v1737_v47 = vrot.slane %v5605_v25, 1 }
  0xa6   : > { %3041 = vmatmul.mubr.bf16.gmra.mrb[52].mxu1 %v1332_v13  ;;  %3145 = vmatprep.mubr.bf16.mxu0 %v1727_v8  ;;  %v1562_v13 = vshll.u32 %v5549_v9, 16  ;;  %v5064_v9 = vld [vmem:[%s6385_s1 + $0x228] sm:$0xff]   ;;  %v1734_v8 = vrot.slane %v5577_v37, 1  ;;  %v5071_v37 = vld [vmem:[%s6385_s1 + $0x230] sm:$0xff]  }
  0xa7   : > { %3048 = vmatprep.mubr.bf16.mxu1 %v5700_v17  ;;  %4846 = vmatpush3.bf16.msra.mxu0 %v5044_v3  ;;  %v625_v61 = vsel %vm5230_vm7, %v617_v42, %v624_v56  ;;  %v787_v34 = vsel %vm5245_vm9, %v616_v58, %v786_v53  ;;  %v1558_v3 = vsel %vm1093_vm5, %v1553_v32, %v1557_v15  ;;  %v1576_v30 = vrot.slane %v1574_v21, 1  ;;  %v5103_v53 = vld [vmem:[#allocation2 + $0xb0] ss:$0 sps:$4 sm:$0x11]  }
  0xa8   : > { %4847 = vmatprep.subr.bf16.mxu0 %v5051_v2  ;;  %788 = vst [vmem:[#allocation2 + $0xc0] sm:$0xf] %v787_v34  ;;  %789 = vst [vmem:[#allocation2 + $0xc4] sm:$0xf] %v625_v61  ;;  %v1564_v11 = vrot.slane %v1562_v13, 1  ;;  %v1346_v55 = vrot.slane %v5103_v53, 1 }
  0xa9   : > { %v1577_v19 = vor.u32 %v1576_v30, %v1572_v27  ;;  %v1584_v58 = vshrl.u32 %v5605_v25, 16  ;;  %v1591_v42 = vshll.u32 %v5048_v38, 16  ;;  %v5779_v56 = vld [vmem:[#allocation2 + $0x20] ss:$0 sps:$4 sm:$0x11]   ;;  %v5788_v25 = vld [vmem:[#allocation2 + $0x24] sm:$0xff]  }
  0xaa   : > { %v1565_v20 = vor.u32 %v1564_v11, %v1560_v62  ;;  %v5053_v34 = vld [vmem:[#allocation2 + $0x68] ss:$0 sps:$4 sm:$0x11]   ;;  %v1347_v32 = vsel %vm1302_vm2, %v1345_v50, %v1346_v55  ;;  %v1935_v5 = vshll.u32 %v5779_v56, 16  ;;  %v5104_v62 = vld [vmem:[#allocation2 + $0xb4] sm:$0xff]   ;;  %v1942_v21 = vshll.u32 %v5788_v25, 16 }
  0xab   : > { %4848 = vmatpush3.bf16.msra.mxu0 %v5051_v2  ;;  %v1735_v2 = vrot.slane %v5046_v51, 1  ;;  %v1593_v15 = vrot.slane %v1591_v42, 1  ;;  %v1589_v29 = vor.u32 %v1588_v52, %v1584_v58  ;;  %v1741_v10 = vrot.slane %v5053_v34, 1  ;;  %v5105_v11 = vld [vmem:[#allocation2 + $0xbc] ss:$0 sps:$4 sm:$0x11]  }
  0xac   : > { %4849 = vmatprep.subr.bf16.mxu0 %v5057_v57  ;;  %v1349_v54 = vrot.slane %v5105_v11, 1  ;;  %v1610_v30 = vshll.u32 %v5665_v22, 16  ;;  %v1940_v33 = vshrl.u32 %v5788_v25, 16  ;;  %v2136_v35 = vrot.slane %v5779_v56, 1 }
  0xad   : > { %3146 = vmatmul.mubr.bf16.gmra.mrb[56].mxu0 %v1546_v39  ;;  %v1736_v36 = vsel %vm1302_vm2, %v1734_v8, %v1735_v2  ;;  %v1738_v39 = vrot.slane %v5048_v38, 1  ;;  %v1937_v2 = vrot.slane %v1935_v5, 1  ;;  %v1742_v0 = vsel %vm1302_vm2, %v1740_v7, %v1741_v10  ;;  %v5828_v10 = vld [vmem:[#allocation2 + $0x3c] sm:$0xff]  }
  0xae   : > { %3049 = vmatmul.mubr.bf16.gmra.mrb[56].mxu1 %v1335_v26  ;;  %3153 = vmatprep.mubr.bf16.mxu0 %v1730_v48  ;;  %v1570_v26 = vsel %vm1093_vm5, %v1565_v20, %v1569_v59  ;;  %v1582_v48 = vsel %vm1093_vm5, %v1577_v19, %v1581_v44  ;;  %v5078_v20 = vld [vmem:[%s6385_s1 + $0x238] sm:$0xff]   ;;  %v5060_v59 = vld [vmem:[#allocation2 + $0x2c] ss:$0 sps:$4 sm:$0x11]   ;;  %v5808_v44 = vld [vmem:[#allocation2 + $0x30] sm:$0xff]   ;;  %v1612_v50 = vrot.slane %v1610_v30, 1 }
  0xaf   : > { %3056 = vmatprep.mubr.bf16.mxu1 %v5726_v31  ;;  %4850 = vmatpush3.bf16.msra.mxu0 %v5057_v57  ;;  %v1930_v57 = vshll.u32 %v5771_v46, 16  ;;  %v1739_v61 = vsel %vm1302_vm2, %v1737_v47, %v1738_v39  ;;  %v5786_v13 = vld [vmem:[#allocation2 + $0xc0] sm:$0xff]   ;;  %v1947_v38 = vshll.u32 %v5060_v59, 16  ;;  %v1608_v39 = vshrl.u32 %v5665_v22, 16 }
  0xb0   : > { %4851 = vmatprep.subr.bf16.mxu0 %v5064_v9  ;;  %v2138_v55 = vrot.slane %v5788_v25, 1  ;;  %v2139_v58 = vrot.slane %v5060_v59, 1  ;;  %v1954_v52 = vshll.u32 %v5808_v44, 16  ;;  %v2141_v56 = vrot.slane %v5808_v44, 1 }
  0xb1   : > { %v1932_v40 = vrot.slane %v1930_v57, 1  ;;  %v5818_v57 = vsel %vm1302_vm2, %v2135_v28, %v2136_v35 }
  0xb2   : > { %v5822_v22 = vsel %vm1302_vm2, %v2138_v55, %v2139_v58  ;;  %v1956_v7 = vrot.slane %v1954_v52, 1  ;;  %v5859_v58 = vld [vmem:[#allocation2 + $0x54] sm:$0xff]   ;;  %v1644_v52 = vshrl.u32 %v5726_v31, 16 }
  0xb3   : > { %4852 = vmatpush3.bf16.msra.mxu0 %v5064_v9  ;;  %v1594_v9 = vsel %vm1093_vm5, %v1589_v29, %v1593_v15  ;;  %v1933_v8 = vor.u32 %v1932_v40, %v1928_v60  ;;  %v1622_v15 = vshll.u32 %v5680_v24, 16  ;;  %v1952_v29 = vshrl.u32 %v5808_v44, 16 }
  0xb4   : > { %4853 = vmatprep.subr.bf16.mxu0 %v5071_v37  ;;  %v1959_v60 = vshll.u32 %v5063_v49, 16  ;;  %v1613_v40 = vor.u32 %v1612_v50, %v1608_v39 }
  0xb5   : > { %3154 = vmatmul.mubr.bf16.gmra.mrb[60].mxu0 %v1558_v3  ;;  %v1348_v3 = vrot.slane %v5104_v62, 1  ;;  %v1938_v19 = vsel %vm1093_vm5, %v1933_v8, %v1937_v2  ;;  %v5061_v2 = vld [vmem:[#allocation2 + $0x8c] ss:$0 sps:$4 sm:$0x11]  }
  0xb6   : > { %3057 = vmatmul.mubr.bf16.gmra.mrb[60].mxu1 %v1338_v63  ;;  %3161 = vmatprep.mubr.bf16.mxu0 %v1733_v14  ;;  %v1598_v63 = vshll.u32 %v5646_v6, 16  ;;  %v1596_v14 = vshrl.u32 %v5646_v6, 16  ;;  %v5054_v6 = vld [vmem:[#allocation2 + $0x74] ss:$0 sps:$4 sm:$0x11]   ;;  %v1961_v59 = vrot.slane %v1959_v60, 1 }
  0xb7   : > { %3064 = vmatprep.mubr.bf16.mxu1 %v5747_v4  ;;  %4854 = vmatpush3.bf16.msra.mxu0 %v5071_v37  ;;  %v1350_v12 = vsel %vm1302_vm2, %v1348_v3, %v1349_v54  ;;  %v1744_v37 = vrot.slane %v5054_v6, 1  ;;  %v1615_v53 = vshll.u32 %v5054_v6, 16  ;;  %v1746_v3 = vrot.slane %v5680_v24, 1 }
  0xb8   : > { %v1600_v51 = vrot.slane %v1598_v63, 1  ;;  %4855 = vmatprep.subr.bf16.mxu0 %v5078_v20  ;;  %v2142_v63 = vrot.slane %v5063_v49, 1  ;;  %v1620_v54 = vshrl.u32 %v5680_v24, 16  ;;  %v1964_v6 = vshrl.u32 %v5828_v10, 16 }
  0xb9   : > { %v1750_v30 = vrot.slane %v5061_v2, 1 }
  0xba   : > { %v5831_v62 = vsel %vm1302_vm2, %v2141_v56, %v2142_v63 }
  0xbb   : > { %4856 = vmatpush3.bf16.msra.mxu0 %v5078_v20  ;;  %v1957_v20 = vor.u32 %v1956_v7, %v1952_v29  ;;  %v1990_v29 = vshll.u32 %v5859_v58, 16 }
  0xbd   : > { %3162 = vmatmul.mubr.bf16.gmra.mrb[64].mxu0 %v1570_v26  ;;  %v1601_v26 = vor.u32 %v1600_v51, %v1596_v14  ;;  %v1624_v14 = vrot.slane %v1622_v15, 1  ;;  %v1962_v24 = vsel %vm1093_vm5, %v1957_v20, %v1961_v59  ;;  %v5865_v15 = vld [vmem:[#allocation2 + $0x5c] ss:$0 sps:$4 sm:$0x11]  }
  0xbe   : > { %3065 = vmatmul.mubr.bf16.gmra.mrb[64].mxu1 %v1341_v16  ;;  %3169 = vmatprep.mubr.bf16.mxu0 %v1736_v36  ;;  %v1603_v16 = vshll.u32 %v5053_v34, 16  ;;  %v1944_v36 = vrot.slane %v1942_v21, 1  ;;  %v5058_v34 = vld [vmem:[#allocation2 + $0x80] ss:$0 sps:$4 sm:$0x11]  }
  0xbf   : > { %3072 = vmatprep.mubr.bf16.mxu1 %v5756_v18  ;;  %v1747_v11 = vrot.slane %v5058_v34, 1  ;;  %v1627_v51 = vshll.u32 %v5058_v34, 16  ;;  %v5837_v21 = vld [vmem:[#allocation2 + $0x44] ss:$0 sps:$4 sm:$0x11]  }
  0xc0   : > { %v1605_v27 = vrot.slane %v1603_v16, 1  ;;  %v1945_v42 = vor.u32 %v1944_v36, %v1940_v33  ;;  %v1632_v33 = vshrl.u32 %v5700_v17, 16  ;;  %v1639_v36 = vshll.u32 %v5061_v2, 16 }
  0xc1   : > { %v1748_v8 = vsel %vm1302_vm2, %v1746_v3, %v1747_v11  ;;  %v1988_v3 = vshrl.u32 %v5859_v58, 16  ;;  %v1992_v11 = vrot.slane %v1990_v29, 1 }
  0xc2   : > { %v1606_v47 = vsel %vm1093_vm5, %v1601_v26, %v1605_v27  ;;  %v5845_v26 = vld [vmem:[#allocation2 + $0x48] sm:$0xff]   ;;  %v1749_v27 = vrot.slane %v5700_v17, 1  ;;  %v1641_v35 = vrot.slane %v1639_v36, 1 }
  0xc3   : > { %v1976_v50 = vshrl.u32 %v5845_v26, 16 }
  0xc4   : > { %v1751_v39 = vsel %vm1302_vm2, %v1749_v27, %v1750_v30  ;;  %v5072_v30 = vld [vmem:[#allocation2 + $0xb0] ss:$0 sps:$4 sm:$0x11]  }
  0xc5   : > { %3170 = vmatmul.mubr.bf16.gmra.mrb[68].mxu0 %v1582_v48  ;;  %v1949_v48 = vrot.slane %v1947_v38, 1 }
  0xc6   : > { %3073 = vmatmul.mubr.bf16.gmra.mrb[68].mxu1 %v1344_v41  ;;  %3177 = vmatprep.mubr.bf16.mxu0 %v1739_v61  ;;  %v791_v41 = vsel %vm5236_vm8, %v626_v23, %v790_v1  ;;  %v1745_v61 = vsel %vm1302_vm2, %v1743_v45, %v1744_v37  ;;  %v1625_v1 = vor.u32 %v1624_v14, %v1620_v54  ;;  %v5851_v37 = vld [vmem:[#allocation2 + $0x50] ss:$0 sps:$4 sm:$0x11]   ;;  %v1995_v54 = vshll.u32 %v5865_v15, 16  ;;  %v5873_v14 = vld [vmem:[#allocation2 + $0x60] sm:$0xff]  }
  0xc7   : > { %3080 = vmatprep.mubr.bf16.mxu1 %v5768_v43  ;;  %792 = vst [vmem:[#allocation2 + $0xc8] sm:$0x1] %v791_v41  ;;  %v1950_v5 = vsel %vm1093_vm5, %v1945_v42, %v1949_v48  ;;  %v5065_v41 = vld [vmem:[#allocation2 + $0x98] ss:$0 sps:$4 sm:$0x11]   ;;  %v1983_v55 = vshll.u32 %v5851_v37, 16 }
  0xc8   : > { %v1752_v42 = vrot.slane %v5726_v31, 1  ;;  %v1753_v48 = vrot.slane %v5065_v41, 1  ;;  %v1651_v34 = vshll.u32 %v5065_v41, 16  ;;  %v1670_v41 = vshll.u32 %v5756_v18, 16 }
  0xca   : > { %v1754_v60 = vsel %vm1302_vm2, %v1752_v42, %v1753_v48  ;;  %v1653_v7 = vrot.slane %v1651_v34, 1  ;;  %v5897_v48 = vld [vmem:[#allocation2 + $0x74] ss:$0 sps:$4 sm:$0x11]  }
  0xcb   : > { %v5075_v34 = vld [vmem:[#allocation2 + $0xbc] ss:$0 sps:$4 sm:$0x11]  }
  0xcd   : > { %3178 = vmatmul.mubr.bf16.gmra.mrb[72].mxu0 %v1594_v9  ;;  %v1966_v9 = vshll.u32 %v5828_v10, 16 }
  0xce   : > { %3081 = vmatmul.mubr.bf16.gmra.mrb[72].mxu1 %v1347_v32  ;;  %3185 = vmatprep.mubr.bf16.mxu0 %v1742_v0  ;;  %v1617_v32 = vrot.slane %v1615_v53, 1  ;;  %v1629_v0 = vrot.slane %v1627_v51, 1  ;;  %v1755_v51 = vrot.slane %v5747_v4, 1 }
  0xcf   : > { %3088 = vmatprep.mubr.bf16.mxu1 %v5786_v13  ;;  %v1968_v23 = vrot.slane %v1966_v9, 1  ;;  %v1656_v9 = vshrl.u32 %v5747_v4, 16 }
  0xd0   : > { %v1618_v16 = vsel %vm1093_vm5, %v1613_v40, %v1617_v32  ;;  %v1985_v32 = vrot.slane %v1983_v55, 1  ;;  %v5068_v40 = vld [vmem:[#allocation2 + $0xa4] ss:$0 sps:$4 sm:$0x11]  }
  0xd1   : > { %v1969_v28 = vor.u32 %v1968_v23, %v1964_v6  ;;  %v1663_v2 = vshll.u32 %v5068_v40, 16  ;;  %v2002_v6 = vshll.u32 %v5873_v14, 16 }
  0xd5   : > { %3186 = vmatmul.mubr.bf16.gmra.mrb[76].mxu0 %v1606_v47  ;;  %v1978_v47 = vshll.u32 %v5845_v26, 16 }
  0xd6   : > { %3089 = vmatmul.mubr.bf16.gmra.mrb[76].mxu1 %v1350_v12  ;;  %3193 = vmatprep.mubr.bf16.mxu0 %v1745_v61  ;;  %v1971_v12 = vshll.u32 %v5837_v21, 16 }
  0xd7   : > { %3290 = vmatprep.mubr.bf16.mxu1 %v1938_v19  ;;  %v1630_v19 = vsel %vm1093_vm5, %v1625_v1, %v1629_v0  ;;  %v1980_v53 = vrot.slane %v1978_v47, 1  ;;  %v1993_v0 = vor.u32 %v1992_v11, %v1988_v3  ;;  %v1762_v3 = vrot.slane %v5075_v34, 1 }
  0xd8   : > { %v1973_v45 = vrot.slane %v1971_v12, 1 }
  0xd9   : > { %v1981_v63 = vor.u32 %v1980_v53, %v1976_v50  ;;  %v1675_v50 = vshll.u32 %v5072_v30, 16 }
  0xdd   : > { %3194 = vmatmul.mubr.bf16.gmra.mrb[80].mxu0 %v1618_v16  ;;  %v1756_v16 = vrot.slane %v5068_v40, 1 }
  0xde   : > { %3291 = vmatmul.mubr.bf16.vlgmr.msra.gmra.mrb[80].mxu1 %v5771_v46  ;;  %v1634_v46 = vshll.u32 %v5700_v17, 16  ;;  %3201 = vmatprep.mubr.bf16.mxu0 %v1748_v8  ;;  %v1974_v17 = vsel %vm1093_vm5, %v1969_v28, %v1973_v45  ;;  %v2000_v28 = vshrl.u32 %v5873_v14, 16  ;;  %v2004_v45 = vrot.slane %v2002_v6, 1 }
  0xdf   : > { %3298 = vmatprep.mubr.bf16.mxu1 %v1950_v5  ;;  %v1757_v27 = vsel %vm1302_vm2, %v1755_v51, %v1756_v16  ;;  %v1680_v16 = vshrl.u32 %v5768_v43, 16 }
  0xe0   : > { %v1636_v38 = vrot.slane %v1634_v46, 1  ;;  %v1997_v46 = vrot.slane %v1995_v54, 1  ;;  %v2005_v55 = vor.u32 %v2004_v45, %v2000_v28  ;;  %v1764_v45 = vrot.slane %v5786_v13, 1 }
  0xe2   : > { %v1637_v49 = vor.u32 %v1636_v38, %v1632_v33  ;;  %v1665_v38 = vrot.slane %v1663_v2, 1 }
  0xe4   : > { %v1642_v56 = vsel %vm1093_vm5, %v1637_v49, %v1641_v35  ;;  %v1758_v49 = vrot.slane %v5756_v18, 1  ;;  %v1759_v35 = vrot.slane %v5072_v30, 1 }
  0xe5   : > { %3202 = vmatmul.mubr.bf16.gmra.mrb[84].mxu0 %v1630_v19  ;;  %v1998_v19 = vsel %vm1093_vm5, %v1993_v0, %v1997_v46  ;;  %v5915_v0 = vld [vmem:[#allocation2 + $0x80] ss:$0 sps:$4 sm:$0x11]  }
  0xe6   : > { %3299 = vmatmul.mubr.bf16.gmra.mrb[84].mxu1 %v5788_v25  ;;  %v1646_v25 = vshll.u32 %v5726_v31, 16  ;;  %3209 = vmatprep.mubr.bf16.mxu0 %v1751_v39  ;;  %v1986_v31 = vsel %vm1093_vm5, %v1981_v63, %v1985_v32  ;;  %v5891_v39 = vld [vmem:[#allocation2 + $0x6c] sm:$0xff]   ;;  %v1677_v63 = vrot.slane %v1675_v50, 1  ;;  %v1682_v32 = vshll.u32 %v5768_v43, 16 }
  0xe7   : > { %3306 = vmatprep.mubr.bf16.mxu1 %v1962_v24  ;;  %v5879_v24 = vld [vmem:[#allocation2 + $0x68] ss:$0 sps:$4 sm:$0x11]   ;;  %v2012_v40 = vshrl.u32 %v5891_v39, 16  ;;  %v2031_v28 = vshll.u32 %v5915_v0, 16 }
  0xe8   : > { %v1648_v61 = vrot.slane %v1646_v25, 1  ;;  %v2007_v47 = vshll.u32 %v5879_v24, 16  ;;  %v1668_v25 = vshrl.u32 %v5756_v18, 16 }
  0xea   : > { %v1649_v5 = vor.u32 %v1648_v61, %v1644_v52  ;;  %v2009_v42 = vrot.slane %v2007_v47, 1  ;;  %v2014_v52 = vshll.u32 %v5891_v39, 16  ;;  %v1760_v61 = vsel %vm1302_vm2, %v1758_v49, %v1759_v35 }
  0xec   : > { %v1654_v59 = vsel %vm1093_vm5, %v1649_v5, %v1653_v7  ;;  %v2010_v18 = vsel %vm1093_vm5, %v2005_v55, %v2009_v42  ;;  %v2016_v5 = vrot.slane %v2014_v52, 1  ;;  %v2019_v7 = vshll.u32 %v5897_v48, 16 }
  0xed   : > { %3210 = vmatmul.mubr.bf16.gmra.mrb[88].mxu0 %v1642_v56 }
  0xee   : > { %3307 = vmatmul.mubr.bf16.gmra.mrb[88].mxu1 %v5808_v44  ;;  %v1658_v44 = vshll.u32 %v5747_v4, 16  ;;  %3217 = vmatprep.mubr.bf16.mxu0 %v1754_v60  ;;  %v2017_v2 = vor.u32 %v2016_v5, %v2012_v40 }
  0xef   : > { %3314 = vmatprep.mubr.bf16.mxu1 %v1974_v17  ;;  %v1672_v17 = vrot.slane %v1670_v41, 1 }
  0xf0   : > { %v1660_v8 = vrot.slane %v1658_v44, 1  ;;  %v5905_v44 = vld [vmem:[#allocation2 + $0x78] sm:$0xff]  }
  0xf1   : > { %v1673_v56 = vor.u32 %v1672_v17, %v1668_v25  ;;  %v2026_v46 = vshll.u32 %v5905_v44, 16  ;;  %v2024_v41 = vshrl.u32 %v5905_v44, 16  ;;  %v1692_v25 = vshrl.u32 %v5786_v13, 16 }
  0xf2   : > { %v1661_v4 = vor.u32 %v1660_v8, %v1656_v9 }
  0xf3   : > { %v1678_v8 = vsel %vm1093_vm5, %v1673_v56, %v1677_v63 }
  0xf4   : > { %v1666_v53 = vsel %vm1093_vm5, %v1661_v4, %v1665_v38 }
  0xf5   : > { %3218 = vmatmul.mubr.bf16.gmra.mrb[92].mxu0 %v1654_v59  ;;  %v1687_v59 = vshll.u32 %v5075_v34, 16 }
  0xf6   : > { %3315 = vmatmul.mubr.bf16.gmra.mrb[92].mxu1 %v5828_v10  ;;  %3225 = vmatprep.mubr.bf16.mxu0 %v1757_v27 }
  0xf7   : > { %3322 = vmatprep.mubr.bf16.mxu1 %v1986_v31  ;;  %v1761_v31 = vrot.slane %v5768_v43, 1  ;;  %v1689_v30 = vrot.slane %v1687_v59, 1  ;;  %v1694_v43 = vshll.u32 %v5786_v13, 16  ;;  %v5936_v13 = vld [vmem:[#allocation2 + $0x8c] ss:$0 sps:$4 sm:$0x11]  }
  0xf9   : > { %v1763_v6 = vsel %vm1302_vm2, %v1761_v31, %v1762_v3  ;;  %v1696_v42 = vrot.slane %v1694_v43, 1 }
  0xfb   : > { %v1697_v3 = vor.u32 %v1696_v42, %v1692_v25  ;;  %v5961_v25 = vld [vmem:[#allocation2 + $0x9c] sm:$0xff]  }
  0xfc   : > { %v4385_v20 = vpop.f32.mrb[0].mxu0 }
  0xfd   : > { %v4386_v1 = vpop.f32.mrb[1].mxu0  ;;  %3226 = vmatmul.mubr.bf16.gmra.mrb[96].mxu0 %v1666_v53 }
  0xfe   : > { %v5882_v23 = vadd.f32 %v4386_v1, %v4385_v20  ;;  %v4388_v12 = vpop.f32.mrb[2].mxu0  ;;  %3323 = vmatmul.mubr.bf16.gmra.mrb[96].mxu1 %v5845_v26  ;;  %3233 = vmatprep.mubr.bf16.mxu0 %v1760_v61  ;;  %v1684_v20 = vrot.slane %v1682_v32, 1  ;;  %v2021_v1 = vrot.slane %v2019_v7, 1 }
  0xff   : > { %v4389_v33 = vpop.f32.mrb[3].mxu0  ;;  %3330 = vmatprep.mubr.bf16.mxu1 %v1998_v19  ;;  %v2028_v19 = vrot.slane %v2026_v46, 1 }
 0x100   : > { %v5885_v36 = vadd.f32 %v4389_v33, %v4388_v12  ;;  %v5079_v12 = vld [vmem:[#allocation2 + $0xc8] ss:$0 sps:$4 sm:$0x11]   ;;  %v1685_v27 = vor.u32 %v1684_v20, %v1680_v16  ;;  %v2022_v4 = vsel %vm1093_vm5, %v2017_v2, %v2021_v1  ;;  %v2043_v16 = vshll.u32 %v5936_v13, 16  ;;  %v5944_v20 = vld [vmem:[#allocation2 + $0x90] sm:$0xff]  }
 0x101   : > { %v5920_v33 = vld [vmem:[#allocation2 + $0x84] sm:$0xff]   ;;  %v1765_v47 = vrot.slane %v5079_v12, 1  ;;  %v1699_v63 = vshll.u32 %v5079_v12, 16 }
 0x102   : > { %v1690_v55 = vsel %vm1093_vm5, %v1685_v27, %v1689_v30  ;;  %v2038_v56 = vshll.u32 %v5920_v33, 16  ;;  %v2036_v7 = vshrl.u32 %v5920_v33, 16  ;;  %v2045_v12 = vrot.slane %v2043_v16, 1  ;;  %v5950_v27 = vld [vmem:[#allocation2 + $0x98] ss:$0 sps:$4 sm:$0x11]  }
 0x103   : > { %v1766_v40 = vsel %vm1302_vm2, %v1764_v45, %v1765_v47  ;;  %v2050_v30 = vshll.u32 %v5944_v20, 16 }
 0x104   : > { %v2040_v31 = vrot.slane %v2038_v56, 1  ;;  %v2145_v56 = vrot.slane %v5837_v21, 1  ;;  %v2148_v21 = vrot.slane %v5851_v37, 1 }
 0x105   : > { %3234 = vmatmul.mubr.bf16.gmra.mrb[100].mxu0 %v1678_v8 }
 0x106   : > { %3331 = vmatmul.mubr.bf16.gmra.mrb[100].mxu1 %v5859_v58  ;;  %3241 = vmatprep.mubr.bf16.mxu0 %v1763_v6  ;;  %v2041_v2 = vor.u32 %v2040_v31, %v2036_v7  ;;  %v5976_v31 = vld [vmem:[#allocation2 + $0xa8] sm:$0xff]  }
 0x107   : > { %3338 = vmatprep.mubr.bf16.mxu1 %v2010_v18  ;;  %v2033_v18 = vrot.slane %v2031_v28, 1 }
 0x108   : > { %v2046_v47 = vsel %vm1093_vm5, %v2041_v2, %v2045_v12  ;;  %v2074_v2 = vshll.u32 %v5976_v31, 16 }
 0x109   : > { %v4457_v29 = vpop.f32.mrb[0].mxu1 }
 0x10a   : > { %v4458_v60 = vpop.f32.mrb[1].mxu1 }
 0x10b   : > { %v5908_v11 = vadd.f32 %v4458_v60, %v4457_v29  ;;  %v4460_v54 = vpop.f32.mrb[2].mxu1  ;;  %v2029_v29 = vor.u32 %v2028_v19, %v2024_v41  ;;  %v2048_v19 = vshrl.u32 %v5944_v20, 16 }
 0x10c   : > { %v4461_v51 = vpop.f32.mrb[3].mxu1 }
 0x10d   : > { %v5912_v9 = vadd.f32 %v4461_v51, %v4460_v54  ;;  %3242 = vmatmul.mubr.bf16.gmra.mrb[104].mxu0 %v1690_v55  ;;  %v1701_v54 = vrot.slane %v1699_v63, 1  ;;  %v2034_v51 = vsel %vm1093_vm5, %v2029_v29, %v2033_v18  ;;  %v2060_v18 = vshrl.u32 %v5961_v25, 16 }
 0x10e   : > { %v4391_v38 = vpop.f32.mrb[4].mxu0  ;;  %3339 = vmatmul.mubr.bf16.gmra.mrb[104].mxu1 %v5873_v14  ;;  %3249 = vmatprep.mubr.bf16.mxu0 %v1766_v40 }
 0x10f   : > { %v4392_v35 = vpop.f32.mrb[5].mxu0  ;;  %3346 = vmatprep.mubr.bf16.mxu1 %v2022_v4  ;;  %v1702_v1 = vsel %vm1093_vm5, %v1697_v3, %v1701_v54 }
 0x110   : > { %v5928_v50 = vadd.f32 %v4392_v35, %v4391_v38  ;;  %v4394_v53 = vpop.f32.mrb[6].mxu0  ;;  %v2055_v35 = vshll.u32 %v5950_v27, 16 }
 0x111   : > { %v4463_v49 = vpop.f32.mrb[4].mxu1  ;;  %v4395_v34 = vpop.f32.mrb[7].mxu0 }
 0x112   : > { %v4464_v17 = vpop.f32.mrb[5].mxu1  ;;  %v5934_v60 = vadd.f32 %v4395_v34, %v4394_v53  ;;  %v2057_v42 = vrot.slane %v2055_v35, 1  ;;  %v2144_v34 = vrot.slane %v5828_v10, 1  ;;  %v2147_v10 = vrot.slane %v5845_v26, 1 }
 0x113   : > { %v5931_v52 = vadd.f32 %v4464_v17, %v4463_v49  ;;  %v4466_v61 = vpop.f32.mrb[6].mxu1  ;;  %v2052_v49 = vrot.slane %v2050_v30, 1  ;;  %v2150_v30 = vrot.slane %v5859_v58, 1 }
 0x114   : > { %v4467_v32 = vpop.f32.mrb[7].mxu1 }
 0x115   : > { %v5939_v5 = vadd.f32 %v4467_v32, %v4466_v61  ;;  %3250 = vmatmul.mubr.bf16.gmra.mrb[108].mxu0 %v1702_v1  ;;  %v2053_v55 = vor.u32 %v2052_v49, %v2048_v19  ;;  %v5966_v61 = vld [vmem:[#allocation2 + $0xa4] ss:$0 sps:$4 sm:$0x11]   ;;  %v2072_v19 = vshrl.u32 %v5976_v31, 16  ;;  %v5997_v49 = vld [vmem:[#allocation2 + $0xb4] sm:$0xff]  }
 0x116   : > { %3347 = vmatmul.mubr.bf16.gmra.mrb[108].mxu1 %v5891_v39  ;;  %4857 = vmatprep.mubr.bf16.mxu0 %v5818_v57  ;;  %v2062_v57 = vshll.u32 %v5961_v25, 16  ;;  %v2067_v7 = vshll.u32 %v5966_v61, 16 }
 0x117   : > { %3354 = vmatprep.mubr.bf16.mxu1 %v2034_v51  ;;  %v2058_v29 = vsel %vm1093_vm5, %v2053_v55, %v2057_v42  ;;  %v2146_v51 = vsel %vm1302_vm2, %v2144_v34, %v2145_v56  ;;  %v2154_v55 = vrot.slane %v5879_v24, 1  ;;  %v2086_v34 = vshll.u32 %v5997_v49, 16 }
 0x118   : > { %v4397_v59 = vpop.f32.mrb[8].mxu0  ;;  %v2064_v40 = vrot.slane %v2062_v57, 1  ;;  %v6005_v57 = vld [vmem:[#allocation2 + $0xbc] ss:$0 sps:$4 sm:$0x11]   ;;  %v2156_v24 = vrot.slane %v5891_v39, 1 }
 0x119   : > { %v4398_v8 = vpop.f32.mrb[9].mxu0  ;;  %v2160_v39 = vrot.slane %v5915_v0, 1 }
 0x11a   : > { %v5948_v46 = vadd.f32 %v4398_v8, %v4397_v59  ;;  %v4400_v6 = vpop.f32.mrb[10].mxu0  ;;  %v2065_v16 = vor.u32 %v2064_v40, %v2060_v18  ;;  %v2069_v59 = vrot.slane %v2067_v7, 1  ;;  %v5986_v8 = vld [vmem:[#allocation2 + $0xb0] ss:$0 sps:$4 sm:$0x11]   ;;  %v2157_v18 = vrot.slane %v5897_v48, 1 }
 0x11b   : > { %v4401_v43 = vpop.f32.mrb[11].mxu0  ;;  %v4469_v4 = vpop.f32.mrb[8].mxu1 }
 0x11c   : > { %v5953_v38 = vadd.f32 %v4401_v43, %v4400_v6  ;;  %v4470_v41 = vpop.f32.mrb[9].mxu1  ;;  %v2149_v6 = vsel %vm1302_vm2, %v2147_v10, %v2148_v21  ;;  %v2151_v43 = vrot.slane %v5865_v15, 1  ;;  %v2088_v10 = vrot.slane %v2086_v34, 1 }
 0x11d   : > { %v5957_v28 = vadd.f32 %v4470_v41, %v4469_v4  ;;  %v4472_v45 = vpop.f32.mrb[10].mxu1  ;;  %4858 = vmatmul.mubr.bf16.vlgmr.msra.gmra.mrb[112].mxu0 %v5822_v22  ;;  %v2070_v41 = vsel %vm1093_vm5, %v2065_v16, %v2069_v59  ;;  %v2091_v21 = vshll.u32 %v6005_v57, 16  ;;  %v2159_v59 = vrot.slane %v5905_v44, 1 }
 0x11e   : > { %v4473_v17 = vpop.f32.mrb[11].mxu1  ;;  %3355 = vmatmul.mubr.bf16.gmra.mrb[112].mxu1 %v5905_v44  ;;  %4861 = vmatprep.mubr.bf16.mxu0 %v5831_v62  ;;  %v2152_v58 = vsel %vm1302_vm2, %v2150_v30, %v2151_v43  ;;  %v6028_v43 = vld [vmem:[#allocation2 + $0xc8] ss:$0 sps:$4 sm:$0x11]  }
 0x11f   : > { %v5964_v53 = vadd.f32 %v4473_v17, %v4472_v45  ;;  %3362 = vmatprep.mubr.bf16.mxu1 %v2046_v47  ;;  %v2076_v45 = vrot.slane %v2074_v2, 1  ;;  %v2079_v47 = vshll.u32 %v5986_v8, 16  ;;  %v2153_v17 = vrot.slane %v5873_v14, 1 }
 0x120   : > { %v2093_v30 = vrot.slane %v2091_v21, 1  ;;  %v6053_v21 = vld [vmem:[#allocation2 + $0xd4] ss:$0 sps:$4 sm:$0x11]  }
 0x121   : > { %v2077_v15 = vor.u32 %v2076_v45, %v2072_v19  ;;  %v2081_v42 = vrot.slane %v2079_v47, 1 }
 0x123   : > { %v2082_v7 = vsel %vm1093_vm5, %v2077_v15, %v2081_v42 }
 0x124   : > { %v4403_v63 = vpop.f32.mrb[12].mxu0 }
 0x125   : > { %v4404_v32 = vpop.f32.mrb[13].mxu0  ;;  %4862 = vmatmul.mubr.bf16.gmra.mrb[116].mxu0 %v2146_v51 }
 0x126   : > { %v5978_v3 = vadd.f32 %v4404_v32, %v4403_v63  ;;  %v4406_v22 = vpop.f32.mrb[14].mxu0  ;;  %3363 = vmatmul.mubr.bf16.gmra.mrb[116].mxu1 %v5920_v33  ;;  %4865 = vmatprep.mubr.bf16.mxu0 %v2149_v6  ;;  %v2155_v63 = vsel %vm1302_vm2, %v2153_v17, %v2154_v55  ;;  %v2158_v6 = vsel %vm1302_vm2, %v2156_v24, %v2157_v18  ;;  %v2162_v17 = vrot.slane %v5920_v33, 1 }
 0x127   : > { %v4407_v62 = vpop.f32.mrb[15].mxu0  ;;  %3370 = vmatprep.mubr.bf16.mxu1 %v2058_v29  ;;  %v2163_v55 = vrot.slane %v5936_v13, 1  ;;  %v2166_v33 = vrot.slane %v5950_v27, 1 }
 0x128   : > { %v5983_v54 = vadd.f32 %v4407_v62, %v4406_v22  ;;  %v2084_v22 = vshrl.u32 %v5997_v49, 16  ;;  %v6014_v62 = vld [vmem:[#allocation2 + $0xc0] sm:$0xff]  }
 0x129   : > { %v4475_v1 = vpop.f32.mrb[12].mxu1  ;;  %v2098_v44 = vshll.u32 %v6014_v62, 16  ;;  %v2096_v42 = vshrl.u32 %v6014_v62, 16 }
 0x12a   : > { %v4476_v26 = vpop.f32.mrb[13].mxu1 }
 0x12b   : > { %v5990_v37 = vadd.f32 %v4476_v26, %v4475_v1  ;;  %v4478_v12 = vpop.f32.mrb[14].mxu1  ;;  %v2100_v34 = vrot.slane %v2098_v44, 1 }
 0x12c   : > { %v4479_v4 = vpop.f32.mrb[15].mxu1 }
 0x12d   : > { %v5999_v35 = vadd.f32 %v4479_v4, %v4478_v12  ;;  %4866 = vmatmul.mubr.bf16.gmra.mrb[120].mxu0 %v2152_v58 }
 0x12e   : > { %3371 = vmatmul.mubr.bf16.gmra.mrb[120].mxu1 %v5944_v20  ;;  %4869 = vmatprep.mubr.bf16.mxu0 %v2155_v63  ;;  %v6039_v63 = vld [vmem:[#allocation2 + $0xcc] sm:$0xff]  }
 0x12f   : > { %3378 = vmatprep.mubr.bf16.mxu1 %v2070_v41  ;;  %v4409_v48 = vpop.f32.mrb[16].mxu0  ;;  %v2161_v41 = vsel %vm1302_vm2, %v2159_v59, %v2160_v39  ;;  %v2108_v44 = vshrl.u32 %v6039_v63, 16 }
 0x130   : > { %v4410_v2 = vpop.f32.mrb[17].mxu0 }
 0x131   : > { %v4497_v56 = vpop.f32.mrb[16].mxu1  ;;  %v6026_v26 = vadd.f32 %v4410_v2, %v4409_v48  ;;  %v4412_v12 = vpop.f32.mrb[18].mxu0 }
 0x132   : > { %v4498_v32 = vpop.f32.mrb[17].mxu1  ;;  %v4413_v0 = vpop.f32.mrb[19].mxu0 }
 0x133   : > { %v4499_v29 = vadd.f32 %v4498_v32, %v4497_v56  ;;  %v4500_v14 = vpop.f32.mrb[18].mxu1  ;;  %v6032_v19 = vadd.f32 %v4413_v0, %v4412_v12  ;;  %v2103_v56 = vshll.u32 %v6028_v43, 16  ;;  %v2169_v12 = vrot.slane %v5966_v61, 1 }
 0x134   : > { %v4501_v40 = vpop.f32.mrb[19].mxu1 }
 0x135   : > { %v6017_v51 = vadd.f32 %v4499_v29, %v5882_v23  ;;  %v4502_v16 = vadd.f32 %v4501_v40, %v4500_v14  ;;  %v2089_v23 = vor.u32 %v2088_v10, %v2084_v22  ;;  %4870 = vmatmul.mubr.bf16.gmra.mrb[124].mxu0 %v2158_v6  ;;  %v2165_v14 = vrot.slane %v5944_v20, 1 }
 0x136   : > { %3379 = vmatmul.mubr.bf16.gmra.mrb[124].mxu1 %v5961_v25  ;;  %4873 = vmatprep.mubr.bf16.mxu0 %v2161_v41  ;;  %v2164_v40 = vsel %vm1302_vm2, %v2162_v17, %v2163_v55  ;;  %v2105_v10 = vrot.slane %v2103_v56, 1  ;;  %v2110_v20 = vshll.u32 %v6039_v63, 16  ;;  %v2168_v6 = vrot.slane %v5961_v25, 1 }
 0x137   : > { %v6023_v1 = vadd.f32 %v4502_v16, %v5885_v36  ;;  %3386 = vmatprep.mubr.bf16.mxu1 %v2082_v7  ;;  %v2094_v15 = vsel %vm1093_vm5, %v2089_v23, %v2093_v30  ;;  %v4415_v13 = vpop.f32.mrb[20].mxu0  ;;  %v2167_v59 = vsel %vm1302_vm2, %v2165_v14, %v2166_v33 }
 0x138   : > { %v4416_v24 = vpop.f32.mrb[21].mxu0  ;;  %v2112_v0 = vrot.slane %v2110_v20, 1  ;;  %v2178_v20 = vrot.slane %v6028_v43, 1 }
 0x139   : > { %v4503_v4 = vpop.f32.mrb[20].mxu1  ;;  %v6051_v7 = vadd.f32 %v4416_v24, %v4415_v13  ;;  %v4418_v22 = vpop.f32.mrb[22].mxu0  ;;  %v2174_v13 = vrot.slane %v5997_v49, 1  ;;  %v2175_v24 = vrot.slane %v6005_v57, 1 }
 0x13a   : > { %v4504_v36 = vpop.f32.mrb[21].mxu1  ;;  %v4419_v27 = vpop.f32.mrb[23].mxu0 }
 0x13b   : > { %v4505_v45 = vadd.f32 %v4504_v36, %v4503_v4  ;;  %v4506_v47 = vpop.f32.mrb[22].mxu1  ;;  %v6057_v39 = vadd.f32 %v4419_v27, %v4418_v22  ;;  %v2115_v4 = vshll.u32 %v6053_v21, 16 }
 0x13c   : > { %v4507_v58 = vpop.f32.mrb[23].mxu1 }
 0x13d   : > { %v6042_v32 = vadd.f32 %v4505_v45, %v5928_v50  ;;  %v4508_v29 = vadd.f32 %v4507_v58, %v4506_v47  ;;  %v2101_v50 = vor.u32 %v2100_v34, %v2096_v42  ;;  %4874 = vmatmul.mubr.bf16.gmra.mrb[128].mxu0 %v2164_v40  ;;  %v2171_v45 = vrot.slane %v5976_v31, 1 }
 0x13e   : > { %3387 = vmatmul.mubr.bf16.gmra.mrb[128].mxu1 %v5976_v31  ;;  %4877 = vmatprep.mubr.bf16.mxu0 %v2167_v59  ;;  %v2172_v47 = vrot.slane %v5986_v8, 1  ;;  %v2117_v42 = vrot.slane %v2115_v4, 1 }
 0x13f   : > { %v6048_v18 = vadd.f32 %v4508_v29, %v5934_v60  ;;  %3394 = vmatprep.mubr.bf16.mxu1 %v2094_v15  ;;  %v2106_v30 = vsel %vm1093_vm5, %v2101_v50, %v2105_v10  ;;  %v4421_v25 = vpop.f32.mrb[24].mxu0  ;;  %v2170_v15 = vsel %vm1302_vm2, %v2168_v6, %v2169_v12  ;;  %v2177_v10 = vrot.slane %v6014_v62, 1 }
 0x140   : > { %v4422_v61 = vpop.f32.mrb[25].mxu0  ;;  %v2173_v31 = vsel %vm1302_vm2, %v2171_v45, %v2172_v47 }
 0x141   : > { %v4509_v16 = vpop.f32.mrb[24].mxu1  ;;  %v6073_v55 = vadd.f32 %v4422_v61, %v4421_v25  ;;  %v4424_v58 = vpop.f32.mrb[26].mxu0 }
 0x142   : > { %v4510_v60 = vpop.f32.mrb[25].mxu1  ;;  %v4425_v34 = vpop.f32.mrb[27].mxu0 }
 0x143   : > { %v4511_v48 = vadd.f32 %v4510_v60, %v4509_v16  ;;  %v4512_v2 = vpop.f32.mrb[26].mxu1  ;;  %v6077_v8 = vadd.f32 %v4425_v34, %v4424_v58  ;;  %v2176_v60 = vsel %vm1302_vm2, %v2174_v13, %v2175_v24 }
 0x144   : > { %v4513_v23 = vpop.f32.mrb[27].mxu1 }
 0x145   : > { %v6065_v41 = vadd.f32 %v4511_v48, %v5948_v46  ;;  %v4514_v36 = vadd.f32 %v4513_v23, %v4512_v2  ;;  %v2113_v46 = vor.u32 %v2112_v0, %v2108_v44  ;;  %4878 = vmatmul.mubr.bf16.gmra.mrb[132].mxu0 %v2170_v15  ;;  %v2179_v2 = vsel %vm1302_vm2, %v2177_v10, %v2178_v20 }
 0x146   : > { %3395 = vmatmul.mubr.bf16.gmra.mrb[132].mxu1 %v5997_v49  ;;  %4881 = vmatprep.mubr.bf16.mxu0 %v2173_v31 }
 0x147   : > { %v6071_v17 = vadd.f32 %v4514_v36, %v5953_v38  ;;  %3402 = vmatprep.mubr.bf16.mxu1 %v2106_v30  ;;  %v2118_v40 = vsel %vm1093_vm5, %v2113_v46, %v2117_v42 }
 0x148   : > { %v4427_v27 = vpop.f32.mrb[28].mxu0 }
 0x149   : > { %v4515_v56 = vpop.f32.mrb[28].mxu1  ;;  %v4428_v16 = vpop.f32.mrb[29].mxu0 }
 0x14a   : > { %v4516_v29 = vpop.f32.mrb[29].mxu1  ;;  %v4429_v49 = vadd.f32 %v4428_v16, %v4427_v27  ;;  %v4430_v57 = vpop.f32.mrb[30].mxu0 }
 0x14b   : > { %v4517_v14 = vadd.f32 %v4516_v29, %v4515_v56  ;;  %v4518_v33 = vpop.f32.mrb[30].mxu1  ;;  %v4431_v48 = vpop.f32.mrb[31].mxu0 }
 0x14c   : > { %v4519_v38 = vpop.f32.mrb[31].mxu1  ;;  %v4432_v6 = vadd.f32 %v4431_v48, %v4430_v57 }
 0x14d   : > { %v6083_v22 = vadd.f32 %v4517_v14, %v5978_v3  ;;  %v4520_v50 = vadd.f32 %v4519_v38, %v4518_v33  ;;  %4882 = vmatmul.mubr.bf16.gmra.mrb[136].mxu0 %v2176_v60 }
 0x14e   : > { %3403 = vmatmul.mubr.bf16.gmra.mrb[136].mxu1 %v6014_v62  ;;  %4885 = vmatprep.mubr.bf16.mxu0 %v2179_v2  ;;  %v2180_v62 = vrot.slane %v6039_v63, 1 }
 0x14f   : > { %v6089_v59 = vadd.f32 %v4520_v50, %v5983_v54  ;;  %3410 = vmatprep.mubr.bf16.mxu1 %v2118_v40  ;;  %v2181_v54 = vrot.slane %v6053_v21, 1 }
 0x150   : > { %v4433_v4 = vpop.f32.mrb[32].mxu0 }
 0x151   : > { %v4521_v3 = vpop.f32.mrb[32].mxu1  ;;  %v4434_v36 = vpop.f32.mrb[33].mxu0  ;;  %v2182_v61 = vsel %vm1302_vm2, %v2180_v62, %v2181_v54 }
 0x152   : > { %v4522_v12 = vpop.f32.mrb[33].mxu1  ;;  %v4435_v47 = vadd.f32 %v4434_v36, %v4433_v4  ;;  %v4436_v25 = vpop.f32.mrb[34].mxu0 }
 0x153   : > { %v4523_v43 = vadd.f32 %v4522_v12, %v4521_v3  ;;  %v4524_v23 = vpop.f32.mrb[34].mxu1  ;;  %v4437_v58 = vpop.f32.mrb[35].mxu0 }
 0x154   : > { %v4525_v30 = vpop.f32.mrb[35].mxu1  ;;  %v4438_v46 = vadd.f32 %v4437_v58, %v4436_v25 }
 0x155   : > { %v6096_v44 = vadd.f32 %v4523_v43, %v6026_v26  ;;  %v4526_v0 = vadd.f32 %v4525_v30, %v4524_v23  ;;  %4886 = vmatmul.mubr.bf16.gmra.mrb[140].mxu0 %v2182_v61 }
 0x156   : > { %3411 = vmatmul.mubr.bf16.gmra.mrb[140].mxu1 %v6039_v63 }
 0x157   : > { %v6100_v45 = vadd.f32 %v4526_v0, %v6032_v19 }
 0x158   : > { %v4439_v31 = vpop.f32.mrb[36].mxu0 }
 0x159   : > { %v4527_v15 = vpop.f32.mrb[36].mxu1  ;;  %v4440_v29 = vpop.f32.mrb[37].mxu0 }
 0x15a   : > { %v4528_v42 = vpop.f32.mrb[37].mxu1  ;;  %v4441_v14 = vadd.f32 %v4440_v29, %v4439_v31  ;;  %v4442_v33 = vpop.f32.mrb[38].mxu0 }
 0x15b   : > { %v4529_v21 = vadd.f32 %v4528_v42, %v4527_v15  ;;  %v4530_v26 = vpop.f32.mrb[38].mxu1  ;;  %v4443_v38 = vpop.f32.mrb[39].mxu0 }
 0x15c   : > { %v4531_v34 = vpop.f32.mrb[39].mxu1  ;;  %v4444_v24 = vadd.f32 %v4443_v38, %v4442_v33 }
 0x15d   : > { %v6104_v56 = vadd.f32 %v4529_v21, %v6051_v7  ;;  %v4532_v63 = vadd.f32 %v4531_v34, %v4530_v26 }
 0x15f   : > { %v6107_v19 = vadd.f32 %v4532_v63, %v6057_v39 }
 0x160   : > { %v4445_v16 = vpop.f32.mrb[40].mxu0 }
 0x161   : > { %v4533_v13 = vpop.f32.mrb[40].mxu1  ;;  %v4446_v57 = vpop.f32.mrb[41].mxu0 }
 0x162   : > { %v4534_v40 = vpop.f32.mrb[41].mxu1  ;;  %v4447_v39 = vadd.f32 %v4446_v57, %v4445_v16  ;;  %v4448_v48 = vpop.f32.mrb[42].mxu0 }
 0x163   : > { %v4535_v50 = vadd.f32 %v4534_v40, %v4533_v13  ;;  %v4536_v10 = vpop.f32.mrb[42].mxu1  ;;  %v4449_v3 = vpop.f32.mrb[43].mxu0 }
 0x164   : > { %v4537_v20 = vpop.f32.mrb[43].mxu1  ;;  %v4450_v12 = vadd.f32 %v4449_v3, %v4448_v48 }
 0x165   : > { %v6110_v27 = vadd.f32 %v4535_v50, %v6073_v55  ;;  %v4538_v7 = vadd.f32 %v4537_v20, %v4536_v10 }
 0x167   : > { %v6113_v60 = vadd.f32 %v4538_v7, %v6077_v8 }
 0x168   : > { %v4451_v55 = vpop.f32.mrb[44].mxu0 }
 0x169   : > { %v4539_v2 = vpop.f32.mrb[44].mxu1  ;;  %v4452_v4 = vpop.f32.mrb[45].mxu0 }
 0x16a   : > { %v4540_v43 = vpop.f32.mrb[45].mxu1  ;;  %v4453_v25 = vadd.f32 %v4452_v4, %v4451_v55  ;;  %v4454_v61 = vpop.f32.mrb[46].mxu0 }
 0x16b   : > { %v4541_v23 = vadd.f32 %v4540_v43, %v4539_v2  ;;  %v4542_v30 = vpop.f32.mrb[46].mxu1  ;;  %v4455_v8 = vpop.f32.mrb[47].mxu0 }
 0x16c   : > { %v4543_v62 = vpop.f32.mrb[47].mxu1  ;;  %v4456_v15 = vadd.f32 %v4455_v8, %v4454_v61 }
 0x16d   : > { %v6115_v54 = vadd.f32 %v4541_v23, %v4429_v49  ;;  %v4544_v0 = vadd.f32 %v4543_v62, %v4542_v30 }
 0x16f   : > { %v6117_v36 = vadd.f32 %v4544_v0, %v4432_v6 }
 0x170   : > { %v4609_v29 = vpop.f32.mrb[48].mxu0 }
 0x171   : > { %v4545_v58 = vpop.f32.mrb[48].mxu1  ;;  %v4610_v49 = vpop.f32.mrb[49].mxu0 }
 0x172   : > { %v4546_v42 = vpop.f32.mrb[49].mxu1  ;;  %v4611_v38 = vadd.f32 %v4610_v49, %v4609_v29  ;;  %v4612_v13 = vpop.f32.mrb[50].mxu0 }
 0x173   : > { %v4547_v21 = vadd.f32 %v4546_v42, %v4545_v58  ;;  %v4548_v26 = vpop.f32.mrb[50].mxu1  ;;  %v4613_v6 = vpop.f32.mrb[51].mxu0 }
 0x174   : > { %v4549_v34 = vpop.f32.mrb[51].mxu1  ;;  %v6124_v50 = vadd.f32 %v4611_v38, %v6017_v51  ;;  %v4614_v10 = vadd.f32 %v4613_v6, %v4612_v13 }
 0x175   : > { %v6119_v63 = vadd.f32 %v4547_v21, %v4435_v47  ;;  %v4550_v31 = vadd.f32 %v4549_v34, %v4548_v26 }
 0x176   : > { %v6127_v57 = vadd.f32 %v4614_v10, %v6023_v1 }
 0x177   : > { %v6121_v33 = vadd.f32 %v4550_v31, %v4438_v46 }
 0x178   : > { %v4615_v46 = vpop.f32.mrb[52].mxu0 }
 0x179   : > { %v4551_v40 = vpop.f32.mrb[52].mxu1  ;;  %v4616_v2 = vpop.f32.mrb[53].mxu0 }
 0x17a   : > { %v4552_v20 = vpop.f32.mrb[53].mxu1  ;;  %v4617_v23 = vadd.f32 %v4616_v2, %v4615_v46  ;;  %v4618_v30 = vpop.f32.mrb[54].mxu0 }
 0x17b   : > { %v4553_v7 = vadd.f32 %v4552_v20, %v4551_v40  ;;  %v4554_v16 = vpop.f32.mrb[54].mxu1  ;;  %v4619_v62 = vpop.f32.mrb[55].mxu0 }
 0x17c   : > { %v4555_v47 = vpop.f32.mrb[55].mxu1  ;;  %v6134_v0 = vadd.f32 %v4617_v23, %v6042_v32  ;;  %v4620_v55 = vadd.f32 %v4619_v62, %v4618_v30 }
 0x17d   : > { %v6129_v48 = vadd.f32 %v4553_v7, %v4441_v14  ;;  %v4556_v3 = vadd.f32 %v4555_v47, %v4554_v16 }
 0x17e   : > { %v6137_v8 = vadd.f32 %v4620_v55, %v6048_v18 }
 0x17f   : > { %v6131_v43 = vadd.f32 %v4556_v3, %v4444_v24 }
 0x180   : > { %v4621_v24 = vpop.f32.mrb[56].mxu0 }
 0x181   : > { %v4557_v51 = vpop.f32.mrb[56].mxu1  ;;  %v4622_v21 = vpop.f32.mrb[57].mxu0 }
 0x182   : > { %v4558_v4 = vpop.f32.mrb[57].mxu1  ;;  %v4623_v34 = vadd.f32 %v4622_v21, %v4621_v24  ;;  %v4624_v31 = vpop.f32.mrb[58].mxu0 }
 0x183   : > { %v4559_v61 = vadd.f32 %v4558_v4, %v4557_v51  ;;  %v4560_v1 = vpop.f32.mrb[58].mxu1  ;;  %v4625_v29 = vpop.f32.mrb[59].mxu0 }
 0x184   : > { %v4561_v14 = vpop.f32.mrb[59].mxu1  ;;  %v6144_v49 = vadd.f32 %v4623_v34, %v6065_v41  ;;  %v4626_v38 = vadd.f32 %v4625_v29, %v4624_v31 }
 0x185   : > { %v6139_v58 = vadd.f32 %v4559_v61, %v4447_v39  ;;  %v4562_v42 = vadd.f32 %v4561_v14, %v4560_v1 }
 0x186   : > { %v6147_v40 = vadd.f32 %v4626_v38, %v6071_v17 }
 0x187   : > { %v6141_v26 = vadd.f32 %v4562_v42, %v4450_v12 }
 0x188   : > { %v4627_v12 = vpop.f32.mrb[60].mxu0 }
 0x189   : > { %v4563_v32 = vpop.f32.mrb[60].mxu1  ;;  %v4628_v7 = vpop.f32.mrb[61].mxu0 }
 0x18a   : > { %v4564_v13 = vpop.f32.mrb[61].mxu1  ;;  %v4629_v47 = vadd.f32 %v4628_v7, %v4627_v12  ;;  %v4630_v3 = vpop.f32.mrb[62].mxu0 }
 0x18b   : > { %v4565_v6 = vadd.f32 %v4564_v13, %v4563_v32  ;;  %v4566_v18 = vpop.f32.mrb[62].mxu1  ;;  %v4631_v46 = vpop.f32.mrb[63].mxu0 }
 0x18c   : > { %v4567_v39 = vpop.f32.mrb[63].mxu1  ;;  %v6154_v2 = vadd.f32 %v4629_v47, %v6083_v22  ;;  %v4632_v23 = vadd.f32 %v4631_v46, %v4630_v3 }
 0x18d   : > { %v6149_v10 = vadd.f32 %v4565_v6, %v4453_v25  ;;  %v4568_v20 = vadd.f32 %v4567_v39, %v4566_v18 }
 0x18e   : > { %v6157_v51 = vadd.f32 %v4632_v23, %v6089_v59 }
 0x18f   : > { %v6151_v16 = vadd.f32 %v4568_v20, %v4456_v15 }
 0x190   : > { %v4633_v4 = vpop.f32.mrb[64].mxu0 }
 0x191   : > { %v4569_v41 = vpop.f32.mrb[64].mxu1  ;;  %v4634_v61 = vpop.f32.mrb[65].mxu0 }
 0x192   : > { %v4570_v30 = vpop.f32.mrb[65].mxu1  ;;  %v4635_v14 = vadd.f32 %v4634_v61, %v4633_v4  ;;  %v4636_v22 = vpop.f32.mrb[66].mxu0 }
 0x193   : > { %v4571_v62 = vadd.f32 %v4570_v30, %v4569_v41  ;;  %v4572_v17 = vpop.f32.mrb[66].mxu1  ;;  %v4637_v42 = vpop.f32.mrb[67].mxu0 }
 0x194   : > { %v4573_v25 = vpop.f32.mrb[67].mxu1  ;;  %v6166_v21 = vadd.f32 %v4635_v14, %v6096_v44  ;;  %v4638_v34 = vadd.f32 %v4637_v42, %v4636_v22 }
 0x195   : > { %v6160_v55 = vadd.f32 %v4571_v62, %v5908_v11  ;;  %v4574_v15 = vadd.f32 %v4573_v25, %v4572_v17 }
 0x196   : > { %v6169_v11 = vadd.f32 %v4638_v34, %v6100_v45 }
 0x197   : > { %v6163_v1 = vadd.f32 %v4574_v15, %v5912_v9 }
 0x198   : > { %v4639_v13 = vpop.f32.mrb[68].mxu0 }
 0x199   : > { %v4575_v24 = vpop.f32.mrb[68].mxu1  ;;  %v4640_v6 = vpop.f32.mrb[69].mxu0 }
 0x19a   : > { %v4576_v59 = vpop.f32.mrb[69].mxu1  ;;  %v4641_v39 = vadd.f32 %v4640_v6, %v4639_v13  ;;  %v4642_v44 = vpop.f32.mrb[70].mxu0 }
 0x19b   : > { %v4577_v31 = vadd.f32 %v4576_v59, %v4575_v24  ;;  %v4578_v29 = vpop.f32.mrb[70].mxu1  ;;  %v4643_v20 = vpop.f32.mrb[71].mxu0 }
 0x19c   : > { %v4579_v32 = vpop.f32.mrb[71].mxu1  ;;  %v6178_v7 = vadd.f32 %v4641_v39, %v6104_v56  ;;  %v4644_v47 = vadd.f32 %v4643_v20, %v4642_v44 }
 0x19d   : > { %v6172_v38 = vadd.f32 %v4577_v31, %v5931_v52  ;;  %v4580_v9 = vadd.f32 %v4579_v32, %v4578_v29 }
 0x19e   : > { %v6181_v52 = vadd.f32 %v4644_v47, %v6107_v19 }
 0x19f   : > { %v6175_v18 = vadd.f32 %v4580_v9, %v5939_v5 }
 0x1a0   : > { %v4645_v30 = vpop.f32.mrb[72].mxu0 }
 0x1a1   : > { %v4581_v12 = vpop.f32.mrb[72].mxu1  ;;  %v4646_v62 = vpop.f32.mrb[73].mxu0 }
 0x1a2   : > { %v4582_v45 = vpop.f32.mrb[73].mxu1  ;;  %v4647_v25 = vadd.f32 %v4646_v62, %v4645_v30  ;;  %v4648_v56 = vpop.f32.mrb[74].mxu0 }
 0x1a3   : > { %v4583_v3 = vadd.f32 %v4582_v45, %v4581_v12  ;;  %v4584_v46 = vpop.f32.mrb[74].mxu1  ;;  %v4649_v15 = vpop.f32.mrb[75].mxu0 }
 0x1a4   : > { %v4585_v41 = vpop.f32.mrb[75].mxu1  ;;  %v6190_v61 = vadd.f32 %v4647_v25, %v6110_v27  ;;  %v4650_v14 = vadd.f32 %v4649_v15, %v4648_v56 }
 0x1a5   : > { %v6184_v23 = vadd.f32 %v4583_v3, %v5957_v28  ;;  %v4586_v5 = vadd.f32 %v4585_v41, %v4584_v46 }
 0x1a6   : > { %v6193_v28 = vadd.f32 %v4650_v14, %v6113_v60 }
 0x1a7   : > { %v6187_v17 = vadd.f32 %v4586_v5, %v5964_v53 }
 0x1a8   : > { %v4651_v59 = vpop.f32.mrb[76].mxu0 }
 0x1a9   : > { %v4587_v4 = vpop.f32.mrb[76].mxu1  ;;  %v4652_v31 = vpop.f32.mrb[77].mxu0 }
 0x1aa   : > { %v4588_v19 = vpop.f32.mrb[77].mxu1  ;;  %v4653_v32 = vadd.f32 %v4652_v31, %v4651_v59  ;;  %v4654_v27 = vpop.f32.mrb[78].mxu0 }
 0x1ab   : > { %v4589_v22 = vadd.f32 %v4588_v19, %v4587_v4  ;;  %v4590_v42 = vpop.f32.mrb[78].mxu1  ;;  %v4655_v9 = vpop.f32.mrb[79].mxu0 }
 0x1ac   : > { %v4591_v24 = vpop.f32.mrb[79].mxu1  ;;  %v6202_v6 = vadd.f32 %v4653_v32, %v6115_v54  ;;  %v4656_v39 = vadd.f32 %v4655_v9, %v4654_v27 }
 0x1ad   : > { %v6196_v34 = vadd.f32 %v4589_v22, %v5990_v37  ;;  %v4592_v53 = vadd.f32 %v4591_v24, %v4590_v42 }
 0x1ae   : > { %v6205_v37 = vadd.f32 %v4656_v39, %v6117_v36 }
 0x1af   : > { %v6199_v29 = vadd.f32 %v4592_v53, %v5999_v35 }
 0x1b0   : > { %v4657_v35 = vpop.f32.mrb[80].mxu0 }
 0x1b1   : > { %v4721_v13 = vpop.f32.mrb[80].mxu1  ;;  %v4658_v3 = vpop.f32.mrb[81].mxu0 }
 0x1b2   : > { %v4722_v60 = vpop.f32.mrb[81].mxu1  ;;  %v4659_v41 = vadd.f32 %v4658_v3, %v4657_v35  ;;  %v4660_v54 = vpop.f32.mrb[82].mxu0 }
 0x1b3   : > { %v4723_v44 = vadd.f32 %v4722_v60, %v4721_v13  ;;  %v4724_v20 = vpop.f32.mrb[82].mxu1  ;;  %v4661_v5 = vpop.f32.mrb[83].mxu0 }
 0x1b4   : > { %v4725_v12 = vpop.f32.mrb[83].mxu1  ;;  %v6214_v62 = vadd.f32 %v4659_v41, %v6119_v63  ;;  %v4662_v25 = vadd.f32 %v4661_v5, %v4660_v54 }
 0x1b5   : > { %v4726_v47 = vadd.f32 %v4725_v12, %v4724_v20  ;;  %v6208_v45 = vadd.f32 %v4723_v44, %v6124_v50 }
 0x1b6   : > { %v6217_v4 = vadd.f32 %v4662_v25, %v6121_v33 }
 0x1b7   : > { %v6211_v46 = vadd.f32 %v4726_v47, %v6127_v57 }
 0x1b8   : > { %v4663_v57 = vpop.f32.mrb[84].mxu0 }
 0x1b9   : > { %v4727_v30 = vpop.f32.mrb[84].mxu1  ;;  %v4664_v22 = vpop.f32.mrb[85].mxu0 }
 0x1ba   : > { %v4728_v36 = vpop.f32.mrb[85].mxu1  ;;  %v4665_v24 = vadd.f32 %v4664_v22, %v4663_v57  ;;  %v4666_v63 = vpop.f32.mrb[86].mxu0 }
 0x1bb   : > { %v4729_v56 = vadd.f32 %v4728_v36, %v4727_v30  ;;  %v4730_v15 = vpop.f32.mrb[86].mxu1  ;;  %v4667_v53 = vpop.f32.mrb[87].mxu0 }
 0x1bc   : > { %v4731_v50 = vpop.f32.mrb[87].mxu1  ;;  %v6226_v31 = vadd.f32 %v4665_v24, %v6129_v48  ;;  %v4668_v32 = vadd.f32 %v4667_v53, %v4666_v63 }
 0x1bd   : > { %v4732_v14 = vadd.f32 %v4731_v50, %v4730_v15  ;;  %v6220_v19 = vadd.f32 %v4729_v56, %v6134_v0 }
 0x1be   : > { %v6229_v13 = vadd.f32 %v4668_v32, %v6131_v43 }
 0x1bf   : > { %v6223_v42 = vadd.f32 %v4732_v14, %v6137_v8 }
 0x1c0   : > { %v4669_v8 = vpop.f32.mrb[88].mxu0 }
 0x1c1   : > { %v4733_v59 = vpop.f32.mrb[88].mxu1  ;;  %v4670_v44 = vpop.f32.mrb[89].mxu0 }
 0x1c2   : > { %v4734_v33 = vpop.f32.mrb[89].mxu1  ;;  %v4671_v12 = vadd.f32 %v4670_v44, %v4669_v8  ;;  %v4672_v48 = vpop.f32.mrb[90].mxu0 }
 0x1c3   : > { %v4735_v27 = vadd.f32 %v4734_v33, %v4733_v59  ;;  %v4736_v9 = vpop.f32.mrb[90].mxu1  ;;  %v4673_v47 = vpop.f32.mrb[91].mxu0 }
 0x1c4   : > { %v4737_v0 = vpop.f32.mrb[91].mxu1  ;;  %v6238_v3 = vadd.f32 %v4671_v12, %v6139_v58  ;;  %v4674_v41 = vadd.f32 %v4673_v47, %v4672_v48 }
 0x1c5   : > { %v4738_v39 = vadd.f32 %v4737_v0, %v4736_v9  ;;  %v6232_v60 = vadd.f32 %v4735_v27, %v6144_v49 }
 0x1c6   : > { %v6241_v30 = vadd.f32 %v4674_v41, %v6141_v26 }
 0x1c7   : > { %v6235_v20 = vadd.f32 %v4738_v39, %v6147_v40 }
 0x1c8   : > { %v4675_v40 = vpop.f32.mrb[92].mxu0 }
 0x1c9   : > { %v4739_v35 = vpop.f32.mrb[92].mxu1  ;;  %v4676_v56 = vpop.f32.mrb[93].mxu0 }
 0x1ca   : > { %v4740_v43 = vpop.f32.mrb[93].mxu1  ;;  %v4677_v50 = vadd.f32 %v4676_v56, %v4675_v40  ;;  %v4678_v58 = vpop.f32.mrb[94].mxu0 }
 0x1cb   : > { %v4741_v54 = vadd.f32 %v4740_v43, %v4739_v35  ;;  %v4742_v5 = vpop.f32.mrb[94].mxu1  ;;  %v4679_v14 = vpop.f32.mrb[95].mxu0 }
 0x1cc   : > { %v4743_v49 = vpop.f32.mrb[95].mxu1  ;;  %v6250_v22 = vadd.f32 %v4677_v50, %v6149_v10  ;;  %v4680_v24 = vadd.f32 %v4679_v14, %v4678_v58 }
 0x1cd   : > { %v4744_v25 = vadd.f32 %v4743_v49, %v4742_v5  ;;  %v6244_v36 = vadd.f32 %v4741_v54, %v6154_v2 }
 0x1ce   : > { %v6253_v59 = vadd.f32 %v4680_v24, %v6151_v16 }
 0x1cf   : > { %v6247_v15 = vadd.f32 %v4744_v25, %v6157_v51 }
 0x1d0   : > { %v4681_v51 = vpop.f32.mrb[96].mxu0 }
 0x1d1   : > { %v4745_v57 = vpop.f32.mrb[96].mxu1  ;;  %v4682_v27 = vpop.f32.mrb[97].mxu0 }
 0x1d2   : > { %v4746_v26 = vpop.f32.mrb[97].mxu1  ;;  %v4683_v0 = vadd.f32 %v4682_v27, %v4681_v51  ;;  %v4684_v10 = vpop.f32.mrb[98].mxu0 }
 0x1d3   : > { %v4747_v63 = vadd.f32 %v4746_v26, %v4745_v57  ;;  %v4748_v53 = vpop.f32.mrb[98].mxu1  ;;  %v4685_v39 = vpop.f32.mrb[99].mxu0 }
 0x1d4   : > { %v4749_v2 = vpop.f32.mrb[99].mxu1  ;;  %v6262_v44 = vadd.f32 %v4683_v0, %v6160_v55  ;;  %v4686_v12 = vadd.f32 %v4685_v39, %v4684_v10 }
 0x1d5   : > { %v4750_v32 = vadd.f32 %v4749_v2, %v4748_v53  ;;  %v6256_v33 = vadd.f32 %v4747_v63, %v6166_v21 }
 0x1d6   : > { %v6265_v35 = vadd.f32 %v4686_v12, %v6163_v1 }
 0x1d7   : > { %v6259_v9 = vadd.f32 %v4750_v32, %v6169_v11 }
 0x1d8   : > { %v4687_v11 = vpop.f32.mrb[100].mxu0 }
 0x1d9   : > { %v4751_v8 = vpop.f32.mrb[100].mxu1  ;;  %v4688_v54 = vpop.f32.mrb[101].mxu0 }
 0x1da   : > { %v4752_v16 = vpop.f32.mrb[101].mxu1  ;;  %v4689_v49 = vadd.f32 %v4688_v54, %v4687_v11  ;;  %v4690_v55 = vpop.f32.mrb[102].mxu0 }
 0x1db   : > { %v4753_v48 = vadd.f32 %v4752_v16, %v4751_v8  ;;  %v4754_v47 = vpop.f32.mrb[102].mxu1  ;;  %v4691_v25 = vpop.f32.mrb[103].mxu0 }
 0x1dc   : > { %v4755_v21 = vpop.f32.mrb[103].mxu1  ;;  %v6274_v56 = vadd.f32 %v4689_v49, %v6172_v38  ;;  %v4692_v50 = vadd.f32 %v4691_v25, %v4690_v55 }
 0x1dd   : > { %v4756_v41 = vadd.f32 %v4755_v21, %v4754_v47  ;;  %v6268_v43 = vadd.f32 %v4753_v48, %v6178_v7 }
 0x1de   : > { %v6277_v57 = vadd.f32 %v4692_v50, %v6175_v18 }
 0x1df   : > { %v6271_v5 = vadd.f32 %v4756_v41, %v6181_v52 }
 0x1e0   : > { %v4693_v52 = vpop.f32.mrb[104].mxu0 }
 0x1e1   : > { %v4757_v40 = vpop.f32.mrb[104].mxu1  ;;  %v4694_v63 = vpop.f32.mrb[105].mxu0 }
 0x1e2   : > { %v4758_v1 = vpop.f32.mrb[105].mxu1  ;;  %v4695_v2 = vadd.f32 %v4694_v63, %v4693_v52  ;;  %v4696_v38 = vpop.f32.mrb[106].mxu0 }
 0x1e3   : > { %v4759_v58 = vadd.f32 %v4758_v1, %v4757_v40  ;;  %v4760_v14 = vpop.f32.mrb[106].mxu1  ;;  %v4697_v32 = vpop.f32.mrb[107].mxu0 }
 0x1e4   : > { %v4761_v7 = vpop.f32.mrb[107].mxu1  ;;  %v6286_v27 = vadd.f32 %v4695_v2, %v6184_v23  ;;  %v4698_v0 = vadd.f32 %v4697_v32, %v4696_v38 }
 0x1e5   : > { %v4762_v24 = vadd.f32 %v4761_v7, %v4760_v14  ;;  %v6280_v26 = vadd.f32 %v4759_v58, %v6190_v61 }
 0x1e6   : > { %v6289_v8 = vadd.f32 %v4698_v0, %v6187_v17 }
 0x1e7   : > { %v6283_v53 = vadd.f32 %v4762_v24, %v6193_v28 }
 0x1e8   : > { %v4699_v28 = vpop.f32.mrb[108].mxu0 }
 0x1e9   : > { %v4763_v51 = vpop.f32.mrb[108].mxu1  ;;  %v4700_v48 = vpop.f32.mrb[109].mxu0 }
 0x1ea   : > { %v4764_v18 = vpop.f32.mrb[109].mxu1  ;;  %v4701_v21 = vadd.f32 %v4700_v48, %v4699_v28  ;;  %v4702_v23 = vpop.f32.mrb[110].mxu0 }
 0x1eb   : > { %v4765_v10 = vadd.f32 %v4764_v18, %v4763_v51  ;;  %v4766_v39 = vpop.f32.mrb[110].mxu1  ;;  %v4703_v41 = vpop.f32.mrb[111].mxu0 }
 0x1ec   : > { %v4767_v61 = vpop.f32.mrb[111].mxu1  ;;  %v6298_v54 = vadd.f32 %v4701_v21, %v6196_v34  ;;  %v4704_v17 = vadd.f32 %v4703_v41, %v4702_v23 }
 0x1ed   : > { %v4768_v12 = vadd.f32 %v4767_v61, %v4766_v39  ;;  %v6292_v16 = vadd.f32 %v4765_v10, %v6202_v6 }
 0x1ee   : > { %v6301_v6 = vadd.f32 %v4704_v17, %v6199_v29 }
 0x1ef   : > { %v6295_v47 = vadd.f32 %v4768_v12, %v6205_v37 }
 0x1f0   : > { %v4859_v1 = vpop.f32.mrb[112].mxu0 }
 0x1f1   : > { %v4769_v11 = vpop.f32.mrb[112].mxu1  ;;  %v3462_v58 = vadd.f32 %v4859_v1, %v6220_v19  ;;  %v3453_v14 = vpop.f32.mrb[113].mxu0 }
 0x1f2   : > { %v4770_v49 = vpop.f32.mrb[113].mxu1  ;;  %v3454_v34 = vadd.f32 %v3453_v14, %v6208_v45  ;;  %v4860_v24 = vpop.f32.mrb[114].mxu0 }
 0x1f3   : > { %v4771_v55 = vadd.f32 %v4770_v49, %v4769_v11  ;;  %v4772_v25 = vpop.f32.mrb[114].mxu1  ;;  %v3465_v52 = vadd.f32 %v4860_v24, %v6223_v42  ;;  %v3456_v29 = vpop.f32.mrb[115].mxu0 }
 0x1f4   : > { %v4773_v40 = vpop.f32.mrb[115].mxu1  ;;  %v3457_v2 = vadd.f32 %v3456_v29, %v6211_v46  ;;  %v3580_v19 = vmax.f32 %v3454_v34, 0.0 }
 0x1f5   : > { %v4774_v50 = vadd.f32 %v4773_v40, %v4772_v25  ;;  %v6304_v37 = vadd.f32 %v4771_v55, %v6214_v62  ;;  %v3582_v62 = vmax.f32 %v3462_v58, 0.0  ;;  %v3583_v32 = vmax.f32 %v3465_v52, 0.0 }
 0x1f6   : > { %v3581_v45 = vmax.f32 %v3457_v2, 0.0 }
 0x1f7   : > { %v6308_v7 = vadd.f32 %v4774_v50, %v6217_v4  ;;  %v4282_v42 = vpack.c.bf16 %v3583_v32, %v3582_v62 }
 0x1f8   : > { %v4277_v46 = vpack.c.bf16 %v3581_v45, %v3580_v19  ;;  %v4863_v39 = vpop.f32.mrb[116].mxu0 }
 0x1f9   : > { %v4775_v63 = vpop.f32.mrb[116].mxu1  ;;  %4354 = vst [vmem:[%s6317_s24 + $0x8] sm:$0xff] %v4282_v42   ;;  %v3478_v61 = vadd.f32 %v4863_v39, %v6244_v36  ;;  %v3469_v12 = vpop.f32.mrb[117].mxu0 }
 0x1fa   : > { %v4776_v38 = vpop.f32.mrb[117].mxu1  ;;  %4278 = vst [vmem:[%s6317_s24] sm:$0xff] %v4277_v46   ;;  %v3470_v48 = vadd.f32 %v3469_v12, %v6232_v60  ;;  %v4864_v21 = vpop.f32.mrb[118].mxu0 }
 0x1fb   : > { %v4777_v51 = vadd.f32 %v4776_v38, %v4775_v63  ;;  %v4778_v0 = vpop.f32.mrb[118].mxu1  ;;  %v3481_v23 = vadd.f32 %v4864_v21, %v6247_v15  ;;  %v3472_v41 = vpop.f32.mrb[119].mxu0  ;;  %v3586_v49 = vmax.f32 %v3478_v61, 0.0 }
 0x1fc   : > { %v4779_v4 = vpop.f32.mrb[119].mxu1  ;;  %v3584_v40 = vmax.f32 %v3470_v48, 0.0 }
 0x1fd   : > { %v4780_v18 = vadd.f32 %v4779_v4, %v4778_v0  ;;  %v6320_v10 = vadd.f32 %v4777_v51, %v6226_v31  ;;  %v3473_v31 = vadd.f32 %v3472_v41, %v6235_v20  ;;  %v3587_v55 = vmax.f32 %v3481_v23, 0.0 }
 0x1ff   : > { %v6325_v28 = vadd.f32 %v4780_v18, %v6229_v13  ;;  %v3585_v13 = vmax.f32 %v3473_v31, 0.0  ;;  %v4292_v1 = vpack.c.bf16 %v3587_v55, %v3586_v49 }
 0x200   : > { %v4867_v14 = vpop.f32.mrb[120].mxu0 }
 0x201   : > { %v4781_v11 = vpop.f32.mrb[120].mxu1  ;;  %v4287_v15 = vpack.c.bf16 %v3585_v13, %v3584_v40  ;;  %4356 = vst [vmem:[%s6317_s24 + $0x18] sm:$0xff] %v4292_v1   ;;  %v3494_v34 = vadd.f32 %v4867_v14, %v6268_v43  ;;  %v3485_v20 = vpop.f32.mrb[121].mxu0 }
 0x202   : > { %v4782_v17 = vpop.f32.mrb[121].mxu1  ;;  %v3486_v52 = vadd.f32 %v3485_v20, %v6256_v33  ;;  %v4868_v29 = vpop.f32.mrb[122].mxu0 }
 0x203   : > { %v4783_v36 = vadd.f32 %v4782_v17, %v4781_v11  ;;  %v4784_v25 = vpop.f32.mrb[122].mxu1  ;;  %4355 = vst [vmem:[%s6317_s24 + $0x10] sm:$0xff] %v4287_v15   ;;  %v3497_v63 = vadd.f32 %v4868_v29, %v6271_v5  ;;  %v3488_v2 = vpop.f32.mrb[123].mxu0  ;;  %v3590_v32 = vmax.f32 %v3494_v34, 0.0 }
 0x204   : > { %v4785_v50 = vpop.f32.mrb[123].mxu1  ;;  %v3588_v19 = vmax.f32 %v3486_v52, 0.0 }
 0x205   : > { %v4786_v58 = vadd.f32 %v4785_v50, %v4784_v25  ;;  %v6332_v60 = vadd.f32 %v4783_v36, %v6238_v3  ;;  %v3489_v3 = vadd.f32 %v3488_v2, %v6259_v9  ;;  %v3591_v51 = vmax.f32 %v3497_v63, 0.0 }
 0x207   : > { %v6337_v24 = vadd.f32 %v4786_v58, %v6241_v30  ;;  %v3589_v30 = vmax.f32 %v3489_v3, 0.0  ;;  %v4302_v4 = vpack.c.bf16 %v3591_v51, %v3590_v32 }
 0x208   : > { %v4871_v5 = vpop.f32.mrb[124].mxu0 }
 0x209   : > { %v4787_v38 = vpop.f32.mrb[124].mxu1  ;;  %v4297_v18 = vpack.c.bf16 %v3589_v30, %v3588_v19  ;;  %4358 = vst [vmem:[%s6317_s24 + $0x28] sm:$0xff] %v4302_v4   ;;  %v3510_v46 = vadd.f32 %v4871_v5, %v6292_v16  ;;  %v3501_v39 = vpop.f32.mrb[125].mxu0 }
 0x20a   : > { %v4788_v62 = vpop.f32.mrb[125].mxu1  ;;  %v3502_v61 = vadd.f32 %v3501_v39, %v6280_v26  ;;  %v4872_v12 = vpop.f32.mrb[126].mxu0 }
 0x20b   : > { %v4789_v43 = vadd.f32 %v4788_v62, %v4787_v38  ;;  %v4790_v0 = vpop.f32.mrb[126].mxu1  ;;  %4357 = vst [vmem:[%s6317_s24 + $0x20] sm:$0xff] %v4297_v18   ;;  %v3513_v48 = vadd.f32 %v4872_v12, %v6295_v47  ;;  %v3504_v21 = vpop.f32.mrb[127].mxu0  ;;  %v3594_v11 = vmax.f32 %v3510_v46, 0.0 }
 0x20c   : > { %v4791_v45 = vpop.f32.mrb[127].mxu1  ;;  %v3505_v41 = vadd.f32 %v3504_v21, %v6283_v53  ;;  %v3592_v49 = vmax.f32 %v3502_v61, 0.0 }
 0x20d   : > { %v4792_v42 = vadd.f32 %v4791_v45, %v4790_v0  ;;  %v3381_v33 = vadd.f32 %v4789_v43, %v6250_v22  ;;  %v3595_v31 = vmax.f32 %v3513_v48, 0.0 }
 0x20e   : > { %v3593_v55 = vmax.f32 %v3505_v41, 0.0 }
 0x20f   : > { %v3384_v9 = vadd.f32 %v4792_v42, %v6253_v59  ;;  %v4312_v36 = vpack.c.bf16 %v3595_v31, %v3594_v11 }
 0x210   : > { %v4307_v40 = vpack.c.bf16 %v3593_v55, %v3592_v49  ;;  %v4875_v47 = vpop.f32.mrb[128].mxu0 }
 0x211   : > { %v4793_v23 = vpop.f32.mrb[128].mxu1  ;;  %4360 = vst [vmem:[%s6317_s24 + $0x38] sm:$0xff] %v4312_v36   ;;  %v3526_v13 = vadd.f32 %v4875_v47, %v6320_v10  ;;  %v3517_v50 = vpop.f32.mrb[129].mxu0 }
 0x212   : > { %v4794_v22 = vpop.f32.mrb[129].mxu1  ;;  %4359 = vst [vmem:[%s6317_s24 + $0x30] sm:$0xff] %v4307_v40   ;;  %v3518_v1 = vadd.f32 %v3517_v50, %v6304_v37  ;;  %v4876_v58 = vpop.f32.mrb[130].mxu0 }
 0x213   : > { %v4795_v17 = vadd.f32 %v4794_v22, %v4793_v23  ;;  %v4796_v16 = vpop.f32.mrb[130].mxu1  ;;  %v3529_v15 = vadd.f32 %v4876_v58, %v6325_v28  ;;  %v3520_v14 = vpop.f32.mrb[131].mxu0  ;;  %v3598_v52 = vmax.f32 %v3526_v13, 0.0 }
 0x214   : > { %v4797_v59 = vpop.f32.mrb[131].mxu1  ;;  %v3521_v20 = vadd.f32 %v3520_v14, %v6308_v7  ;;  %v3596_v2 = vmax.f32 %v3518_v1, 0.0 }
 0x215   : > { %v4798_v25 = vadd.f32 %v4797_v59, %v4796_v16  ;;  %v3389_v26 = vadd.f32 %v4795_v17, %v6262_v44  ;;  %v3599_v29 = vmax.f32 %v3529_v15, 0.0 }
 0x216   : > { %v3597_v38 = vmax.f32 %v3521_v20, 0.0 }
 0x217   : > { %v3392_v53 = vadd.f32 %v4798_v25, %v6265_v35  ;;  %v4322_v3 = vpack.c.bf16 %v3599_v29, %v3598_v52 }
 0x218   : > { %v4317_v32 = vpack.c.bf16 %v3597_v38, %v3596_v2  ;;  %v4879_v28 = vpop.f32.mrb[132].mxu0 }
 0x219   : > { %v4799_v34 = vpop.f32.mrb[132].mxu1  ;;  %4362 = vst [vmem:[%s6317_s24 + $0x48] sm:$0xff] %v4322_v3   ;;  %v3542_v51 = vadd.f32 %v4879_v28, %v3381_v33  ;;  %v3533_v43 = vpop.f32.mrb[133].mxu0 }
 0x21a   : > { %v4800_v44 = vpop.f32.mrb[133].mxu1  ;;  %4361 = vst [vmem:[%s6317_s24 + $0x40] sm:$0xff] %v4317_v32   ;;  %v3534_v0 = vadd.f32 %v3533_v43, %v6332_v60  ;;  %v4880_v19 = vpop.f32.mrb[134].mxu0 }
 0x21b   : > { %v4801_v63 = vadd.f32 %v4800_v44, %v4799_v34  ;;  %v4802_v10 = vpop.f32.mrb[134].mxu1  ;;  %v3545_v30 = vadd.f32 %v4880_v19, %v3384_v9  ;;  %v3536_v45 = vpop.f32.mrb[135].mxu0  ;;  %v3602_v5 = vmax.f32 %v3542_v51, 0.0 }
 0x21c   : > { %v4803_v35 = vpop.f32.mrb[135].mxu1  ;;  %v3537_v42 = vadd.f32 %v3536_v45, %v6337_v24  ;;  %v3600_v33 = vmax.f32 %v3534_v0, 0.0 }
 0x21d   : > { %v4804_v62 = vadd.f32 %v4803_v35, %v4802_v10  ;;  %v3397_v37 = vadd.f32 %v4801_v63, %v6274_v56  ;;  %v3603_v56 = vmax.f32 %v3545_v30, 0.0 }
 0x21e   : > { %v3601_v61 = vmax.f32 %v3537_v42, 0.0 }
 0x21f   : > { %v3400_v7 = vadd.f32 %v4804_v62, %v6277_v57  ;;  %v4332_v57 = vpack.c.bf16 %v3603_v56, %v3602_v5 }
 0x220   : > { %v4327_v21 = vpack.c.bf16 %v3601_v61, %v3600_v33  ;;  %v4883_v9 = vpop.f32.mrb[136].mxu0 }
 0x221   : > { %v4805_v4 = vpop.f32.mrb[136].mxu1  ;;  %4364 = vst [vmem:[%s6317_s24 + $0x58] sm:$0xff] %v4332_v57   ;;  %v3558_v23 = vadd.f32 %v4883_v9, %v3397_v37  ;;  %v3549_v41 = vpop.f32.mrb[137].mxu0 }
 0x222   : > { %v4806_v18 = vpop.f32.mrb[137].mxu1  ;;  %4363 = vst [vmem:[%s6317_s24 + $0x50] sm:$0xff] %v4327_v21   ;;  %v3550_v22 = vadd.f32 %v3549_v41, %v3389_v26  ;;  %v4884_v11 = vpop.f32.mrb[138].mxu0 }
 0x223   : > { %v4807_v46 = vadd.f32 %v4806_v18, %v4805_v4  ;;  %v4808_v39 = vpop.f32.mrb[138].mxu1  ;;  %v3561_v31 = vadd.f32 %v4884_v11, %v3400_v7  ;;  %v3552_v17 = vpop.f32.mrb[139].mxu0  ;;  %v3606_v59 = vmax.f32 %v3558_v23, 0.0 }
 0x224   : > { %v4809_v12 = vpop.f32.mrb[139].mxu1  ;;  %v3553_v49 = vadd.f32 %v3552_v17, %v3392_v53  ;;  %v3604_v40 = vmax.f32 %v3550_v22, 0.0 }
 0x225   : > { %v4810_v48 = vadd.f32 %v4809_v12, %v4808_v39  ;;  %v3405_v60 = vadd.f32 %v4807_v46, %v6286_v27  ;;  %v3607_v36 = vmax.f32 %v3561_v31, 0.0 }
 0x226   : > { %v3605_v47 = vmax.f32 %v3553_v49, 0.0 }
 0x227   : > { %v3408_v24 = vadd.f32 %v4810_v48, %v6289_v8  ;;  %v4342_v50 = vpack.c.bf16 %v3607_v36, %v3606_v59 }
 0x228   : > { %v4337_v26 = vpack.c.bf16 %v3605_v47, %v3604_v40  ;;  %v4887_v58 = vpop.f32.mrb[140].mxu0 }
 0x229   : > { %v4811_v16 = vpop.f32.mrb[140].mxu1  ;;  %4366 = vst [vmem:[%s6317_s24 + $0x68] sm:$0xff] %v4342_v50   ;;  %v3565_v53 = vpop.f32.mrb[141].mxu0 }
 0x22a   : > { %v4812_v55 = vpop.f32.mrb[141].mxu1  ;;  %4365 = vst [vmem:[%s6317_s24 + $0x60] sm:$0xff] %v4337_v26   ;;  %v3566_v34 = vadd.f32 %v3565_v53, %v3405_v60  ;;  %v4888_v20 = vpop.f32.mrb[142].mxu0 }
 0x22b   : > { %v4813_v27 = vadd.f32 %v4812_v55, %v4811_v16  ;;  %v4814_v25 = vpop.f32.mrb[142].mxu1  ;;  %v3568_v52 = vpop.f32.mrb[143].mxu0 }
 0x22c   : > { %v4815_v13 = vpop.f32.mrb[143].mxu1  ;;  %v3569_v29 = vadd.f32 %v3568_v52, %v3408_v24  ;;  %v3608_v2 = vmax.f32 %v3566_v34, 0.0 }
 0x22d   : > { %v3413_v8 = vadd.f32 %v4813_v27, %v6298_v54  ;;  %v4816_v1 = vadd.f32 %v4815_v13, %v4814_v25 }
 0x22e   : > { %v3609_v54 = vmax.f32 %v3569_v29, 0.0 }
 0x22f   : > { %v3574_v15 = vadd.f32 %v4887_v58, %v3413_v8  ;;  %v3416_v14 = vadd.f32 %v4816_v1, %v6301_v6 }
 0x230   : > { %v4347_v35 = vpack.c.bf16 %v3609_v54, %v3608_v2 }
 0x231   : > { %v3577_v44 = vadd.f32 %v4888_v20, %v3416_v14  ;;  %v3610_v63 = vmax.f32 %v3574_v15, 0.0 }
 0x232   : > { %4367 = vst [vmem:[%s6317_s24 + $0x70] sm:$0xff] %v4347_v35  }
 0x233   : > { %v3611_v10 = vmax.f32 %v3577_v44, 0.0 }
 0x235   : > { %v4352_v38 = vpack.c.bf16 %v3611_v10, %v3610_v63 }
 0x237   : > { %4368 = vst [vmem:[%s6317_s24 + $0x78] sm:$0xff] %v4352_v38  }
 0x238 PF: > { %s12_s11 = sadd.s32 1, %s5128_s11   ;;  %s6393_s9 = smov %s5124_s10 }
 0x239   : > { %p9_p5 = scmp.ge.s32.totalorder %s12_s11, 4   ;;  %s6394_s10 = smov %s6396_s12 }
 0x23b   :  { %11 = sbr.rel (!%p9_p5) target bundleno = 2 (0x2), region = 62 }

// kernel: basic_block_forward.3
= control target key start
LH: loop header
LB: loop body
LE: loop exit
PB: predicated region body
PF: predicated region fallthrough
CT: control target
= control target key end

     0   :  { %8 = vsyncpa [#allocation4], 0  ;;  %s6288_s0 = inlined_call_operand.vmem [shape: bf16[2,16,16,128], index: 0, kind: input, shape index: {}]   ;;  %s6289_s1 = inlined_call_operand.vmem [shape: bf16[1152,128], index: 1, kind: input, shape index: {}]   ;;  %s6290_s2 = inlined_call_operand.vmem [shape: f32[2,16,16,128], index: 2, kind: input, shape index: {}]   ;;  %s6291_s3 = inlined_call_operand.hbm [shape: f32[2,16,16,128], index: 3, kind: output, shape index: {}]  }
   0x1   :  { %10 = vsyncpa [#allocation4 + $0x1], 0  ;;  %s4911_s12 = smov 0   ;;  %s4913_s13 = smov 0  }
   0x2   :  { %s4915_s14 = smov 0   ;;  %s4917_s15 = smov 0  }
   0x3   :  { %s4919_s16 = smov 0   ;;  %s4921_s17 = smov 0  }
   0x4 LB: > { %s3755_s18 = sadd.s32 4294967295, %s4885_s17   ;;  %s3756_s19 = sadd.s32 4294967294, %s4885_s17   ;;  %s4885_s17 = sphi %s4921_s17, %s16_s17   ;;  %s4881_s16 = sphi %s4919_s16, %s6304_s16   ;;  %s4877_s15 = sphi %s4917_s15, %s6303_s15   ;;  %s4873_s14 = sphi %s4915_s14, %s6302_s14   ;;  %s4869_s13 = sphi %s4913_s13, %s6301_s13   ;;  %s4865_s12 = sphi %s4911_s12, %s6300_s12  }
   0x5   : > { %s28_s20 = sadd.s32 1, %s4881_s16  ;;  %s112_s21 = sadd.s32 1, %s4873_s14 }
   0x6   : > { %p30_p0 = scmp.ge.s32.totalorder %s28_s20, 2  ;;  %p122_p1 = scmp.ne.s32.totalorder %s4873_s14, %s4869_s13 }
   0x7   : > { %p123_p2 = scmp.eq.s32.totalorder %s3755_s18, 1  ;;  %p128_p3 = scmp.ne.s32.totalorder %s4869_s13, %s4865_s12 }
   0x8   : > { %s6306_s20 = smov (%p30_p0, %s28_s20), 0  ;;  %p129_p5 = scmp.eq.s32.totalorder %s3756_s19, 1 }
   0x9   : > { %p4951_p4 = por %p123_p2, %p122_p1  ;;  %s107_s23 = ssub.s32 %s4881_s16, %s6306_s20 }
   0xa   : > { %p3759_p6 = scmp.ge.s32.totalorder %s4885_s17, 1  ;;  %p110_p7 = scmp.eq.s32.totalorder %s107_s23, 0 }
   0xb   : > { %p4958_p8 = por %p129_p5, %p128_p3  ;;  %p172_p9 = scmp.lt.s32.totalorder %s4885_s17, 3 }
   0xc   : > { %s4964_s25 = scalar_select %p110_p7, %s4873_s14, %s112_s21  }
   0xd   : > { %p173_p10 = pnand %p3759_p6, %p172_p9 }
   0xe   : > { %v4631_v0 = vld [vmem:[%s6289_s1 + $0x40] sm:$0xff] (!%p173_p10)   ;;  %v4887_v2 = vmov (!%p173_p10), 0   ;;  %v4633_v3 = vld [vmem:[%s6289_s1 + $0x48] sm:$0xff] (!%p173_p10)   ;;  %v4635_v5 = vld [vmem:[%s6289_s1 + $0x50] sm:$0xff] (!%p173_p10)   ;;  %p206_p11 = scmp.lt.s32.totalorder (!%p173_p10), %s4877_s15, 1  ;;  %vm634_vm0 = vcmask (!%p173_p10), 1043456  }
   0xf   : > { %176 = sbr.rel (%p173_p10) target bundleno = 590 (0x24e), region = 32  ;;  %v4632_v1 = vld [vmem:[%s6289_s1] sm:$0xff] (!%p173_p10)   ;;  %224 = vst [vmem:[#allocation2] sm:$0xf] (!%p173_p10), %v4887_v2  ;;  %225 = vst [vmem:[#allocation2 + $0x4] sm:$0xf] (!%p173_p10), %v4887_v2  ;;  %4037 = vmatprep.subr.bf16.mxu0 (!%p173_p10), %v4631_v0  ;;  %4557 = vmatprep.subr.bf16.mxu1 (!%p173_p10), %v4631_v0 }
  0x10   : > { %226 = vst [vmem:[#allocation2 + $0x8] sm:$0x1] (!%p173_p10), %v4887_v2  ;;  %227 = vst [vmem:[#allocation2 + $0xc] sm:$0xf] (!%p173_p10), %v4887_v2  ;;  %4038 = vmatpush3.bf16.msra.mxu0 (!%p173_p10), %v4632_v1  ;;  %4565 = vmatpush3.bf16.msra.mxu1 (!%p173_p10), %v4632_v1  ;;  %v4634_v4 = vld [vmem:[%s6289_s1 + $0x8] sm:$0xff] (!%p173_p10)   ;;  %v4636_v6 = vld [vmem:[%s6289_s1 + $0x10] sm:$0xff] (!%p173_p10)  }
  0x11   : > { %228 = vst [vmem:[#allocation2 + $0x10] sm:$0xf] (!%p173_p10), %v4887_v2  ;;  %229 = vst [vmem:[#allocation2 + $0x14] sm:$0x1] (!%p173_p10), %v4887_v2  ;;  %4039 = vmatprep.subr.bf16.mxu0 (!%p173_p10), %v4633_v3  ;;  %4558 = vmatprep.subr.bf16.mxu1 (!%p173_p10), %v4633_v3  ;;  %v4637_v7 = vld [vmem:[%s6289_s1 + $0x58] sm:$0xff] (!%p173_p10)   ;;  %v4639_v9 = vld [vmem:[%s6289_s1 + $0x60] sm:$0xff] (!%p173_p10)  }
  0x12   : > { %230 = vst [vmem:[#allocation2 + $0x18] sm:$0xf] (!%p173_p10), %v4887_v2  ;;  %231 = vst [vmem:[#allocation2 + $0x1c] sm:$0xf] (!%p173_p10), %v4887_v2  ;;  %v4638_v8 = vld [vmem:[%s6289_s1 + $0x18] sm:$0xff] (!%p173_p10)   ;;  %v4640_v10 = vld [vmem:[%s6289_s1 + $0x20] sm:$0xff] (!%p173_p10)  }
  0x13   : > { %232 = vst [vmem:[#allocation2 + $0x20] sm:$0x1] (!%p173_p10), %v4887_v2  ;;  %233 = vst [vmem:[#allocation2 + $0x24] sm:$0xf] (!%p173_p10), %v4887_v2  ;;  %v4641_v11 = vld [vmem:[%s6289_s1 + $0x68] sm:$0xff] (!%p173_p10)   ;;  %vm641_vm1 = vcmask (!%p173_p10), 1040384  }
  0x14   : > { %234 = vst [vmem:[#allocation2 + $0x28] sm:$0xf] (!%p173_p10), %v4887_v2  ;;  %235 = vst [vmem:[#allocation2 + $0x2c] sm:$0x1] (!%p173_p10), %v4887_v2  ;;  %4040 = vmatpush3.bf16.msra.mxu0 (!%p173_p10), %v4634_v4  ;;  %4566 = vmatpush3.bf16.msra.mxu1 (!%p173_p10), %v4634_v4  ;;  %vm1260_vm2 = vcmask (!%p173_p10), 1046528   ;;  %v4642_v16 = vld [vmem:[%s6289_s1 + $0x28] sm:$0xff] (!%p173_p10)  }
  0x15   : > { %236 = vst [vmem:[#allocation2 + $0x30] sm:$0xf] (!%p173_p10), %v4887_v2  ;;  %237 = vst [vmem:[#allocation2 + $0x34] sm:$0xf] (!%p173_p10), %v4887_v2  ;;  %4041 = vmatprep.subr.bf16.mxu0 (!%p173_p10), %v4635_v5  ;;  %4559 = vmatprep.subr.bf16.mxu1 (!%p173_p10), %v4635_v5  ;;  %vm1051_vm3 = vsmask.f32 (!%p173_p10), 7424 }
  0x16   : > { %238 = vst [vmem:[#allocation2 + $0x38] sm:$0x1] %v4887_v2  ;;  %239 = vst [vmem:[#allocation2 + $0x3c] sm:$0xf] %v4887_v2  ;;  %s4989_s19 = scalar_select %p206_p11, %s4877_s15, 1  ;;  %v5009_v12 = vld [vmem:[#allocation2] sm:$0xff]  }
  0x17   : > { %240 = vst [vmem:[#allocation2 + $0x40] sm:$0xf] %v4887_v2  ;;  %241 = vst [vmem:[#allocation2 + $0x44] sm:$0x1] %v4887_v2  ;;  %vm310_vm4 = vsmask.f32 256 }
  0x18   : > { %242 = vst [vmem:[#allocation2 + $0x48] sm:$0xf] %v4887_v2  ;;  %243 = vst [vmem:[#allocation2 + $0x4c] sm:$0xf] %v4887_v2  ;;  %4042 = vmatpush3.bf16.msra.mxu0 %v4636_v6  ;;  %4567 = vmatpush3.bf16.msra.mxu1 %v4636_v6  ;;  %s4034_s28 = sshll.u32 %s4989_s19, 7  ;;  %v1053_v17 = vshrl.u32 %v5009_v12, 16 }
  0x19   : > { %244 = vst [vmem:[#allocation2 + $0x50] sm:$0x1] %v4887_v2  ;;  %245 = vst [vmem:[#allocation2 + $0x54] sm:$0xf] %v4887_v2  ;;  %4043 = vmatprep.subr.bf16.mxu0 %v4637_v7  ;;  %4560 = vmatprep.subr.bf16.mxu1 %v4637_v7  ;;  %s5007_s8 = scalar_lea.vmem %s6288_s0, %s4034_s28  ;;  %v1055_v18 = vshll.u32 %v5009_v12, 16  ;;  %v4643_v21 = vld [vmem:[%s6289_s1 + $0x70] sm:$0xff]  }
  0x1a   : > { %246 = vst [vmem:[#allocation2 + $0x58] sm:$0xf] %v4887_v2  ;;  %247 = vst [vmem:[#allocation2 + $0x5c] sm:$0x1] %v4887_v2  ;;  %v300_v14 = vld [vmem:[%s5007_s8 + $0x58] sm:$0xf] }
  0x1b   : > { %248 = vst [vmem:[#allocation2 + $0x60] sm:$0xf] %v4887_v2  ;;  %249 = vst [vmem:[#allocation2 + $0x64] sm:$0xf] %v4887_v2  ;;  %v301_v15 = vld [vmem:[%s5007_s8 + $0x5c] sm:$0xf] }
  0x1c   : > { %250 = vst [vmem:[#allocation2 + $0x68] sm:$0x1] %v4887_v2  ;;  %251 = vst [vmem:[#allocation2 + $0x6c] sm:$0xf] %v4887_v2  ;;  %4044 = vmatpush3.bf16.msra.mxu0 %v4638_v8  ;;  %4568 = vmatpush3.bf16.msra.mxu1 %v4638_v8  ;;  %vm311_vm5 = vsmask.f32 4368 }
  0x1d   : > { %252 = vst [vmem:[#allocation2 + $0x70] sm:$0xf] %v4887_v2  ;;  %253 = vst [vmem:[#allocation2 + $0x74] sm:$0x1] %v4887_v2  ;;  %4045 = vmatprep.subr.bf16.mxu0 %v4639_v9  ;;  %4561 = vmatprep.subr.bf16.mxu1 %v4639_v9  ;;  %v501_v22 = vshrl.u32 %v300_v14, 16  ;;  %v504_v23 = vshll.u32 %v300_v14, 16 }
  0x1e   : > { %254 = vst [vmem:[#allocation2 + $0x78] sm:$0xf] %v4887_v2  ;;  %255 = vst [vmem:[#allocation2 + $0x7c] sm:$0xf] %v4887_v2  ;;  %v509_v24 = vshrl.u32 %v301_v15, 16  ;;  %v4644_v26 = vld [vmem:[%s6289_s1 + $0x30] sm:$0xff]  }
  0x1f   : > { %256 = vst [vmem:[#allocation2 + $0x80] sm:$0x1] %v4887_v2  ;;  %257 = vst [vmem:[#allocation2 + $0x84] sm:$0xf] %v4887_v2  ;;  %v1057_v27 = vrot.slane %v1055_v18, 1  ;;  %v512_v30 = vshll.u32 %v301_v15, 16 }
  0x20   : > { %258 = vst [vmem:[#allocation2 + $0x88] sm:$0xf] %v4887_v2  ;;  %259 = vst [vmem:[#allocation2 + $0x8c] sm:$0x1] %v4887_v2  ;;  %4046 = vmatpush3.bf16.msra.mxu0 %v4640_v10  ;;  %4569 = vmatpush3.bf16.msra.mxu1 %v4640_v10  ;;  %vm635_vm8 = vsmask.f32 7938 }
  0x21   : > { %260 = vst [vmem:[#allocation2 + $0x90] sm:$0xf] %v4887_v2  ;;  %261 = vst [vmem:[#allocation2 + $0x94] sm:$0xf] %v4887_v2  ;;  %4047 = vmatprep.subr.bf16.mxu0 %v4641_v11  ;;  %4562 = vmatprep.subr.bf16.mxu1 %v4641_v11  ;;  %v4645_v32 = vld [vmem:[%s6289_s1 + $0x78] sm:$0xff]   ;;  %v503_v33 = vrot.slane %v501_v22, 7  ;;  %v1058_v37 = vor.u32 %v1057_v27, %v1053_v17 }
  0x22   : > { %262 = vst [vmem:[#allocation2 + $0x98] sm:$0x1] %v4887_v2  ;;  %263 = vst [vmem:[#allocation2 + $0x9c] sm:$0xf] %v4887_v2  ;;  %v511_v34 = vrot.slane %v509_v24, 7  ;;  %v1261_v43 = vrot.slane %v5009_v12, 1 }
  0x23   : > { %264 = vst [vmem:[#allocation2 + $0xa0] sm:$0xf] %v4887_v2  ;;  %265 = vst [vmem:[#allocation2 + $0xa4] sm:$0x1] %v4887_v2  ;;  %v506_v38 = vor.u32 %v504_v23, %v503_v33  ;;  %v507_v39 = vrot.slane %v503_v33, 4  ;;  %v4646_v44 = vld [vmem:[%s6289_s1 + $0x38] sm:$0xff]  }
  0x24   : > { %266 = vst [vmem:[#allocation2 + $0xa8] sm:$0xf] %v4887_v2  ;;  %267 = vst [vmem:[#allocation2 + $0xac] sm:$0xf] %v4887_v2  ;;  %4048 = vmatpush3.bf16.msra.mxu0 %v4642_v16  ;;  %4570 = vmatpush3.bf16.msra.mxu1 %v4642_v16  ;;  %v514_v40 = vor.u32 %v512_v30, %v511_v34  ;;  %v516_v41 = vrot.slane %v511_v34, 4  ;;  %v4651_v48 = vld [vmem:[%s6289_s1 + $0xc0] sm:$0xff]  }
  0x25   : > { %268 = vst [vmem:[#allocation2 + $0xb0] sm:$0x1] %v4887_v2  ;;  %269 = vst [vmem:[#allocation2 + $0xb4] sm:$0xf] %v4887_v2  ;;  %4049 = vmatprep.subr.bf16.mxu0 %v4643_v21  ;;  %4563 = vmatprep.subr.bf16.mxu1 %v4643_v21  ;;  %v4654_v50 = vld [vmem:[%s6289_s1 + $0x140] sm:$0xff]   ;;  %s4035_s10 = sshll.u32 %s4989_s19, 8 }
  0x26   : > { %270 = vst [vmem:[#allocation2 + $0xb8] sm:$0xf] %v4887_v2  ;;  %271 = vst [vmem:[#allocation2 + $0xbc] sm:$0x1] %v4887_v2  ;;  %v278_v51 = vld [vmem:[%s5007_s8] sm:$0xf]  ;;  %s5661_s21 = scalar_lea.vmem %s6290_s2, %s4035_s10 }
  0x27   : > { %272 = vst [vmem:[#allocation2 + $0xc0] sm:$0xf] %v4887_v2  ;;  %273 = vst [vmem:[#allocation2 + $0xc4] sm:$0xf] %v4887_v2  ;;  %v279_v52 = vld [vmem:[%s5007_s8 + $0x4] sm:$0xf] }
  0x28   : > { %274 = vst [vmem:[#allocation2 + $0xc8] sm:$0x1] %v4887_v2  ;;  %275 = vst [vmem:[#allocation2 + $0xcc] sm:$0xf] %v4887_v2  ;;  %v716_v31 = vld [vmem:[#allocation2 + $0x90] sm:$0xf]  ;;  %4050 = vmatpush3.bf16.msra.mxu0 %v4644_v26  ;;  %4571 = vmatpush3.bf16.msra.mxu1 %v4644_v26 }
  0x29   : > { %276 = vst [vmem:[#allocation2 + $0xd0] sm:$0xf] %v4887_v2  ;;  %277 = vst [vmem:[#allocation2 + $0xd4] sm:$0x1] %v4887_v2  ;;  %v720_v36 = vld [vmem:[#allocation2 + $0x98] sm:$0x1]  ;;  %4051 = vmatprep.subr.bf16.mxu0 %v4645_v32  ;;  %4564 = vmatprep.subr.bf16.mxu1 %v4645_v32 }
  0x2a   : > { %v4648_v13 = vld [vmem:[#allocation2 + $0x8] ss:$0 sps:$4 sm:$0x11]   ;;  %vm5023_vm6 = vmand %vm641_vm1, %vm310_vm4  ;;  %v314_v53 = vshrl.u32 %v278_v51, 16  ;;  %v317_v54 = vshll.u32 %v278_v51, 16  ;;  %v322_v55 = vshrl.u32 %v279_v52, 16 }
  0x2b   : > { %v1060_v19 = vshll.u32 %v4648_v13, 16  ;;  %v1262_v20 = vrot.slane %v4648_v13, 1  ;;  %vm5031_vm7 = vmor %vm310_vm4, %vm311_vm5  ;;  %v721_v47 = vsel %vm5023_vm6, %v516_v41, %v720_v36  ;;  %v325_v56 = vshll.u32 %v279_v52, 16  ;;  %v637_v57 = vld [vmem:[#allocation2 + $0xc] sm:$0xf]  ;;  %v4656_v60 = vld [vmem:[%s6289_s1 + $0x100] sm:$0xff]  }
  0x2c   : > { %vm5039_vm9 = vmand %vm634_vm0, %vm635_vm8  ;;  %v515_v45 = vsel %vm5031_vm7, %v507_v39, %v514_v40  ;;  %722 = vst [vmem:[#allocation2 + $0x98] sm:$0x1] %v721_v47  ;;  %v302_v58 = vld [vmem:[%s5007_s8 + $0x60] sm:$0xf]  ;;  %v303_v59 = vld [vmem:[%s5007_s8 + $0x64] sm:$0xf]  ;;  %4052 = vmatpush3.bf16.msra.mxu0 %v4646_v44  ;;  %4572 = vmatpush3.bf16.msra.mxu1 %v4646_v44 }
  0x2d   : > { %v1062_v28 = vrot.slane %v1060_v19, 1  ;;  %v717_v46 = vsel %vm5039_vm9, %v506_v38, %v716_v31  ;;  %719 = vst [vmem:[#allocation2 + $0x94] sm:$0xf] %v515_v45  ;;  %v5058_v49 = vsel %vm1260_vm2, %v1261_v43, %v1262_v20  ;;  %v316_v61 = vrot.slane %v314_v53, 7  ;;  %v643_v63 = vld [vmem:[#allocation2 + $0x14] sm:$0x1]  ;;  %4149 = vmatprep.subr.bf16.mxu1 %v4651_v48  ;;  %4261 = vmatprep.subr.bf16.mxu0 %v4654_v50 }
  0x2e   : > { %718 = vst [vmem:[#allocation2 + $0x90] sm:$0xf] %v717_v46  ;;  %v324_v62 = vrot.slane %v322_v55, 7  ;;  %v518_v0 = vshrl.u32 %v302_v58, 16  ;;  %v521_v1 = vshll.u32 %v302_v58, 16  ;;  %v526_v2 = vshrl.u32 %v303_v59, 16 }
  0x2f   : > { %v1063_v42 = vsel %vm1051_vm3, %v1058_v37, %v1062_v28  ;;  %v529_v3 = vshll.u32 %v303_v59, 16  ;;  %v319_v4 = vor.u32 %v317_v54, %v316_v61  ;;  %v320_v5 = vrot.slane %v316_v61, 4  ;;  %v723_v8 = vld [vmem:[#allocation2 + $0x9c] sm:$0xf]  ;;  %v727_v16 = vld [vmem:[#allocation2 + $0xa4] sm:$0x1] }
  0x30   : > { %2797 = vmatprep.mubr.bf16.mxu0 %v1063_v42  ;;  %v327_v6 = vor.u32 %v325_v56, %v324_v62  ;;  %v329_v7 = vrot.slane %v324_v62, 4  ;;  %v520_v15 = vrot.slane %v518_v0, 7  ;;  %v280_v28 = vld [vmem:[%s5007_s8 + $0x8] sm:$0xf]  ;;  %v281_v32 = vld [vmem:[%s5007_s8 + $0xc] sm:$0xf] }
  0x31   : > { %2798 = vmatmul.mubr.bf16.vlgmr.msra.gmra.mrb[0].mxu0 %v5009_v12  ;;  %v638_v13 = vsel %vm5039_vm9, %v319_v4, %v637_v57  ;;  %v528_v12 = vrot.slane %v526_v2, 7  ;;  %v331_v33 = vshrl.u32 %v280_v28, 16  ;;  %v334_v34 = vshll.u32 %v280_v28, 16  ;;  %v4652_v37 = vld [vmem:[%s6289_s1 + $0x80] sm:$0xff]   ;;  %v4653_v38 = vld [vmem:[%s6289_s1 + $0xc8] sm:$0xff]   ;;  %v4661_v56 = vld [vmem:[%s6289_s1 + $0xd0] sm:$0xff]  }
  0x32   : > { %4262 = vmatpush3.bf16.msra.mxu0 %v4656_v60  ;;  %v328_v11 = vsel %vm5031_vm7, %v320_v5, %v327_v6  ;;  %v644_v14 = vsel %vm5023_vm6, %v329_v7, %v643_v63  ;;  %639 = vst [vmem:[#allocation2 + $0xc] sm:$0xf] %v638_v13  ;;  %v523_v20 = vor.u32 %v521_v1, %v520_v15  ;;  %v524_v21 = vrot.slane %v520_v15, 4  ;;  %v304_v41 = vld [vmem:[%s5007_s8 + $0x68] sm:$0xf]  ;;  %s203_s19 = sand.u32 1, %s4869_s13  }
  0x33   : > { %v4650_v10 = vld [vmem:[#allocation2 + $0x98] ss:$0 sps:$4 sm:$0x11]   ;;  %640 = vst [vmem:[#allocation2 + $0x10] sm:$0xf] %v328_v11  ;;  %v531_v22 = vor.u32 %v529_v3, %v528_v12  ;;  %v533_v23 = vrot.slane %v528_v12, 4 }
  0x34   : > { %645 = vst [vmem:[#allocation2 + $0x14] sm:$0x1] %v644_v14  ;;  %v1204_v19 = vshll.u32 %v4650_v10, 16  ;;  %v724_v27 = vsel %vm5039_vm9, %v523_v20, %v723_v8  ;;  %v339_v39 = vshrl.u32 %v281_v32, 16  ;;  %v342_v40 = vshll.u32 %v281_v32, 16  ;;  %v4670_v47 = vld [vmem:[%s6289_s1 + $0x148] sm:$0xff]  }
  0x35   : > { %v4649_v9 = vld [vmem:[#allocation2 + $0x90] sm:$0xff]   ;;  %v532_v30 = vsel %vm5031_vm7, %v524_v21, %v531_v22  ;;  %725 = vst [vmem:[#allocation2 + $0x9c] sm:$0xf] %v724_v27  ;;  %v728_v31 = vsel %vm5023_vm6, %v533_v23, %v727_v16  ;;  %v333_v42 = vrot.slane %v331_v33, 7  ;;  %v646_v43 = vld [vmem:[#allocation2 + $0x18] sm:$0xf]  ;;  %4263 = vmatprep.subr.bf16.mxu0 %v4670_v47 }
  0x36   : > { %v1197_v17 = vshrl.u32 %v4649_v9, 16  ;;  %v1199_v18 = vshll.u32 %v4649_v9, 16  ;;  %v1206_v26 = vrot.slane %v1204_v19, 1  ;;  %726 = vst [vmem:[#allocation2 + $0xa0] sm:$0xf] %v532_v30  ;;  %v535_v45 = vshrl.u32 %v304_v41, 16 }
  0x37   : > { %729 = vst [vmem:[#allocation2 + $0xa4] sm:$0x1] %v728_v31  ;;  %v305_v44 = vld [vmem:[%s5007_s8 + $0x6c] sm:$0xf]  ;;  %v538_v46 = vshll.u32 %v304_v41, 16  ;;  %v336_v52 = vor.u32 %v334_v34, %v333_v42  ;;  %v337_v53 = vrot.slane %v333_v42, 4 }
  0x38   : > { %v1201_v24 = vrot.slane %v1199_v18, 1  ;;  %v341_v54 = vrot.slane %v339_v39, 7  ;;  %v4655_v55 = vld [vmem:[%s6289_s1 + $0x88] sm:$0xff]   ;;  %v650_v57 = vld [vmem:[#allocation2 + $0x20] sm:$0x1]  ;;  %v537_v58 = vrot.slane %v535_v45, 7 }
  0x39   : > { %v543_v59 = vshrl.u32 %v305_v44, 16  ;;  %v730_v0 = vld [vmem:[#allocation2 + $0xa8] sm:$0xf]  ;;  %v647_v3 = vsel %vm5039_vm9, %v336_v52, %v646_v43  ;;  %v546_v5 = vshll.u32 %v305_v44, 16  ;;  %v4662_v8 = vld [vmem:[%s6289_s1 + $0x90] sm:$0xff]   ;;  %v4663_v21 = vld [vmem:[%s6289_s1 + $0xd8] sm:$0xff]  }
  0x3a   : > { %v1202_v36 = vor.u32 %v1201_v24, %v1197_v17  ;;  %v5097_v50 = vld [vmem:[#allocation2 + $0xc] sm:$0xff]   ;;  %v344_v63 = vor.u32 %v342_v40, %v341_v54  ;;  %v346_v2 = vrot.slane %v341_v54, 4  ;;  %v540_v4 = vor.u32 %v538_v46, %v537_v58  ;;  %648 = vst [vmem:[#allocation2 + $0x18] sm:$0xf] %v647_v3  ;;  %v4664_v24 = vld [vmem:[%s6289_s1 + $0x98] sm:$0xff]   ;;  %v4669_v31 = vld [vmem:[%s6289_s1 + $0xe0] sm:$0xff]  }
  0x3b   : > { %v5099_v51 = vld [vmem:[#allocation2 + $0x14] ss:$0 sps:$4 sm:$0x11]   ;;  %v1065_v60 = vshrl.u32 %v5097_v50, 16  ;;  %v1067_v61 = vshll.u32 %v5097_v50, 16  ;;  %v4672_v1 = vld [vmem:[%s6289_s1 + $0x108] sm:$0xff]  }
  0x3c   : > { %v1207_v48 = vsel %vm1051_vm3, %v1202_v36, %v1206_v26  ;;  %v1072_v62 = vshll.u32 %v5099_v51, 16  ;;  %4264 = vmatpush3.bf16.msra.mxu0 %v4672_v1  ;;  %v651_v13 = vsel %vm5023_vm6, %v346_v2, %v650_v57  ;;  %v541_v14 = vrot.slane %v537_v58, 4  ;;  %v734_v12 = vld [vmem:[#allocation2 + $0xb0] sm:$0x1]  ;;  %v283_v36 = vld [vmem:[%s5007_s8 + $0x14] sm:$0xf] }
  0x3d   : > { %2893 = vmatprep.mubr.bf16.mxu1 %v1207_v48  ;;  %v1069_v6 = vrot.slane %v1067_v61, 1  ;;  %v4659_v10 = vld [vmem:[#allocation2 + $0x9c] sm:$0xff]   ;;  %v545_v15 = vrot.slane %v543_v59, 7  ;;  %v731_v16 = vsel %vm5039_vm9, %v540_v4, %v730_v0  ;;  %652 = vst [vmem:[#allocation2 + $0x20] sm:$0x1] %v651_v13  ;;  %v356_v41 = vshrl.u32 %v283_v36, 16 }
  0x3e   : > { %2894 = vmatmul.mubr.bf16.vlgmr.msra.gmra.mrb[0].mxu1 %v4649_v9  ;;  %v1074_v7 = vrot.slane %v1072_v62, 1  ;;  %v345_v9 = vsel %vm5031_vm7, %v337_v53, %v344_v63  ;;  %v4660_v11 = vld [vmem:[#allocation2 + $0xa4] ss:$0 sps:$4 sm:$0x11]   ;;  %732 = vst [vmem:[#allocation2 + $0xa8] sm:$0xf] %v731_v16 }
  0x3f   : > { %4150 = vmatpush3.bf16.msra.mxu1 %v4652_v37  ;;  %649 = vst [vmem:[#allocation2 + $0x1c] sm:$0xf] %v345_v9  ;;  %v1070_v17 = vor.u32 %v1069_v6, %v1065_v60  ;;  %v1209_v18 = vshrl.u32 %v4659_v10, 16  ;;  %v1211_v19 = vshll.u32 %v4659_v10, 16  ;;  %v1216_v20 = vshll.u32 %v4660_v11, 16  ;;  %v4673_v53 = vld [vmem:[%s6289_s1 + $0xe8] sm:$0xff]  }
  0x40   : > { %4151 = vmatprep.subr.bf16.mxu1 %v4653_v38  ;;  %v548_v22 = vor.u32 %v546_v5, %v545_v15  ;;  %v550_v26 = vrot.slane %v545_v15, 4  ;;  %v282_v34 = vld [vmem:[%s5007_s8 + $0x10] sm:$0xf]  ;;  %v4671_v38 = vld [vmem:[%s6289_s1 + $0xa0] sm:$0xff]   ;;  %v359_v44 = vshll.u32 %v283_v36, 16  ;;  %v358_v48 = vrot.slane %v356_v41, 7 }
  0x41   : > { %v1075_v23 = vsel %vm1051_vm3, %v1070_v17, %v1074_v7  ;;  %v1213_v27 = vrot.slane %v1211_v19, 1  ;;  %v1218_v28 = vrot.slane %v1216_v20, 1  ;;  %v348_v39 = vshrl.u32 %v282_v34, 16  ;;  %v653_v54 = vld [vmem:[#allocation2 + $0x24] sm:$0xf]  ;;  %v4674_v57 = vld [vmem:[%s6289_s1 + $0xa8] sm:$0xff]  }
  0x42   : > { %2805 = vmatprep.mubr.bf16.mxu0 %v1075_v23  ;;  %v549_v30 = vsel %vm5031_vm7, %v541_v14, %v548_v22  ;;  %v735_v32 = vsel %vm5023_vm6, %v550_v26, %v734_v12  ;;  %v351_v40 = vshll.u32 %v282_v34, 16  ;;  %v361_v60 = vor.u32 %v359_v44, %v358_v48  ;;  %v306_v61 = vld [vmem:[%s5007_s8 + $0x70] sm:$0xf]  ;;  %v307_v62 = vld [vmem:[%s5007_s8 + $0x74] sm:$0xf]  ;;  %s3760_s23 = sshll.u32 %s203_s19, 8 }
  0x43   : > { %4152 = vmatpush3.bf16.msra.mxu1 %v4655_v55  ;;  %2806 = vmatmul.mubr.bf16.gmra.mrb[4].mxu0 %v5097_v50  ;;  %733 = vst [vmem:[#allocation2 + $0xac] sm:$0xf] %v549_v30  ;;  %v1214_v33 = vor.u32 %v1213_v27, %v1209_v18  ;;  %736 = vst [vmem:[#allocation2 + $0xb0] sm:$0x1] %v735_v32  ;;  %v350_v47 = vrot.slane %v348_v39, 7  ;;  %v363_v1 = vrot.slane %v358_v48, 4 }
  0x44   : > { %4153 = vmatprep.subr.bf16.mxu1 %v4661_v56  ;;  %v5147_v43 = vld [vmem:[#allocation2 + $0x20] ss:$0 sps:$4 sm:$0x11]   ;;  %v657_v55 = vld [vmem:[#allocation2 + $0x2c] sm:$0x1]  ;;  %v552_v2 = vshrl.u32 %v306_v61, 16 }
  0x45   : > { %v1219_v42 = vsel %vm1051_vm3, %v1214_v33, %v1218_v28  ;;  %v1084_v52 = vshll.u32 %v5147_v43, 16  ;;  %v353_v58 = vor.u32 %v351_v40, %v350_v47  ;;  %v354_v59 = vrot.slane %v350_v47, 4  ;;  %v4679_v13 = vld [vmem:[%s6289_s1 + $0xf0] sm:$0xff]   ;;  %v741_v23 = vld [vmem:[#allocation2 + $0xbc] sm:$0x1]  ;;  %s6157_s26 = scalar_lea.vmem [#allocation3], %s3760_s23 }
  0x46   : > { %v5141_v37 = vld [vmem:[#allocation2 + $0x18] sm:$0xff]   ;;  %2901 = vmatprep.mubr.bf16.mxu1 %v1219_v42  ;;  %v555_v7 = vshll.u32 %v306_v61, 16  ;;  %v554_v11 = vrot.slane %v552_v2, 7  ;;  %v560_v16 = vshrl.u32 %v307_v62, 16  ;;  %v563_v12 = vshll.u32 %v307_v62, 16  ;;  %v4680_v18 = vld [vmem:[%s6289_s1 + $0xb0] sm:$0xff]  }
  0x47   : > { %4154 = vmatpush3.bf16.msra.mxu1 %v4662_v8  ;;  %v1077_v45 = vshrl.u32 %v5141_v37, 16  ;;  %v1079_v46 = vshll.u32 %v5141_v37, 16  ;;  %v1086_v63 = vrot.slane %v1084_v52, 1  ;;  %v362_v5 = vsel %vm5031_vm7, %v354_v59, %v361_v60  ;;  %v737_v17 = vld [vmem:[#allocation2 + $0xb4] sm:$0xf]  ;;  %v4683_v33 = vld [vmem:[%s6289_s1 + $0xb8] sm:$0xff]  }
  0x48   : > { %4155 = vmatprep.subr.bf16.mxu1 %v4663_v21  ;;  %2902 = vmatmul.mubr.bf16.gmra.mrb[4].mxu1 %v4659_v10  ;;  %v654_v6 = vsel %vm5039_vm9, %v353_v58, %v653_v54  ;;  %656 = vst [vmem:[#allocation2 + $0x28] sm:$0xf] %v362_v5  ;;  %v658_v10 = vsel %vm5023_vm6, %v363_v1, %v657_v55  ;;  %v4682_v19 = vld [vmem:[%s6289_s1 + $0x150] sm:$0xff]   ;;  %v558_v22 = vrot.slane %v554_v11, 4  ;;  %v562_v27 = vrot.slane %v560_v16, 7  ;;  %v4688_v2 = vld [vmem:[%s6289_s1 + $0x1c0] sm:$0xff]  }
  0x49   : > { %v1081_v56 = vrot.slane %v1079_v46, 1  ;;  %655 = vst [vmem:[#allocation2 + $0x24] sm:$0xf] %v654_v6  ;;  %659 = vst [vmem:[#allocation2 + $0x2c] sm:$0x1] %v658_v10  ;;  %v557_v21 = vor.u32 %v555_v7, %v554_v11  ;;  %4265 = vmatprep.subr.bf16.mxu0 %v4682_v19  ;;  %v4684_v41 = vld [vmem:[%s6289_s1 + $0x110] sm:$0xff]  }
  0x4a   : > { %v4667_v0 = vld [vmem:[#allocation2 + $0xa8] sm:$0xff]   ;;  %v4668_v4 = vld [vmem:[#allocation2 + $0xb0] ss:$0 sps:$4 sm:$0x11]   ;;  %v567_v32 = vrot.slane %v562_v27, 4  ;;  %4266 = vmatpush3.bf16.msra.mxu0 %v4684_v41  ;;  %s4036_s27 = sshll.u32 %s4877_s15, 12 }
  0x4b   : > { %4156 = vmatpush3.bf16.msra.mxu1 %v4664_v24  ;;  %v1082_v3 = vor.u32 %v1081_v56, %v1077_v45  ;;  %v1221_v8 = vshrl.u32 %v4667_v0, 16  ;;  %v1223_v9 = vshll.u32 %v4667_v0, 16  ;;  %v1228_v15 = vshll.u32 %v4668_v4, 16  ;;  %v4681_v24 = vld [vmem:[%s6289_s1 + $0xf8] sm:$0xff]   ;;  %v660_v56 = vld [vmem:[#allocation2 + $0x30] sm:$0xf]  ;;  %s6233_s30 = scalar_lea.hbm %s6291_s3, %s4036_s27 }
  0x4c   : > { %4157 = vmatprep.subr.bf16.mxu1 %v4669_v31  ;;  %v738_v30 = vsel %vm5039_vm9, %v557_v21, %v737_v17  ;;  %v565_v31 = vor.u32 %v563_v12, %v562_v27  ;;  %v742_v39 = vsel %vm5023_vm6, %v567_v32, %v741_v23  ;;  %v284_v45 = vld [vmem:[%s5007_s8 + $0x18] sm:$0xf]  ;;  %v285_v46 = vld [vmem:[%s5007_s8 + $0x1c] sm:$0xf]  ;;  %v286_v11 = vld [vmem:[%s5007_s8 + $0x20] sm:$0xf] }
  0x4d   : > { %v1087_v14 = vsel %vm1051_vm3, %v1082_v3, %v1086_v63  ;;  %v1225_v20 = vrot.slane %v1223_v9, 1  ;;  %v1230_v26 = vrot.slane %v1228_v15, 1  ;;  %739 = vst [vmem:[#allocation2 + $0xb4] sm:$0xf] %v738_v30  ;;  %743 = vst [vmem:[#allocation2 + $0xbc] sm:$0x1] %v742_v39 }
  0x4e   : > { %2813 = vmatprep.mubr.bf16.mxu0 %v1087_v14  ;;  %v365_v48 = vshrl.u32 %v284_v45, 16  ;;  %v368_v52 = vshll.u32 %v284_v45, 16  ;;  %v376_v55 = vshll.u32 %v285_v46, 16  ;;  %v382_v15 = vshrl.u32 %v286_v11, 16  ;;  %v667_v19 = vld [vmem:[#allocation2 + $0x3c] sm:$0xf] }
  0x4f   : > { %4158 = vmatpush3.bf16.msra.mxu1 %v4671_v38  ;;  %2814 = vmatmul.mubr.bf16.gmra.mrb[8].mxu0 %v5141_v37  ;;  %v1226_v28 = vor.u32 %v1225_v20, %v1221_v8  ;;  %v566_v38 = vsel %vm5031_vm7, %v558_v22, %v565_v31  ;;  %v385_v16 = vshll.u32 %v286_v11, 16  ;;  %v671_v20 = vld [vmem:[#allocation2 + $0x44] sm:$0x1]  ;;  %v5218_v27 = vld [vmem:[#allocation2 + $0xc] sm:$0xff]   ;;  %v288_v39 = vld [vmem:[%s5007_s8 + $0x28] sm:$0xf] }
  0x50   : > { %4159 = vmatprep.subr.bf16.mxu1 %v4673_v53  ;;  %v5186_v36 = vld [vmem:[#allocation2 + $0x24] sm:$0xff]   ;;  %v5192_v40 = vld [vmem:[#allocation2 + $0x2c] ss:$0 sps:$4 sm:$0x11]   ;;  %740 = vst [vmem:[#allocation2 + $0xb8] sm:$0xf] %v566_v38 }
  0x51   : > { %v1231_v34 = vsel %vm1051_vm3, %v1226_v28, %v1230_v26  ;;  %v1089_v42 = vshrl.u32 %v5186_v36, 16  ;;  %v1091_v44 = vshll.u32 %v5186_v36, 16  ;;  %v1096_v47 = vshll.u32 %v5192_v40, 16  ;;  %v289_v41 = vld [vmem:[%s5007_s8 + $0x2c] sm:$0xf]  ;;  %s3651_s28 = sshll.u32 %s6157_s26, 4  ;;  %s6235_s28 = int_to_ptr.vmem [resolvable:$true] %s3651_s28 }
  0x52   : > { %2909 = vmatprep.mubr.bf16.mxu1 %v1231_v34  ;;  %v373_v53 = vshrl.u32 %v285_v46, 16  ;;  %v367_v59 = vrot.slane %v365_v48, 7  ;;  %v384_v22 = vrot.slane %v382_v15, 7  ;;  %v1264_v38 = vrot.slane %v5097_v50, 1  ;;  %s6242_s15 = scalar_lea.sflag [#allocation4], %s203_s19  ;;  %s4807_s4 = scalar_lea.vmem %s6235_s28, 4096 }
  0x53   : > { %4160 = vmatpush3.bf16.msra.mxu1 %v4674_v57  ;;  %v1093_v54 = vrot.slane %v1091_v44, 1  ;;  %v664_v57 = vld [vmem:[#allocation2 + $0x38] sm:$0x1]  ;;  %v1098_v58 = vrot.slane %v1096_v47, 1  ;;  %v399_v48 = vshrl.u32 %v288_v39, 16  ;;  %p4808_p12 = scmp.ne.s32.totalorder %s6235_s28, %s4807_s4  ;;  %s4888_s5 = smov [#allocation3]  }
  0x54   : > { %4161 = vmatprep.subr.bf16.mxu1 %v4679_v13  ;;  %2910 = vmatmul.mubr.bf16.gmra.mrb[8].mxu1 %v4667_v0  ;;  %v375_v60 = vrot.slane %v373_v53, 7  ;;  %v370_v62 = vor.u32 %v368_v52, %v367_v59  ;;  %v371_v63 = vrot.slane %v367_v59, 4  ;;  %v4678_v5 = vld [vmem:[#allocation2 + $0xbc] ss:$0 sps:$4 sm:$0x11]   ;;  %v387_v28 = vor.u32 %v385_v16, %v384_v22  ;;  %s4811_s6 = sshll.u32 %s4888_s5, 4  ;;  %s4812_s6 = int_to_ptr.vmem [resolvable:$false] %s4811_s6 }
  0x55   : > { %v1094_v61 = vor.u32 %v1093_v54, %v1089_v42  ;;  %v287_v13 = vld [vmem:[%s5007_s8 + $0x24] sm:$0xf]  ;;  %v1240_v14 = vshll.u32 %v4678_v5, 16  ;;  %v388_v30 = vrot.slane %v384_v22, 4  ;;  %v402_v52 = vshll.u32 %v288_v39, 16  ;;  %p4809_p13 = pnand %p4808_p12, %p4951_p4  ;;  %s4813_s7 = scalar_lea.vmem %s4812_s6, 8192 }
  0x56   : > { %v378_v0 = vor.u32 %v376_v55, %v375_v60  ;;  %v380_v1 = vrot.slane %v375_v60, 4  ;;  %v661_v7 = vsel %vm5039_vm9, %v370_v62, %v660_v56  ;;  %v390_v12 = vshrl.u32 %v287_v13, 16  ;;  %v674_v55 = vld [vmem:[#allocation2 + $0x48] sm:$0xf]  ;;  %v4689_v60 = vld [vmem:[%s6289_s1 + $0x180] sm:$0xff]   ;;  %p4814_p1 = scmp.lt.s32.totalorder %s6235_s28, %s4812_s6  ;;  %p4815_p2 = scmp.lt.s32.totalorder %s4813_s7, %s4807_s4 }
  0x57   : > { %4162 = vmatpush3.bf16.msra.mxu1 %v4680_v18  ;;  %v1099_v3 = vsel %vm1051_vm3, %v1094_v61, %v1098_v58  ;;  %v4677_v4 = vld [vmem:[#allocation2 + $0xb4] sm:$0xff]   ;;  %662 = vst [vmem:[#allocation2 + $0x30] sm:$0xf] %v661_v7  ;;  %v393_v18 = vshll.u32 %v287_v13, 16  ;;  %v1242_v21 = vrot.slane %v1240_v14, 1  ;;  %v668_v44 = vsel %vm5039_vm9, %v387_v28, %v667_v19  ;;  %v4700_v7 = vld [vmem:[%s6289_s1 + $0x160] sm:$0xff]   ;;  %p4810_p0 = pneg %p4809_p13 }
  0x58   : > { %4163 = vmatprep.subr.bf16.mxu1 %v4681_v24  ;;  %2821 = vmatprep.mubr.bf16.mxu0 %v1099_v3  ;;  %v379_v6 = vsel %vm5031_vm7, %v371_v63, %v378_v0  ;;  %v665_v8 = vsel %vm5023_vm6, %v380_v1, %v664_v57  ;;  %v1233_v9 = vshrl.u32 %v4677_v4, 16  ;;  %v1235_v10 = vshll.u32 %v4677_v4, 16  ;;  %v4693_v24 = vld [vmem:[%s6289_s1 + $0x158] sm:$0xff]   ;;  %669 = vst [vmem:[#allocation2 + $0x3c] sm:$0xf] %v668_v44  ;;  %v4699_v13 = vld [vmem:[%s6289_s1 + $0x188] sm:$0xff]   ;;  %p4816_p3 = por %p4815_p2, %p4814_p1 }
  0x59   : > { %2822 = vmatmul.mubr.bf16.gmra.mrb[12].mxu0 %v5186_v36  ;;  %663 = vst [vmem:[#allocation2 + $0x34] sm:$0xf] %v379_v6  ;;  %666 = vst [vmem:[#allocation2 + $0x38] sm:$0x1] %v665_v8  ;;  %v392_v23 = vrot.slane %v390_v12, 7  ;;  %4267 = vmatprep.subr.bf16.mxu0 %v4693_v24  ;;  %v407_v53 = vshrl.u32 %v289_v41, 16 }
  0x5a   : > { %v1237_v17 = vrot.slane %v1235_v10, 1  ;;  %v410_v54 = vshll.u32 %v289_v41, 16  ;;  %v401_v59 = vrot.slane %v399_v48, 7  ;;  %v678_v62 = vld [vmem:[#allocation2 + $0x50] sm:$0x1]  ;;  %v5244_v1 = vld [vmem:[#allocation2 + $0x18] sm:$0xff]   ;;  %p4817_p5 = pnand %p4816_p3, %p4810_p0 }
  0x5b   : > { %4164 = vmatpush3.bf16.msra.mxu1 %v4683_v33  ;;  %v395_v31 = vor.u32 %v393_v18, %v392_v23  ;;  %v397_v32 = vrot.slane %v392_v23, 4  ;;  %v4694_v33 = vld [vmem:[%s6289_s1 + $0x118] sm:$0xff]   ;;  %v409_v61 = vrot.slane %v407_v53, 7  ;;  %v4698_v6 = vld [vmem:[%s6289_s1 + $0x1c8] sm:$0xff]   ;;  %v1265_v12 = vrot.slane %v5099_v51, 1 }
  0x5c   : > { %4373 = vmatprep.subr.bf16.mxu1 %v4688_v2  ;;  %v1238_v26 = vor.u32 %v1237_v17, %v1233_v9  ;;  %4268 = vmatpush3.bf16.msra.mxu0 %v4694_v33  ;;  %v404_v2 = vor.u32 %v402_v52, %v401_v59  ;;  %v405_v3 = vrot.slane %v401_v59, 4  ;;  %v4701_v17 = vld [vmem:[%s6289_s1 + $0x120] sm:$0xff]   ;;  %v290_v18 = vld [vmem:[%s5007_s8 + $0x30] sm:$0xf]  ;;  %v291_v19 = vld [vmem:[%s5007_s8 + $0x34] sm:$0xf] }
  0x5d   : > { %v396_v42 = vsel %vm5031_vm7, %v388_v30, %v395_v31  ;;  %v672_v45 = vsel %vm5023_vm6, %v397_v32, %v671_v20  ;;  %v414_v5 = vrot.slane %v409_v61, 4  ;;  %4269 = vmatprep.subr.bf16.mxu0 %v4700_v7  ;;  %v416_v22 = vshrl.u32 %v290_v18, 16  ;;  %v5278_v23 = vld [vmem:[#allocation2 + $0x24] sm:$0xff]   ;;  %v681_v30 = vld [vmem:[#allocation2 + $0x54] sm:$0xf] }
  0x5e   : > { %v1243_v34 = vsel %vm1051_vm3, %v1238_v26, %v1242_v21  ;;  %670 = vst [vmem:[#allocation2 + $0x40] sm:$0xf] %v396_v42  ;;  %673 = vst [vmem:[#allocation2 + $0x44] sm:$0x1] %v672_v45  ;;  %v675_v9 = vsel %vm5039_vm9, %v404_v2, %v674_v55  ;;  %v1267_v51 = vrot.slane %v5141_v37, 1  ;;  %v419_v24 = vshll.u32 %v290_v18, 16 }
  0x5f   : > { %2917 = vmatprep.mubr.bf16.mxu1 %v1243_v34  ;;  %676 = vst [vmem:[#allocation2 + $0x48] sm:$0xf] %v675_v9  ;;  %v679_v11 = vsel %vm5023_vm6, %v414_v5, %v678_v62  ;;  %v424_v26 = vshrl.u32 %v291_v19, 16  ;;  %v427_v28 = vshll.u32 %v291_v19, 16  ;;  %v1268_v33 = vrot.slane %v5147_v43, 1 }
  0x60   : > { %2918 = vmatmul.mubr.bf16.gmra.mrb[12].mxu1 %v4677_v4  ;;  %v5233_v46 = vld [vmem:[#allocation2 + $0x30] sm:$0xff]   ;;  %v5235_v47 = vld [vmem:[#allocation2 + $0x38] ss:$0 sps:$4 sm:$0x11]   ;;  %v412_v4 = vor.u32 %v410_v54, %v409_v61  ;;  %680 = vst [vmem:[#allocation2 + $0x50] sm:$0x1] %v679_v11  ;;  %4270 = vmatpush3.bf16.msra.mxu0 %v4701_v17  ;;  %v1266_v41 = vsel %vm1260_vm2, %v1264_v38, %v1265_v12 }
  0x61   : > { %2958 = vmatprep.mubr.bf16.mxu1 %v5218_v27  ;;  %v1101_v56 = vshrl.u32 %v5233_v46, 16  ;;  %v1103_v57 = vshll.u32 %v5233_v46, 16  ;;  %v1108_v58 = vshll.u32 %v5235_v47, 16  ;;  %v418_v34 = vrot.slane %v416_v22, 7  ;;  %v685_v39 = vld [vmem:[#allocation2 + $0x5c] sm:$0x1] }
  0x62   : > { %v413_v10 = vsel %vm5031_vm7, %v405_v3, %v412_v4  ;;  %v426_v37 = vrot.slane %v424_v26, 7  ;;  %v1270_v42 = vrot.slane %v5186_v36, 1  ;;  %v292_v44 = vld [vmem:[%s5007_s8 + $0x38] sm:$0xf]  ;;  %v293_v53 = vld [vmem:[%s5007_s8 + $0x3c] sm:$0xf]  ;;  %v1269_v19 = vsel %vm1260_vm2, %v1267_v51, %v1268_v33 }
  0x63   : > { %v1105_v63 = vrot.slane %v1103_v57, 1  ;;  %v1110_v0 = vrot.slane %v1108_v58, 1  ;;  %677 = vst [vmem:[#allocation2 + $0x4c] sm:$0xf] %v413_v10  ;;  %v421_v48 = vor.u32 %v419_v24, %v418_v34  ;;  %v422_v52 = vrot.slane %v418_v34, 4  ;;  %v4708_v54 = vld [vmem:[%s6289_s1 + $0x168] sm:$0xff]  }
  0x64   : > { %v429_v55 = vor.u32 %v427_v28, %v426_v37  ;;  %v433_v58 = vshrl.u32 %v292_v44, 16  ;;  %v436_v59 = vshll.u32 %v292_v44, 16  ;;  %4271 = vmatprep.subr.bf16.mxu0 %v4708_v54  ;;  %v688_v2 = vld [vmem:[#allocation2 + $0x60] sm:$0xf]  ;;  %v441_v5 = vshrl.u32 %v293_v53, 16  ;;  %v4710_v10 = vld [vmem:[%s6289_s1 + $0x128] sm:$0xff]  }
  0x65   : > { %v1106_v8 = vor.u32 %v1105_v63, %v1101_v56  ;;  %v5263_v15 = vld [vmem:[#allocation2 + $0x3c] sm:$0xff]   ;;  %v5265_v16 = vld [vmem:[#allocation2 + $0x44] ss:$0 sps:$4 sm:$0x11]   ;;  %v431_v56 = vrot.slane %v426_v37, 4  ;;  %v682_v57 = vsel %vm5039_vm9, %v421_v48, %v681_v30  ;;  %v4711_v17 = vld [vmem:[%s6289_s1 + $0x190] sm:$0xff]   ;;  %4272 = vmatpush3.bf16.msra.mxu0 %v4710_v10 }
  0x66   : > { %v1115_v20 = vshll.u32 %v5263_v15, 16  ;;  %v1120_v21 = vshll.u32 %v5265_v16, 16  ;;  %v430_v63 = vsel %vm5031_vm7, %v422_v52, %v429_v55  ;;  %683 = vst [vmem:[#allocation2 + $0x54] sm:$0xf] %v682_v57  ;;  %v435_v4 = vrot.slane %v433_v58, 7 }
  0x67   : > { %v1111_v14 = vsel %vm1051_vm3, %v1106_v8, %v1110_v0  ;;  %v5294_v38 = vld [vmem:[#allocation2 + $0x50] ss:$0 sps:$4 sm:$0x11]   ;;  %v686_v0 = vsel %vm5023_vm6, %v431_v56, %v685_v39  ;;  %684 = vst [vmem:[#allocation2 + $0x58] sm:$0xf] %v430_v63  ;;  %v443_v12 = vrot.slane %v441_v5, 7 }
  0x68   : > { %2959 = vmatmul.mubr.bf16.vlgmr.msra.gmra.mrb[16].mxu1 %v5058_v49  ;;  %2829 = vmatprep.mubr.bf16.mxu0 %v1111_v14  ;;  %v1113_v49 = vshrl.u32 %v5263_v15, 16  ;;  %v1117_v31 = vrot.slane %v1115_v20, 1  ;;  %v1122_v32 = vrot.slane %v1120_v21, 1  ;;  %v1132_v3 = vshll.u32 %v5294_v38, 16  ;;  %687 = vst [vmem:[#allocation2 + $0x5c] sm:$0x1] %v686_v0 }
  0x69   : > { %4374 = vmatpush3.bf16.msra.mxu1 %v4689_v60  ;;  %2830 = vmatmul.mubr.bf16.gmra.mrb[16].mxu0 %v5233_v46  ;;  %v4709_v60 = vld [vmem:[%s6289_s1 + $0x1d0] sm:$0xff]   ;;  %v692_v9 = vld [vmem:[#allocation2 + $0x68] sm:$0x1]  ;;  %v439_v14 = vrot.slane %v435_v4, 4  ;;  %v448_v21 = vrot.slane %v443_v12, 4  ;;  %v1273_v0 = vrot.slane %v5233_v46, 1 }
  0x6a   : > { %2966 = vmatprep.mubr.bf16.mxu1 %v5244_v1  ;;  %4375 = vmatprep.subr.bf16.mxu1 %v4698_v6  ;;  %v1118_v45 = vor.u32 %v1117_v31, %v1113_v49  ;;  %v5291_v43 = vld [vmem:[#allocation2 + $0x48] sm:$0xff]   ;;  %v444_v6 = vshll.u32 %v293_v53, 16  ;;  %v5310_v8 = vld [vmem:[#allocation2 + $0x30] sm:$0xff]   ;;  %v1134_v11 = vrot.slane %v1132_v3, 1  ;;  %v1271_v49 = vrot.slane %v5192_v40, 1 }
  0x6b   : > { %v1125_v61 = vshrl.u32 %v5291_v43, 16  ;;  %v1127_v62 = vshll.u32 %v5291_v43, 16  ;;  %v294_v26 = vld [vmem:[%s5007_s8 + $0x40] sm:$0xf]  ;;  %v693_v51 = vsel %vm5023_vm6, %v448_v21, %v692_v9  ;;  %v295_v30 = vld [vmem:[%s5007_s8 + $0x44] sm:$0xf] }
  0x6c   : > { %v1123_v50 = vsel %vm1051_vm3, %v1118_v45, %v1122_v32  ;;  %v446_v20 = vor.u32 %v444_v6, %v443_v12  ;;  %v450_v40 = vshrl.u32 %v294_v26, 16  ;;  %v453_v31 = vshll.u32 %v294_v26, 16  ;;  %694 = vst [vmem:[#allocation2 + $0x68] sm:$0x1] %v693_v51  ;;  %v5337_v45 = vld [vmem:[#allocation2 + $0x3c] sm:$0xff]   ;;  %v5370_v12 = vld [vmem:[#allocation2 + $0x48] sm:$0xff]  }
  0x6d   : > { %4376 = vmatpush3.bf16.msra.mxu1 %v4699_v13  ;;  %2837 = vmatprep.mubr.bf16.mxu0 %v1123_v50  ;;  %v1129_v7 = vrot.slane %v1127_v62, 1  ;;  %v438_v13 = vor.u32 %v436_v59, %v435_v4  ;;  %v458_v33 = vshrl.u32 %v295_v30, 16  ;;  %v695_v52 = vld [vmem:[#allocation2 + $0x6c] sm:$0xf]  ;;  %v699_v56 = vld [vmem:[#allocation2 + $0x74] sm:$0x1]  ;;  %v1272_v57 = vsel %vm1260_vm2, %v1270_v42, %v1271_v49 }
  0x6e   : > { %4377 = vmatprep.subr.bf16.mxu1 %v4709_v60  ;;  %v447_v28 = vsel %vm5031_vm7, %v439_v14, %v446_v20  ;;  %v5329_v32 = vld [vmem:[#allocation2 + $0x54] sm:$0xff]   ;;  %v452_v39 = vrot.slane %v450_v40, 7  ;;  %v1274_v4 = vrot.slane %v5235_v47, 1  ;;  %v1276_v6 = vrot.slane %v5263_v15, 1  ;;  %v706_v21 = vld [vmem:[#allocation2 + $0x80] sm:$0x1] }
  0x6f   : > { %v1130_v18 = vor.u32 %v1129_v7, %v1125_v61  ;;  %v689_v22 = vsel %vm5039_vm9, %v438_v13, %v688_v2  ;;  %691 = vst [vmem:[#allocation2 + $0x64] sm:$0xf] %v447_v28  ;;  %v5333_v34 = vld [vmem:[#allocation2 + $0x5c] ss:$0 sps:$4 sm:$0x11]   ;;  %v1137_v37 = vshrl.u32 %v5329_v32, 16 }
  0x70   : > { %2967 = vmatmul.mubr.bf16.gmra.mrb[20].mxu1 %v1266_v41  ;;  %690 = vst [vmem:[#allocation2 + $0x60] sm:$0xf] %v689_v22  ;;  %v461_v41 = vshll.u32 %v295_v30, 16  ;;  %v1139_v44 = vshll.u32 %v5329_v32, 16  ;;  %v460_v48 = vrot.slane %v458_v33, 7  ;;  %v1144_v53 = vshll.u32 %v5333_v34, 16 }
  0x71   : > { %2974 = vmatprep.mubr.bf16.mxu1 %v5278_v23  ;;  %2838 = vmatmul.mubr.bf16.gmra.mrb[20].mxu0 %v5263_v15  ;;  %v1135_v24 = vsel %vm1051_vm3, %v1130_v18, %v1134_v11  ;;  %v455_v54 = vor.u32 %v453_v31, %v452_v39  ;;  %v456_v55 = vrot.slane %v452_v39, 4  ;;  %v4715_v62 = vld [vmem:[%s6289_s1 + $0x170] sm:$0xff]   ;;  %v296_v7 = vld [vmem:[%s5007_s8 + $0x48] sm:$0xf]  ;;  %v297_v11 = vld [vmem:[%s5007_s8 + $0x4c] sm:$0xf] }
  0x72   : > { %4378 = vmatpush3.bf16.msra.mxu1 %v4711_v17  ;;  %2845 = vmatprep.mubr.bf16.mxu0 %v1135_v24  ;;  %v1141_v50 = vrot.slane %v1139_v44, 1  ;;  %v463_v58 = vor.u32 %v461_v41, %v460_v48  ;;  %v465_v59 = vrot.slane %v460_v48, 4  ;;  %v1146_v60 = vrot.slane %v1144_v53, 1  ;;  %v4716_v42 = vld [vmem:[%s6289_s1 + $0x130] sm:$0xff]   ;;  %v4720_v15 = vld [vmem:[%s6289_s1 + $0x1d8] sm:$0xff]  }
  0x73   : > { %v696_v61 = vsel %vm5039_vm9, %v455_v54, %v695_v52  ;;  %4273 = vmatprep.subr.bf16.mxu0 %v4715_v62  ;;  %v5360_v5 = vld [vmem:[#allocation2 + $0x68] ss:$0 sps:$4 sm:$0x11]   ;;  %v467_v47 = vshrl.u32 %v296_v7, 16  ;;  %v470_v13 = vshll.u32 %v296_v7, 16  ;;  %v475_v17 = vshrl.u32 %v297_v11, 16  ;;  %4379 = vmatprep.subr.bf16.mxu1 %v4720_v15 }
  0x74   : > { %v1142_v63 = vor.u32 %v1141_v50, %v1137_v37  ;;  %v464_v2 = vsel %vm5031_vm7, %v456_v55, %v463_v58  ;;  %697 = vst [vmem:[#allocation2 + $0x6c] sm:$0xf] %v696_v61  ;;  %v700_v36 = vsel %vm5023_vm6, %v465_v59, %v699_v56  ;;  %4274 = vmatpush3.bf16.msra.mxu0 %v4716_v42  ;;  %v1156_v14 = vshll.u32 %v5360_v5, 16  ;;  %v4721_v40 = vld [vmem:[%s6289_s1 + $0x198] sm:$0xff]   ;;  %v298_v56 = vld [vmem:[%s5007_s8 + $0x50] sm:$0xf] }
  0x75   : > { %698 = vst [vmem:[#allocation2 + $0x70] sm:$0xf] %v464_v2  ;;  %701 = vst [vmem:[#allocation2 + $0x74] sm:$0x1] %v700_v36  ;;  %v478_v18 = vshll.u32 %v297_v11, 16  ;;  %v469_v20 = vrot.slane %v467_v47, 7  ;;  %v1275_v24 = vsel %vm1260_vm2, %v1273_v0, %v1274_v4 }
  0x76   : > { %v1147_v46 = vsel %vm1051_vm3, %v1142_v63, %v1146_v60  ;;  %v1158_v22 = vrot.slane %v1156_v14, 1  ;;  %v477_v26 = vrot.slane %v475_v17, 7  ;;  %v1277_v44 = vrot.slane %v5265_v16, 1  ;;  %4380 = vmatpush3.bf16.msra.mxu1 %v4721_v40  ;;  %v299_v50 = vld [vmem:[%s5007_s8 + $0x54] sm:$0xf]  ;;  %v4725_v7 = vld [vmem:[%s6289_s1 + $0x178] sm:$0xff]  }
  0x77   : > { %v5356_v3 = vld [vmem:[#allocation2 + $0x60] sm:$0xff]   ;;  %v472_v51 = vor.u32 %v470_v13, %v469_v20  ;;  %v473_v30 = vrot.slane %v469_v20, 4  ;;  %v487_v58 = vshll.u32 %v298_v56, 16  ;;  %v5398_v60 = vld [vmem:[#allocation2 + $0x54] sm:$0xff]   ;;  %v492_v61 = vshrl.u32 %v299_v50, 16  ;;  %4275 = vmatprep.subr.bf16.mxu0 %v4725_v7 }
  0x78   : > { %2975 = vmatmul.mubr.bf16.gmra.mrb[24].mxu1 %v1269_v19  ;;  %v1149_v9 = vshrl.u32 %v5356_v3, 16  ;;  %v1151_v10 = vshll.u32 %v5356_v3, 16  ;;  %v702_v19 = vld [vmem:[#allocation2 + $0x78] sm:$0xf]  ;;  %v480_v33 = vor.u32 %v478_v18, %v477_v26  ;;  %v482_v39 = vrot.slane %v477_v26, 4 }
  0x79   : > { %2982 = vmatprep.mubr.bf16.mxu1 %v5310_v8  ;;  %2846 = vmatmul.mubr.bf16.gmra.mrb[24].mxu0 %v5291_v43  ;;  %v703_v48 = vsel %vm5039_vm9, %v472_v51, %v702_v19  ;;  %v495_v62 = vshll.u32 %v299_v50, 16  ;;  %v709_v63 = vld [vmem:[#allocation2 + $0x84] sm:$0xf]  ;;  %v713_v36 = vld [vmem:[#allocation2 + $0x8c] sm:$0x1]  ;;  %v1278_v4 = vsel %vm1260_vm2, %v1276_v6, %v1277_v44  ;;  %v4726_v11 = vld [vmem:[%s6289_s1 + $0x138] sm:$0xff]  }
  0x7a   : > { %2853 = vmatprep.mubr.bf16.mxu0 %v1147_v46  ;;  %v1153_v49 = vrot.slane %v1151_v10, 1  ;;  %v481_v54 = vsel %vm5031_vm7, %v473_v30, %v480_v33  ;;  %704 = vst [vmem:[#allocation2 + $0x78] sm:$0xf] %v703_v48  ;;  %v707_v55 = vsel %vm5023_vm6, %v482_v39, %v706_v21  ;;  %v494_v46 = vrot.slane %v492_v61, 7  ;;  %4276 = vmatpush3.bf16.msra.mxu0 %v4726_v11  ;;  %v4730_v51 = vld [vmem:[%s6289_s1 + $0x1a0] sm:$0xff]  }
  0x7b   : > { %705 = vst [vmem:[#allocation2 + $0x7c] sm:$0xf] %v481_v54  ;;  %708 = vst [vmem:[#allocation2 + $0x80] sm:$0x1] %v707_v55  ;;  %v1279_v13 = vrot.slane %v5291_v43, 1  ;;  %v1280_v19 = vrot.slane %v5294_v38, 1 }
  0x7c   : > { %v1154_v28 = vor.u32 %v1153_v49, %v1149_v9  ;;  %v5379_v31 = vld [vmem:[#allocation2 + $0x6c] sm:$0xff]   ;;  %v5382_v37 = vld [vmem:[#allocation2 + $0x74] ss:$0 sps:$4 sm:$0x11]   ;;  %v497_v14 = vor.u32 %v495_v62, %v494_v46  ;;  %v499_v17 = vrot.slane %v494_v46, 4  ;;  %v4731_v39 = vld [vmem:[%s6289_s1 + $0x200] sm:$0xff]  }
  0x7d   : > { %v1161_v52 = vshrl.u32 %v5379_v31, 16  ;;  %v1163_v53 = vshll.u32 %v5379_v31, 16  ;;  %v1168_v16 = vshll.u32 %v5382_v37, 16  ;;  %v1281_v26 = vsel %vm1260_vm2, %v1279_v13, %v1280_v19  ;;  %v4728_v33 = vld [vmem:[#allocation2 + $0x14] ss:$0 sps:$4 sm:$0x11]   ;;  %4509 = vmatprep.subr.bf16.mxu0 %v4731_v39 }
  0x7e   : > { %v1159_v41 = vsel %vm1051_vm3, %v1154_v28, %v1158_v22  ;;  %v714_v43 = vsel %vm5023_vm6, %v499_v17, %v713_v36  ;;  %v5425_v22 = vld [vmem:[#allocation2 + $0x60] sm:$0xff]   ;;  %v1285_v62 = vrot.slane %v5356_v3, 1  ;;  %v1289_v17 = vrot.slane %v5382_v37, 1  ;;  %v4735_v37 = vld [vmem:[#allocation2 + $0x2c] ss:$0 sps:$4 sm:$0x11]  }
  0x7f   : > { %v1165_v59 = vrot.slane %v1163_v53, 1  ;;  %v1170_v0 = vrot.slane %v1168_v16, 1  ;;  %715 = vst [vmem:[#allocation2 + $0x8c] sm:$0x1] %v714_v43  ;;  %v4729_v28 = vld [vmem:[%s6289_s1 + $0x1e0] sm:$0xff]   ;;  %v1689_v35 = vrot.slane %v5337_v45, 1 }
  0x80   : > { %2983 = vmatmul.mubr.bf16.gmra.mrb[28].mxu1 %v1272_v57  ;;  %v484_v57 = vshrl.u32 %v298_v56, 16  ;;  %4381 = vmatprep.subr.bf16.mxu1 %v4729_v28  ;;  %v1472_v56 = vshll.u32 %v5218_v27, 16  ;;  %v4733_v7 = vld [vmem:[#allocation2 + $0x20] ss:$0 sps:$4 sm:$0x11]   ;;  %v1518_v29 = vshrl.u32 %v5337_v45, 16 }
  0x81   : > { %2990 = vmatprep.mubr.bf16.mxu1 %v5337_v45  ;;  %2854 = vmatmul.mubr.bf16.gmra.mrb[28].mxu0 %v5329_v32  ;;  %v1166_v42 = vor.u32 %v1165_v59, %v1161_v52  ;;  %v1283_v52 = vrot.slane %v5333_v34, 1  ;;  %v1677_v34 = vrot.slane %v5218_v27, 1  ;;  %v1681_v13 = vrot.slane %v4733_v7, 1 }
  0x82   : > { %2861 = vmatprep.mubr.bf16.mxu0 %v1159_v41  ;;  %v486_v2 = vrot.slane %v484_v57, 7  ;;  %v5411_v18 = vld [vmem:[#allocation2 + $0x78] sm:$0xff]   ;;  %v5419_v49 = vld [vmem:[#allocation2 + $0x80] ss:$0 sps:$4 sm:$0x11]   ;;  %v1282_v41 = vrot.slane %v5329_v32, 1  ;;  %4382 = vmatpush3.bf16.msra.mxu1 %v4730_v51 }
  0x83   : > { %v1171_v47 = vsel %vm1051_vm3, %v1166_v42, %v1170_v0  ;;  %v1173_v20 = vshrl.u32 %v5411_v18, 16  ;;  %v1175_v21 = vshll.u32 %v5411_v18, 16  ;;  %v1180_v38 = vshll.u32 %v5419_v49, 16  ;;  %v5451_v57 = vld [vmem:[#allocation2 + $0x6c] sm:$0xff]   ;;  %v5469_v11 = vld [vmem:[#allocation2 + $0x78] sm:$0xff]  }
  0x84   : > { %v489_v9 = vor.u32 %v487_v58, %v486_v2  ;;  %v490_v10 = vrot.slane %v486_v2, 4  ;;  %v1284_v50 = vsel %vm1260_vm2, %v1282_v41, %v1283_v52  ;;  %v1678_v58 = vrot.slane %v4728_v33, 1  ;;  %v4736_v42 = vld [vmem:[%s6289_s1 + $0x1e8] sm:$0xff]  }
  0x85   : > { %v1182_v30 = vrot.slane %v1180_v38, 1  ;;  %v1477_v0 = vshll.u32 %v4728_v33, 16  ;;  %v1470_v2 = vshrl.u32 %v5218_v27, 16  ;;  %v1474_v36 = vrot.slane %v1472_v56, 1  ;;  %4383 = vmatprep.subr.bf16.mxu1 %v4736_v42  ;;  %v4738_v38 = vld [vmem:[%s6289_s1 + $0x208] sm:$0xff]   ;;  %v4745_v33 = vld [vmem:[%s6289_s1 + $0x210] sm:$0xff]  }
  0x86   : > { %v710_v6 = vsel %vm5039_vm9, %v489_v9, %v709_v63  ;;  %v498_v15 = vsel %vm5031_vm7, %v490_v10, %v497_v14  ;;  %v5443_v53 = vld [vmem:[#allocation2 + $0x8c] ss:$0 sps:$4 sm:$0x11]   ;;  %v1286_v63 = vrot.slane %v5360_v5, 1  ;;  %v1679_v46 = vsel %vm1260_vm2, %v1677_v34, %v1678_v58 }
  0x87   : > { %711 = vst [vmem:[#allocation2 + $0x84] sm:$0xf] %v710_v6  ;;  %712 = vst [vmem:[#allocation2 + $0x88] sm:$0xf] %v498_v15  ;;  %v1192_v32 = vshll.u32 %v5443_v53, 16  ;;  %v1475_v27 = vor.u32 %v1474_v36, %v1470_v2  ;;  %v1479_v5 = vrot.slane %v1477_v0, 1 }
  0x88   : > { %2991 = vmatmul.mubr.bf16.gmra.mrb[32].mxu1 %v1275_v24  ;;  %v1177_v24 = vrot.slane %v1175_v21, 1  ;;  %v1484_v9 = vshll.u32 %v5244_v1, 16  ;;  %v1287_v10 = vsel %vm1260_vm2, %v1285_v62, %v1286_v63  ;;  %v1288_v14 = vrot.slane %v5379_v31, 1  ;;  %v4743_v6 = vld [vmem:[%s6289_s1 + $0x1f0] sm:$0xff]   ;;  %v309_v0 = vld [vmem:[%s5007_s8 + $0x7c] sm:$0xf] }
  0x89   : > { %2998 = vmatprep.mubr.bf16.mxu1 %v5370_v12  ;;  %2862 = vmatmul.mubr.bf16.gmra.mrb[32].mxu0 %v5356_v3  ;;  %v1194_v59 = vrot.slane %v1192_v32, 1  ;;  %v4737_v3 = vld [vmem:[%s6289_s1 + $0x1a8] sm:$0xff]   ;;  %v1480_v19 = vsel %vm1051_vm3, %v1475_v27, %v1479_v5  ;;  %v1482_v15 = vshrl.u32 %v5244_v1, 16  ;;  %v4744_v21 = vld [vmem:[%s6289_s1 + $0x1b0] sm:$0xff]   ;;  %v1291_v41 = vrot.slane %v5411_v18, 1 }
  0x8a   : > { %2869 = vmatprep.mubr.bf16.mxu0 %v1171_v47  ;;  %v1178_v40 = vor.u32 %v1177_v24, %v1173_v20  ;;  %4384 = vmatpush3.bf16.msra.mxu1 %v4737_v3  ;;  %v1680_v47 = vrot.slane %v5244_v1, 1  ;;  %v1486_v43 = vrot.slane %v1484_v9, 1  ;;  %v1489_v20 = vshll.u32 %v4733_v7, 16 }
  0x8b   : > { %4385 = vmatprep.subr.bf16.mxu1 %v4743_v6  ;;  %v1290_v28 = vsel %vm1260_vm2, %v1288_v14, %v1289_v17  ;;  %v1501_v32 = vshll.u32 %v4735_v37, 16  ;;  %v1686_v62 = vrot.slane %v5310_v8, 1  ;;  %v1506_v7 = vshrl.u32 %v5310_v8, 16  ;;  %v4742_v14 = vld [vmem:[#allocation2 + $0x44] ss:$0 sps:$4 sm:$0x11]  }
  0x8c   : > { %v1183_v44 = vsel %vm1051_vm3, %v1178_v40, %v1182_v30  ;;  %v1487_v1 = vor.u32 %v1486_v43, %v1482_v15  ;;  %v1491_v24 = vrot.slane %v1489_v20, 1  ;;  %v1683_v30 = vrot.slane %v5278_v23, 1 }
  0x8d   : > { %v1684_v40 = vrot.slane %v4735_v37, 1  ;;  %v1503_v58 = vrot.slane %v1501_v32, 1  ;;  %v5547_v32 = vld [vmem:[#allocation2 + $0xa8] sm:$0xff]  }
  0x8e   : > { %v5439_v48 = vld [vmem:[#allocation2 + $0x84] sm:$0xff]   ;;  %4386 = vmatpush3.bf16.msra.mxu1 %v4744_v21  ;;  %v1492_v52 = vsel %vm1051_vm3, %v1487_v1, %v1491_v24  ;;  %v1520_v21 = vshll.u32 %v5337_v45, 16  ;;  %v1690_v1 = vrot.slane %v4742_v14, 1  ;;  %v4799_v24 = vld [vmem:[#allocation2 + $0x90] sm:$0xff]  }
  0x8f   : > { %v1185_v54 = vshrl.u32 %v5439_v48, 16  ;;  %v1187_v55 = vshll.u32 %v5439_v48, 16  ;;  %v5489_v51 = vld [vmem:[#allocation2 + $0x84] sm:$0xff]   ;;  %v1685_v56 = vsel %vm1260_vm2, %v1683_v30, %v1684_v40  ;;  %v1294_v42 = vrot.slane %v5439_v48, 1 }
  0x90   : > { %2999 = vmatmul.mubr.bf16.gmra.mrb[36].mxu1 %v1278_v4  ;;  %v1522_v30 = vrot.slane %v1520_v21, 1  ;;  %v1525_v40 = vshll.u32 %v4742_v14, 16  ;;  %v4754_v14 = vld [vmem:[#allocation2 + $0x68] ss:$0 sps:$4 sm:$0x11]   ;;  %v1556_v21 = vshll.u32 %v5425_v22, 16 }
  0x91   : > { %3006 = vmatprep.mubr.bf16.mxu1 %v5398_v60  ;;  %2870 = vmatmul.mubr.bf16.gmra.mrb[36].mxu0 %v5379_v31  ;;  %v1189_v16 = vrot.slane %v1187_v55, 1  ;;  %v1682_v31 = vsel %vm1260_vm2, %v1680_v47, %v1681_v13  ;;  %v744_v47 = vld [vmem:[#allocation2 + $0xc0] sm:$0xf] }
  0x92   : > { %2877 = vmatprep.mubr.bf16.mxu0 %v1183_v44  ;;  %v4750_v44 = vld [vmem:[%s6289_s1 + $0x1f8] sm:$0xff]   ;;  %v4758_v13 = vld [vmem:[%s6289_s1 + $0x220] sm:$0xff]  }
  0x93   : > { %v1190_v61 = vor.u32 %v1189_v16, %v1185_v54  ;;  %v1494_v54 = vshrl.u32 %v5278_v23, 16  ;;  %v1508_v16 = vshll.u32 %v5310_v8, 16  ;;  %4387 = vmatprep.subr.bf16.mxu1 %v4750_v44  ;;  %v1295_v8 = vrot.slane %v5443_v53, 1  ;;  %v4765_v53 = vld [vmem:[%s6289_s1 + $0x228] sm:$0xff]  }
  0x94   : > { %v4747_v44 = vld [vmem:[#allocation2 + $0x50] ss:$0 sps:$4 sm:$0x11]  }
  0x95   : > { %v1195_v4 = vsel %vm1051_vm3, %v1190_v61, %v1194_v59  ;;  %v5512_v59 = vld [vmem:[#allocation2 + $0x90] sm:$0xff]   ;;  %v308_v61 = vld [vmem:[%s5007_s8 + $0x78] sm:$0xf]  ;;  %v1510_v3 = vrot.slane %v1508_v16, 1  ;;  %v1296_v37 = vsel %vm1260_vm2, %v1294_v42, %v1295_v8 }
  0x96   : > { %v569_v2 = vshrl.u32 %v308_v61, 16  ;;  %v572_v36 = vshll.u32 %v308_v61, 16 }
  0x97   : > { %v1511_v43 = vor.u32 %v1510_v3, %v1506_v7  ;;  %v1695_v7 = vrot.slane %v5398_v60, 1 }
  0x98   : > { %3007 = vmatmul.mubr.bf16.gmra.mrb[40].mxu1 %v1281_v26  ;;  %v1496_v26 = vshll.u32 %v5278_v23, 16  ;;  %v4752_v23 = vld [vmem:[%s6289_s1 + $0x218] sm:$0xff]   ;;  %v571_v5 = vrot.slane %v569_v2, 7  ;;  %v4772_v2 = vld [vmem:[%s6289_s1 + $0x230] sm:$0xff]  }
  0x99   : > { %3014 = vmatprep.mubr.bf16.mxu1 %v5425_v22  ;;  %2878 = vmatmul.mubr.bf16.gmra.mrb[40].mxu0 %v5411_v18  ;;  %v4740_v18 = vld [vmem:[#allocation2 + $0x38] ss:$0 sps:$4 sm:$0x11]  }
  0x9a   : > { %2885 = vmatprep.mubr.bf16.mxu0 %v1195_v4  ;;  %v1498_v55 = vrot.slane %v1496_v26, 1  ;;  %v1687_v63 = vrot.slane %v4740_v18, 1  ;;  %v577_v4 = vshrl.u32 %v309_v0, 16  ;;  %v1513_v27 = vshll.u32 %v4740_v18, 16 }
  0x9b   : > { %v574_v17 = vor.u32 %v572_v36, %v571_v5  ;;  %v575_v6 = vrot.slane %v571_v5, 4  ;;  %v1297_v26 = vrot.slane %v4799_v24, 1  ;;  %v1693_v18 = vrot.slane %v4747_v44, 1 }
  0x9c   : > { %v1499_v34 = vor.u32 %v1498_v55, %v1494_v54  ;;  %v1515_v20 = vrot.slane %v1513_v27, 1  ;;  %v1527_v54 = vrot.slane %v1525_v40, 1  ;;  %v1532_v55 = vshll.u32 %v5370_v12, 16  ;;  %v5562_v27 = vld [vmem:[#allocation2 + $0x18] sm:$0xff]  }
  0x9d   : > { %v745_v15 = vsel %vm5039_vm9, %v574_v17, %v744_v47  ;;  %v4803_v47 = vld [vmem:[#allocation2 + $0xa8] sm:$0xff]   ;;  %v4755_v40 = vld [vmem:[#allocation2 + $0x74] ss:$0 sps:$4 sm:$0x11]  }
  0x9e   : > { %v1504_v9 = vsel %vm1051_vm3, %v1499_v34, %v1503_v58  ;;  %746 = vst [vmem:[#allocation2 + $0xc0] sm:$0xf] %v745_v15  ;;  %v1530_v34 = vshrl.u32 %v5370_v12, 16  ;;  %v1534_v61 = vrot.slane %v1532_v55, 1 }
  0x9f   : > { %v5568_v15 = vld [vmem:[#allocation2 + $0x20] ss:$0 sps:$4 sm:$0x11]  }
  0xa0   : > { %3015 = vmatmul.mubr.bf16.gmra.mrb[44].mxu1 %v1284_v50  ;;  %v1535_v36 = vor.u32 %v1534_v61, %v1530_v34  ;;  %v4779_v34 = vld [vmem:[%s6289_s1 + $0x238] sm:$0xff]   ;;  %v1702_v61 = vrot.slane %v4755_v40, 1 }
  0xa1   : > { %3022 = vmatprep.mubr.bf16.mxu1 %v5451_v57  ;;  %2886 = vmatmul.mubr.bf16.gmra.mrb[44].mxu0 %v5439_v48  ;;  %v1688_v48 = vsel %vm1260_vm2, %v1686_v62, %v1687_v63  ;;  %v1537_v62 = vshll.u32 %v4747_v44, 16  ;;  %v1561_v44 = vshll.u32 %v4754_v14, 16 }
  0xa2   : > { %3119 = vmatprep.mubr.bf16.mxu0 %v1679_v46  ;;  %v580_v46 = vshll.u32 %v309_v0, 16  ;;  %v4749_v0 = vld [vmem:[#allocation2 + $0x5c] ss:$0 sps:$4 sm:$0x11]  }
  0xa3   : > { %v1539_v42 = vrot.slane %v1537_v62, 1  ;;  %v1696_v3 = vrot.slane %v4749_v0, 1  ;;  %v1549_v5 = vshll.u32 %v4749_v0, 16 }
  0xa5   : > { %v1697_v17 = vsel %vm1260_vm2, %v1695_v7, %v1696_v3  ;;  %v1573_v3 = vshll.u32 %v4755_v40, 16 }
  0xa7   : > { %v1575_v25 = vrot.slane %v1573_v3, 1 }
  0xa8   : > { %3023 = vmatmul.mubr.bf16.gmra.mrb[48].mxu1 %v1287_v10  ;;  %v5520_v10 = vrot.slane %v577_v4, 7  ;;  %v1544_v4 = vshll.u32 %v5398_v60, 16 }
  0xa9   : > { %3030 = vmatprep.mubr.bf16.mxu1 %v5469_v11  ;;  %3120 = vmatmul.mubr.bf16.vlgmr.msra.gmra.mrb[48].mxu0 %v1480_v19 }
  0xaa   : > { %4510 = vmatpush3.bf16.msra.mxu0 %v4731_v39  ;;  %3127 = vmatprep.mubr.bf16.mxu0 %v1682_v31  ;;  %v1292_v39 = vrot.slane %v5419_v49, 1  ;;  %v4751_v49 = vld [vmem:[%s6289_s1 + $0x1b8] sm:$0xff]   ;;  %v582_v19 = vor.u32 %v580_v46, %v5520_v10  ;;  %v1546_v8 = vrot.slane %v1544_v4, 1  ;;  %v584_v0 = vrot.slane %v5520_v10, 4 }
  0xab   : > { %4511 = vmatprep.subr.bf16.mxu0 %v4738_v38  ;;  %4388 = vmatpush3.bf16.msra.mxu1 %v4751_v49  ;;  %v4801_v49 = vld [vmem:[#allocation2 + $0x9c] sm:$0xff]   ;;  %v5600_v10 = vld [vmem:[#allocation2 + $0x38] ss:$0 sps:$4 sm:$0x11]  }
  0xac   : > { %v1293_v50 = vsel %vm1260_vm2, %v1291_v41, %v1292_v39  ;;  %v583_v31 = vsel %vm5031_vm7, %v575_v6, %v582_v19  ;;  %v4800_v41 = vld [vmem:[#allocation2 + $0x98] ss:$0 sps:$4 sm:$0x11]   ;;  %v1300_v16 = vrot.slane %v4801_v49, 1 }
  0xad   : > { %747 = vst [vmem:[#allocation2 + $0xc4] sm:$0xf] %v583_v31  ;;  %v1298_v39 = vrot.slane %v4800_v41, 1  ;;  %v4804_v6 = vld [vmem:[#allocation2 + $0xb0] ss:$0 sps:$4 sm:$0x11]  }
  0xae   : > { %4512 = vmatpush3.bf16.msra.mxu0 %v4738_v38  ;;  %v5538_v38 = vld [vmem:[#allocation2 + $0x9c] sm:$0xff]   ;;  %v1304_v19 = vrot.slane %v4804_v6, 1  ;;  %v1554_v41 = vshrl.u32 %v5425_v22, 16 }
  0xaf   : > { %4513 = vmatprep.subr.bf16.mxu0 %v4745_v33  ;;  %v1299_v45 = vsel %vm1260_vm2, %v1297_v26, %v1298_v39  ;;  %v1893_v26 = vshll.u32 %v5568_v15, 16  ;;  %v1558_v39 = vrot.slane %v1556_v21, 1 }
  0xb0   : > { %3031 = vmatmul.mubr.bf16.gmra.mrb[52].mxu1 %v1290_v28  ;;  %v1516_v28 = vsel %vm1051_vm3, %v1511_v43, %v1515_v20  ;;  %v1888_v43 = vshll.u32 %v5562_v27, 16  ;;  %v1551_v20 = vrot.slane %v1549_v5, 1 }
  0xb1   : > { %3038 = vmatprep.mubr.bf16.mxu1 %v5489_v51  ;;  %3128 = vmatmul.mubr.bf16.gmra.mrb[52].mxu0 %v1492_v52  ;;  %v1523_v52 = vor.u32 %v1522_v30, %v1518_v29  ;;  %v5578_v29 = vld [vmem:[#allocation2 + $0x24] sm:$0xff]  }
  0xb2   : > { %3135 = vmatprep.mubr.bf16.mxu0 %v1685_v56  ;;  %4514 = vmatpush3.bf16.msra.mxu0 %v4745_v33  ;;  %v1691_v33 = vsel %vm1260_vm2, %v1689_v35, %v1690_v1  ;;  %v1692_v56 = vrot.slane %v5370_v12, 1  ;;  %v5557_v12 = vld [vmem:[#allocation2 + $0xb4] sm:$0xff]   ;;  %v1699_v35 = vrot.slane %v4754_v14, 1  ;;  %v1886_v1 = vshrl.u32 %v5562_v27, 16 }
  0xb3   : > { %4515 = vmatprep.subr.bf16.mxu0 %v4752_v23  ;;  %v1528_v58 = vsel %vm1051_vm3, %v1523_v52, %v1527_v54  ;;  %v1890_v24 = vrot.slane %v1888_v43, 1  ;;  %v4806_v54 = vld [vmem:[#allocation2 + $0xbc] ss:$0 sps:$4 sm:$0x11]   ;;  %v1900_v49 = vshll.u32 %v5578_v29, 16  ;;  %v2093_v14 = vrot.slane %v5562_v27, 1 }
  0xb4   : > { %v1694_v63 = vsel %vm1260_vm2, %v1692_v56, %v1693_v18  ;;  %v1307_v55 = vrot.slane %v4806_v54, 1  ;;  %v1895_v18 = vrot.slane %v1893_v26, 1  ;;  %v1580_v43 = vshll.u32 %v5469_v11, 16 }
  0xb5   : > { %v1891_v56 = vor.u32 %v1890_v24, %v1886_v1  ;;  %v1902_v4 = vrot.slane %v1900_v49, 1  ;;  %v1917_v24 = vshll.u32 %v5600_v10, 16 }
  0xb6   : > { %4516 = vmatpush3.bf16.msra.mxu0 %v4752_v23  ;;  %v4802_v23 = vld [vmem:[#allocation2 + $0xa4] ss:$0 sps:$4 sm:$0x11]   ;;  %v1582_v40 = vrot.slane %v1580_v43, 1 }
  0xb7   : > { %4517 = vmatprep.subr.bf16.mxu0 %v4758_v13  ;;  %v1919_v54 = vrot.slane %v1917_v24, 1 }
  0xb8   : > { %3039 = vmatmul.mubr.bf16.gmra.mrb[56].mxu1 %v1293_v50  ;;  %v1301_v50 = vrot.slane %v4802_v23, 1  ;;  %v1559_v23 = vor.u32 %v1558_v39, %v1554_v41  ;;  %v4762_v39 = vld [vmem:[#allocation2 + $0x8c] ss:$0 sps:$4 sm:$0x11]  }
  0xb9   : > { %3046 = vmatprep.mubr.bf16.mxu1 %v5512_v59  ;;  %3136 = vmatmul.mubr.bf16.gmra.mrb[56].mxu0 %v1504_v9  ;;  %v1540_v9 = vsel %vm1051_vm3, %v1535_v36, %v1539_v42  ;;  %v1896_v36 = vsel %vm1051_vm3, %v1891_v56, %v1895_v18  ;;  %v1898_v42 = vshrl.u32 %v5578_v29, 16  ;;  %v1708_v18 = vrot.slane %v4762_v39, 1 }
  0xba   : > { %3143 = vmatprep.mubr.bf16.mxu0 %v1688_v48  ;;  %4518 = vmatpush3.bf16.msra.mxu0 %v4758_v13  ;;  %v1302_v46 = vsel %vm1260_vm2, %v1300_v16, %v1301_v50  ;;  %v1303_v13 = vrot.slane %v4803_v47, 1  ;;  %v1542_v48 = vshrl.u32 %v5398_v60, 16  ;;  %v1568_v16 = vshll.u32 %v5451_v57, 16  ;;  %v4759_v47 = vld [vmem:[#allocation2 + $0x80] ss:$0 sps:$4 sm:$0x11]  }
  0xbb   : > { %4519 = vmatprep.subr.bf16.mxu0 %v4765_v53  ;;  %v1563_v50 = vrot.slane %v1561_v44, 1  ;;  %v5624_v44 = vld [vmem:[#allocation2 + $0x44] ss:$0 sps:$4 sm:$0x11]  }
  0xbc   : > { %v1547_v31 = vor.u32 %v1546_v8, %v1542_v48  ;;  %v1305_v60 = vsel %vm1260_vm2, %v1303_v13, %v1304_v19  ;;  %v1570_v7 = vrot.slane %v1568_v16, 1  ;;  %v1903_v8 = vor.u32 %v1902_v4, %v1898_v42  ;;  %v5630_v16 = vld [vmem:[#allocation2 + $0x48] sm:$0xff]   ;;  %v5638_v4 = vld [vmem:[#allocation2 + $0x50] ss:$0 sps:$4 sm:$0x11]  }
  0xbd   : > { %v1704_v19 = vrot.slane %v5469_v11, 1  ;;  %v1929_v49 = vshll.u32 %v5624_v44, 16 }
  0xbe   : > { %4520 = vmatpush3.bf16.msra.mxu0 %v4765_v53  ;;  %v5573_v53 = vld [vmem:[#allocation2 + $0xc0] sm:$0xff]  }
  0xbf   : > { %4521 = vmatprep.subr.bf16.mxu0 %v4772_v2 }
  0xc0   : > { %3047 = vmatmul.mubr.bf16.gmra.mrb[60].mxu1 %v1296_v37  ;;  %v1698_v37 = vrot.slane %v5425_v22, 1  ;;  %v1701_v22 = vrot.slane %v5451_v57, 1 }
  0xc1   : > { %3054 = vmatprep.mubr.bf16.mxu1 %v5538_v38  ;;  %3144 = vmatmul.mubr.bf16.gmra.mrb[60].mxu0 %v1516_v28  ;;  %v4805_v28 = vld [vmem:[#allocation2 + $0xb4] sm:$0xff]  }
  0xc2   : > { %3151 = vmatprep.mubr.bf16.mxu0 %v1691_v33  ;;  %4522 = vmatpush3.bf16.msra.mxu0 %v4772_v2  ;;  %v1306_v30 = vrot.slane %v4805_v28, 1  ;;  %v1552_v33 = vsel %vm1051_vm3, %v1547_v31, %v1551_v20  ;;  %v1700_v52 = vsel %vm1260_vm2, %v1698_v37, %v1699_v35  ;;  %v748_v2 = vld [vmem:[#allocation2 + $0xc8] sm:$0x1]  ;;  %v1703_v13 = vsel %vm1260_vm2, %v1701_v22, %v1702_v61  ;;  %v5608_v20 = vld [vmem:[#allocation2 + $0x3c] sm:$0xff]  }
  0xc3   : > { %4523 = vmatprep.subr.bf16.mxu0 %v4779_v34  ;;  %v749_v5 = vsel %vm5023_vm6, %v584_v0, %v748_v2  ;;  %v1705_v31 = vrot.slane %v4759_v47, 1  ;;  %v2096_v37 = vrot.slane %v5578_v29, 1  ;;  %v4766_v2 = vld [vmem:[#allocation2 + $0x98] ss:$0 sps:$4 sm:$0x11]  }
  0xc4   : > { %750 = vst [vmem:[#allocation2 + $0xc8] sm:$0x1] %v749_v5  ;;  %v1711_v5 = vrot.slane %v4766_v2, 1 }
  0xc5   : > { %v1706_v41 = vsel %vm1260_vm2, %v1704_v19, %v1705_v31  ;;  %v4769_v19 = vld [vmem:[#allocation2 + $0xa4] ss:$0 sps:$4 sm:$0x11]  }
  0xc6   : > { %4524 = vmatpush3.bf16.msra.mxu0 %v4779_v34  ;;  %v1714_v24 = vrot.slane %v4769_v19, 1 }
  0xc8   : > { %3055 = vmatmul.mubr.bf16.gmra.mrb[64].mxu1 %v1299_v45  ;;  %v4761_v45 = vld [vmem:[#allocation2 + $0x2c] ss:$0 sps:$4 sm:$0x11]  }
  0xc9   : > { %3062 = vmatprep.mubr.bf16.mxu1 %v5547_v32  ;;  %3152 = vmatmul.mubr.bf16.gmra.mrb[64].mxu0 %v1528_v58  ;;  %v1308_v58 = vsel %vm1260_vm2, %v1306_v30, %v1307_v55  ;;  %v1905_v62 = vshll.u32 %v4761_v45, 16  ;;  %v2097_v35 = vrot.slane %v4761_v45, 1  ;;  %v1578_v30 = vshrl.u32 %v5469_v11, 16 }
  0xca   : > { %3159 = vmatprep.mubr.bf16.mxu0 %v1694_v63  ;;  %v5591_v63 = vld [vmem:[#allocation2 + $0x30] sm:$0xff]   ;;  %v1924_v55 = vshll.u32 %v5608_v20, 16  ;;  %v1707_v11 = vrot.slane %v5489_v51, 1 }
  0xcb   : > { %v1907_v48 = vrot.slane %v1905_v62, 1  ;;  %v5618_v26 = vsel %vm1260_vm2, %v2096_v37, %v2097_v35  ;;  %v1583_v45 = vor.u32 %v1582_v40, %v1578_v30  ;;  %v1597_v62 = vshll.u32 %v4762_v39, 16  ;;  %v5666_v39 = vld [vmem:[#allocation2 + $0x60] sm:$0xff]  }
  0xcc   : > { %v1926_v22 = vrot.slane %v1924_v55, 1  ;;  %v1709_v0 = vsel %vm1260_vm2, %v1707_v11, %v1708_v18  ;;  %v1621_v18 = vshll.u32 %v4769_v19, 16  ;;  %v2325_v19 = vld [vmem:[%s5661_s21 + $0xc0] sm:$0xff] }
  0xcd   : > { %v1599_v3 = vrot.slane %v1597_v62, 1 }
  0xd0   : > { %3063 = vmatmul.mubr.bf16.gmra.mrb[68].mxu1 %v1302_v46  ;;  %v1566_v46 = vshrl.u32 %v5451_v57, 16  ;;  %v1912_v57 = vshll.u32 %v5591_v63, 16 }
  0xd1   : > { %3070 = vmatprep.mubr.bf16.mxu1 %v5557_v12  ;;  %3160 = vmatmul.mubr.bf16.gmra.mrb[68].mxu0 %v1540_v9  ;;  %v1564_v9 = vsel %vm1051_vm3, %v1559_v23, %v1563_v50  ;;  %v1922_v50 = vshrl.u32 %v5608_v20, 16 }
  0xd2   : > { %3167 = vmatprep.mubr.bf16.mxu0 %v1697_v17  ;;  %v2094_v17 = vrot.slane %v5568_v15, 1  ;;  %v1571_v6 = vor.u32 %v1570_v7, %v1566_v46  ;;  %v1908_v15 = vsel %vm1051_vm3, %v1903_v8, %v1907_v48  ;;  %v1914_v1 = vrot.slane %v1912_v57, 1  ;;  %v5646_v8 = vld [vmem:[#allocation2 + $0x54] sm:$0xff]  }
  0xd3   : > { %v1927_v42 = vor.u32 %v1926_v22, %v1922_v50  ;;  %v1936_v46 = vshll.u32 %v5630_v16, 16  ;;  %v1941_v48 = vshll.u32 %v5638_v4, 16  ;;  %v1948_v37 = vshll.u32 %v5646_v8, 16  ;;  %v4773_v22 = vld [vmem:[#allocation2 + $0xb0] ss:$0 sps:$4 sm:$0x11]  }
  0xd4   : > { %v5611_v21 = vsel %vm1260_vm2, %v2093_v14, %v2094_v17  ;;  %v1576_v28 = vsel %vm1051_vm3, %v1571_v6, %v1575_v25  ;;  %v1602_v14 = vshrl.u32 %v5512_v59, 16  ;;  %v1609_v25 = vshll.u32 %v4766_v2, 16 }
  0xd5   : > { %v1943_v31 = vrot.slane %v1941_v48, 1  ;;  %v1946_v40 = vshrl.u32 %v5646_v8, 16  ;;  %v1960_v2 = vshll.u32 %v5666_v39, 16  ;;  %v1626_v48 = vshrl.u32 %v5547_v32, 16 }
  0xd8   : > { %3071 = vmatmul.mubr.bf16.gmra.mrb[72].mxu1 %v1305_v60  ;;  %v1910_v60 = vshrl.u32 %v5591_v63, 16 }
  0xd9   : > { %3078 = vmatprep.mubr.bf16.mxu1 %v5573_v53  ;;  %3168 = vmatmul.mubr.bf16.gmra.mrb[72].mxu0 %v1552_v33  ;;  %v1585_v33 = vshll.u32 %v4759_v47, 16  ;;  %v1934_v47 = vshrl.u32 %v5630_v16, 16 }
  0xda   : > { %3175 = vmatprep.mubr.bf16.mxu0 %v1700_v52  ;;  %v1915_v52 = vor.u32 %v1914_v1, %v1910_v60  ;;  %v5653_v60 = vld [vmem:[#allocation2 + $0x5c] ss:$0 sps:$4 sm:$0x11]   ;;  %v1616_v1 = vshll.u32 %v5538_v38, 16 }
  0xdb   : > { %v1587_v56 = vrot.slane %v1585_v33, 1  ;;  %v1950_v33 = vrot.slane %v1948_v37, 1 }
  0xdc   : > { %v1920_v23 = vsel %vm1051_vm3, %v1915_v52, %v1919_v54  ;;  %v2301_v52 = vld [vmem:[%s5661_s21] sm:$0xff]  ;;  %v1618_v11 = vrot.slane %v1616_v1, 1  ;;  %v5693_v1 = vld [vmem:[#allocation2 + $0x74] ss:$0 sps:$4 sm:$0x11]  }
  0xdd   : > { %v1588_v34 = vsel %vm1051_vm3, %v1583_v45, %v1587_v56 }
  0xe0   : > { %3079 = vmatmul.mubr.bf16.gmra.mrb[76].mxu1 %v1308_v58  ;;  %v1590_v58 = vshrl.u32 %v5489_v51, 16 }
  0xe1   : > { %3280 = vmatprep.mubr.bf16.mxu1 %v1896_v36  ;;  %3176 = vmatmul.mubr.bf16.gmra.mrb[76].mxu0 %v1564_v9  ;;  %v1931_v36 = vrot.slane %v1929_v49, 1  ;;  %v2302_v49 = vld [vmem:[%s5661_s21 + $0x8] sm:$0xff] }
  0xe2   : > { %3183 = vmatprep.mubr.bf16.mxu0 %v1703_v13  ;;  %v1938_v13 = vrot.slane %v1936_v46, 1  ;;  %v1628_v46 = vshll.u32 %v5547_v32, 16 }
  0xe3   : > { %v1932_v9 = vsel %vm1051_vm3, %v1927_v42, %v1931_v36  ;;  %v1623_v42 = vrot.slane %v1621_v18, 1  ;;  %v5706_v18 = vld [vmem:[#allocation2 + $0x78] sm:$0xff]  }
  0xe4   : > { %v1939_v43 = vor.u32 %v1938_v13, %v1934_v47  ;;  %v5686_v47 = vld [vmem:[#allocation2 + $0x6c] sm:$0xff]  }
  0xe6   : > { %v1944_v30 = vsel %vm1051_vm3, %v1939_v43, %v1943_v31 }
  0xe8   : > { %3281 = vmatmul.mubr.bf16.vlgmr.msra.gmra.mrb[80].mxu1 %v5562_v27  ;;  %v1592_v27 = vshll.u32 %v5489_v51, 16  ;;  %v1710_v51 = vrot.slane %v5512_v59, 1 }
  0xe9   : > { %3288 = vmatprep.mubr.bf16.mxu1 %v1908_v15  ;;  %3184 = vmatmul.mubr.bf16.gmra.mrb[80].mxu0 %v1576_v28  ;;  %v1611_v15 = vrot.slane %v1609_v25, 1 }
  0xea   : > { %3191 = vmatprep.mubr.bf16.mxu0 %v1706_v41  ;;  %v1594_v61 = vrot.slane %v1592_v27, 1  ;;  %v1712_v6 = vsel %vm1260_vm2, %v1710_v51, %v1711_v5  ;;  %v1953_v41 = vshll.u32 %v5653_v60, 16  ;;  %v1614_v27 = vshrl.u32 %v5538_v38, 16 }
  0xeb   : > { %v1958_v51 = vshrl.u32 %v5666_v39, 16  ;;  %v1962_v5 = vrot.slane %v1960_v2, 1  ;;  %v2303_v2 = vld [vmem:[%s5661_s21 + $0x10] sm:$0xff] }
  0xec   : > { %v1595_v7 = vor.u32 %v1594_v61, %v1590_v58  ;;  %v1951_v61 = vor.u32 %v1950_v33, %v1946_v40  ;;  %v1955_v62 = vrot.slane %v1953_v41, 1 }
  0xed   : > { %v1963_v31 = vor.u32 %v1962_v5, %v1958_v51 }
  0xee   : > { %v1600_v57 = vsel %vm1051_vm3, %v1595_v7, %v1599_v3  ;;  %v1716_v7 = vrot.slane %v5547_v32, 1  ;;  %v1717_v3 = vrot.slane %v4773_v22, 1  ;;  %v1640_v32 = vshll.u32 %v5557_v12, 16 }
  0xf0   : > { %3289 = vmatmul.mubr.bf16.gmra.mrb[84].mxu1 %v5578_v29  ;;  %v1604_v29 = vshll.u32 %v5512_v59, 16  ;;  %v1713_v59 = vrot.slane %v5538_v38, 1  ;;  %v1619_v38 = vor.u32 %v1618_v11, %v1614_v27  ;;  %v1718_v25 = vsel %vm1260_vm2, %v1716_v7, %v1717_v3  ;;  %v5713_v7 = vld [vmem:[#allocation2 + $0x80] ss:$0 sps:$4 sm:$0x11]  }
  0xf1   : > { %3296 = vmatprep.mubr.bf16.mxu1 %v1920_v23  ;;  %3192 = vmatmul.mubr.bf16.gmra.mrb[84].mxu0 %v1588_v34  ;;  %v1977_v11 = vshll.u32 %v5693_v1, 16 }
  0xf2   : > { %3199 = vmatprep.mubr.bf16.mxu0 %v1709_v0  ;;  %v1606_v17 = vrot.slane %v1604_v29, 1  ;;  %v1715_v50 = vsel %vm1260_vm2, %v1713_v59, %v1714_v24  ;;  %v5676_v0 = vld [vmem:[#allocation2 + $0x68] ss:$0 sps:$4 sm:$0x11]   ;;  %v1956_v29 = vsel %vm1051_vm3, %v1951_v61, %v1955_v62  ;;  %v1624_v13 = vsel %vm1051_vm3, %v1619_v38, %v1623_v42 }
  0xf3   : > { %v1972_v59 = vshll.u32 %v5686_v47, 16  ;;  %v2326_v24 = vld [vmem:[%s5661_s21 + $0xc8] sm:$0xff]  ;;  %v1979_v42 = vrot.slane %v1977_v11, 1 }
  0xf4   : > { %v1607_v35 = vor.u32 %v1606_v17, %v1602_v14  ;;  %v1633_v14 = vshll.u32 %v4773_v22, 16  ;;  %v4780_v61 = vld [vmem:[#allocation2 + $0xc8] ss:$0 sps:$4 sm:$0x11]  }
  0xf5   : > { %v1974_v27 = vrot.slane %v1972_v59, 1  ;;  %v2327_v59 = vld [vmem:[%s5661_s21 + $0xd0] sm:$0xff] }
  0xf6   : > { %v1612_v56 = vsel %vm1051_vm3, %v1607_v35, %v1611_v15  ;;  %v1635_v40 = vrot.slane %v1633_v14, 1  ;;  %v1723_v14 = vrot.slane %v4780_v61, 1 }
  0xf8   : > { %3297 = vmatmul.mubr.bf16.gmra.mrb[88].mxu1 %v5591_v63 }
  0xf9   : > { %3304 = vmatprep.mubr.bf16.mxu1 %v1932_v9  ;;  %3200 = vmatmul.mubr.bf16.gmra.mrb[88].mxu0 %v1600_v57  ;;  %v1965_v9 = vshll.u32 %v5676_v0, 16  ;;  %v1630_v57 = vrot.slane %v1628_v46, 1 }
  0xfa   : > { %3207 = vmatprep.mubr.bf16.mxu0 %v1712_v6  ;;  %v4776_v6 = vld [vmem:[#allocation2 + $0xbc] ss:$0 sps:$4 sm:$0x11]  }
  0xfb   : > { %v1967_v37 = vrot.slane %v1965_v9, 1  ;;  %v1652_v9 = vshll.u32 %v5573_v53, 16 }
 0x100   : > { %3305 = vmatmul.mubr.bf16.gmra.mrb[92].mxu1 %v5608_v20 }
 0x101   : > { %3312 = vmatprep.mubr.bf16.mxu1 %v1944_v30  ;;  %3208 = vmatmul.mubr.bf16.gmra.mrb[92].mxu0 %v1612_v56  ;;  %v1631_v30 = vor.u32 %v1630_v57, %v1626_v48  ;;  %v1722_v57 = vrot.slane %v5573_v53, 1 }
 0x102   : > { %3215 = vmatprep.mubr.bf16.mxu0 %v1715_v50  ;;  %v1645_v50 = vshll.u32 %v4776_v6, 16 }
 0x103   : > { %v1636_v22 = vsel %vm1051_vm3, %v1631_v30, %v1635_v40  ;;  %v1654_v30 = vrot.slane %v1652_v9, 1  ;;  %v1657_v40 = vshll.u32 %v4780_v61, 16 }
 0x104   : > { %v4053_v28 = vpop.f32.mrb[0].mxu0 }
 0x105   : > { %v4054_v54 = vpop.f32.mrb[1].mxu0 }
 0x106   : > { %v4055_v55 = vadd.f32 %v4054_v54, %v4053_v28  ;;  %v4056_v45 = vpop.f32.mrb[2].mxu0  ;;  %v1720_v54 = vrot.slane %v4776_v6, 1  ;;  %v5721_v6 = vld [vmem:[#allocation2 + $0x84] sm:$0xff]  }
 0x107   : > { %v4057_v23 = vpop.f32.mrb[3].mxu0  ;;  %v1996_v11 = vshll.u32 %v5721_v6, 16 }
 0x108   : > { %v5674_v34 = vadd.f32 %v4055_v55, %v2301_v52  ;;  %v4058_v58 = vadd.f32 %v4057_v23, %v4056_v45  ;;  %3313 = vmatmul.mubr.bf16.gmra.mrb[96].mxu1 %v5630_v16  ;;  %v1719_v52 = vrot.slane %v5557_v12, 1  ;;  %v1970_v55 = vshrl.u32 %v5686_v47, 16 }
 0x109   : > { %3320 = vmatprep.mubr.bf16.mxu1 %v1956_v29  ;;  %3216 = vmatmul.mubr.bf16.gmra.mrb[96].mxu0 %v1624_v13  ;;  %v1968_v45 = vsel %vm1051_vm3, %v1963_v31, %v1967_v37  ;;  %v1642_v23 = vrot.slane %v1640_v32, 1  ;;  %v1647_v29 = vrot.slane %v1645_v50, 1  ;;  %v2304_v13 = vld [vmem:[%s5661_s21 + $0x18] sm:$0xff]  ;;  %v1982_v31 = vshrl.u32 %v5706_v18, 16 }
 0x10a   : > { %v5679_v36 = vadd.f32 %v4058_v58, %v2302_v49  ;;  %3223 = vmatprep.mubr.bf16.mxu0 %v1718_v25  ;;  %v1638_v49 = vshrl.u32 %v5557_v12, 16  ;;  %v1721_v58 = vsel %vm1260_vm2, %v1719_v52, %v1720_v54  ;;  %v1975_v38 = vor.u32 %v1974_v27, %v1970_v55  ;;  %v2328_v55 = vld [vmem:[%s5661_s21 + $0xd8] sm:$0xff]  ;;  %v5734_v27 = vld [vmem:[#allocation2 + $0x8c] ss:$0 sps:$4 sm:$0x11]  }
 0x10b   : > { %v1984_v12 = vshll.u32 %v5706_v18, 16  ;;  %v1724_v54 = vsel %vm1260_vm2, %v1722_v57, %v1723_v14 }
 0x10c   : > { %v1643_v3 = vor.u32 %v1642_v23, %v1638_v49 }
 0x10d   : > { %v1986_v37 = vrot.slane %v1984_v12, 1  ;;  %v2305_v12 = vld [vmem:[%s5661_s21 + $0x20] sm:$0xff] }
 0x10f   : > { %v1987_v50 = vor.u32 %v1986_v37, %v1982_v31  ;;  %v5752_v31 = vld [vmem:[#allocation2 + $0x98] ss:$0 sps:$4 sm:$0x11]  }
 0x110   : > { %3321 = vmatmul.mubr.bf16.gmra.mrb[100].mxu1 %v5646_v8 }
 0x111   : > { %v4125_v17 = vpop.f32.mrb[0].mxu1  ;;  %3328 = vmatprep.mubr.bf16.mxu1 %v1968_v45  ;;  %3224 = vmatmul.mubr.bf16.gmra.mrb[100].mxu0 %v1636_v22 }
 0x112   : > { %v4126_v43 = vpop.f32.mrb[1].mxu1  ;;  %3231 = vmatprep.mubr.bf16.mxu0 %v1721_v58  ;;  %v1659_v58 = vrot.slane %v1657_v40, 1 }
 0x113   : > { %v4127_v35 = vadd.f32 %v4126_v43, %v4125_v17  ;;  %v4128_v15 = vpop.f32.mrb[2].mxu1 }
 0x114   : > { %v4129_v28 = vpop.f32.mrb[3].mxu1 }
 0x115   : > { %v5698_v33 = vadd.f32 %v4127_v35, %v2325_v19  ;;  %v4130_v41 = vadd.f32 %v4129_v28, %v4128_v15  ;;  %v1980_v19 = vsel %vm1051_vm3, %v1975_v38, %v1979_v42  ;;  %v1989_v35 = vshll.u32 %v5713_v7, 16 }
 0x116   : > { %v4059_v62 = vpop.f32.mrb[4].mxu0  ;;  %v1648_v15 = vsel %vm1051_vm3, %v1643_v3, %v1647_v29  ;;  %v1650_v28 = vshrl.u32 %v5573_v53, 16  ;;  %v1998_v38 = vrot.slane %v1996_v11, 1  ;;  %v2001_v42 = vshll.u32 %v5734_v27, 16  ;;  %v5745_v29 = vld [vmem:[#allocation2 + $0x90] sm:$0xff]  }
 0x117   : > { %v5703_v56 = vadd.f32 %v4130_v41, %v2326_v24  ;;  %v4060_v46 = vpop.f32.mrb[5].mxu0  ;;  %v1991_v22 = vrot.slane %v1989_v35, 1  ;;  %v2008_v37 = vshll.u32 %v5745_v29, 16  ;;  %v2329_v35 = vld [vmem:[%s5661_s21 + $0xe0] sm:$0xff] }
 0x118   : > { %v4061_v51 = vadd.f32 %v4060_v46, %v4059_v62  ;;  %v4062_v5 = vpop.f32.mrb[6].mxu0  ;;  %3329 = vmatmul.mubr.bf16.gmra.mrb[104].mxu1 %v5666_v39  ;;  %v1655_v53 = vor.u32 %v1654_v30, %v1650_v28  ;;  %v2330_v30 = vld [vmem:[%s5661_s21 + $0xe8] sm:$0xff] }
 0x119   : > { %v4063_v48 = vpop.f32.mrb[7].mxu0  ;;  %3336 = vmatprep.mubr.bf16.mxu1 %v1980_v19  ;;  %3232 = vmatmul.mubr.bf16.gmra.mrb[104].mxu0 %v1648_v15  ;;  %v1992_v46 = vsel %vm1051_vm3, %v1987_v50, %v1991_v22  ;;  %v2013_v50 = vshll.u32 %v5752_v31, 16 }
 0x11a   : > { %v5719_v17 = vadd.f32 %v4061_v51, %v2303_v2  ;;  %v4064_v25 = vadd.f32 %v4063_v48, %v4062_v5  ;;  %3239 = vmatprep.mubr.bf16.mxu0 %v1724_v54  ;;  %v1994_v2 = vshrl.u32 %v5721_v6, 16  ;;  %v1660_v9 = vsel %vm1051_vm3, %v1655_v53, %v1659_v58  ;;  %v5773_v58 = vld [vmem:[#allocation2 + $0xa4] ss:$0 sps:$4 sm:$0x11]  }
 0x11b   : > { %v4131_v43 = vpop.f32.mrb[4].mxu1  ;;  %v2100_v54 = vrot.slane %v5600_v10, 1  ;;  %v2015_v10 = vrot.slane %v2013_v50, 1  ;;  %v2112_v50 = vrot.slane %v5676_v0, 1 }
 0x11c   : > { %v4132_v32 = vpop.f32.mrb[5].mxu1  ;;  %v5728_v24 = vadd.f32 %v4064_v25, %v2304_v13  ;;  %v2306_v13 = vld [vmem:[%s5661_s21 + $0x28] sm:$0xff]  ;;  %v1999_v14 = vor.u32 %v1998_v38, %v1994_v2  ;;  %v2003_v25 = vrot.slane %v2001_v42, 1  ;;  %v2102_v38 = vrot.slane %v5608_v20, 1 }
 0x11d   : > { %v4133_v41 = vadd.f32 %v4132_v32, %v4131_v43  ;;  %v4134_v52 = vpop.f32.mrb[6].mxu1  ;;  %v2103_v42 = vrot.slane %v5624_v44, 1  ;;  %v2025_v20 = vshll.u32 %v5773_v58, 16 }
 0x11e   : > { %v4135_v45 = vpop.f32.mrb[7].mxu1 }
 0x11f   : > { %v5737_v49 = vadd.f32 %v4133_v41, %v2327_v59  ;;  %v4136_v23 = vadd.f32 %v4135_v45, %v4134_v52  ;;  %v2004_v41 = vsel %vm1051_vm3, %v1999_v14, %v2003_v25  ;;  %v2099_v52 = vrot.slane %v5591_v63, 1 }
 0x120   : > { %3337 = vmatmul.mubr.bf16.gmra.mrb[108].mxu1 %v5686_v47 }
 0x121   : > { %v5739_v61 = vadd.f32 %v4136_v23, %v2328_v55  ;;  %3344 = vmatprep.mubr.bf16.mxu1 %v1992_v46  ;;  %3240 = vmatmul.mubr.bf16.gmra.mrb[108].mxu0 %v1660_v9  ;;  %v2006_v55 = vshrl.u32 %v5745_v29, 16  ;;  %v2010_v23 = vrot.slane %v2008_v37, 1  ;;  %v2101_v63 = vsel %vm1260_vm2, %v2099_v52, %v2100_v54  ;;  %v2307_v46 = vld [vmem:[%s5661_s21 + $0x30] sm:$0xff] }
 0x122   : > { %v4065_v62 = vpop.f32.mrb[8].mxu0  ;;  %4525 = vmatprep.mubr.bf16.mxu0 %v5611_v21  ;;  %v5767_v21 = vld [vmem:[#allocation2 + $0x9c] sm:$0xff]   ;;  %v2106_v9 = vrot.slane %v5638_v4, 1  ;;  %v2108_v52 = vrot.slane %v5646_v8, 1  ;;  %v2109_v54 = vrot.slane %v5653_v60, 1 }
 0x123   : > { %v4066_v3 = vpop.f32.mrb[9].mxu0  ;;  %v2011_v53 = vor.u32 %v2010_v23, %v2006_v55  ;;  %v2111_v23 = vrot.slane %v5666_v39, 1 }
 0x124   : > { %v4067_v51 = vadd.f32 %v4066_v3, %v4065_v62  ;;  %v4068_v5 = vpop.f32.mrb[10].mxu0  ;;  %v2020_v62 = vshll.u32 %v5767_v21, 16  ;;  %v2110_v39 = vsel %vm1260_vm2, %v2108_v52, %v2109_v54 }
 0x125   : > { %v4069_v48 = vpop.f32.mrb[11].mxu0  ;;  %v2113_v0 = vsel %vm1260_vm2, %v2111_v23, %v2112_v50 }
 0x126   : > { %v5750_v57 = vadd.f32 %v4067_v51, %v2305_v12  ;;  %v4070_v19 = vadd.f32 %v4069_v48, %v4068_v5  ;;  %v2105_v5 = vrot.slane %v5630_v16, 1  ;;  %v2308_v48 = vld [vmem:[%s5661_s21 + $0x38] sm:$0xff]  ;;  %v2022_v25 = vrot.slane %v2020_v62, 1 }
 0x127   : > { %v4137_v43 = vpop.f32.mrb[8].mxu1  ;;  %v2104_v16 = vsel %vm1260_vm2, %v2102_v38, %v2103_v42  ;;  %v5807_v42 = vld [vmem:[#allocation2 + $0xb4] sm:$0xff]  }
 0x128   : > { %v4138_v15 = vpop.f32.mrb[9].mxu1  ;;  %v5756_v59 = vadd.f32 %v4070_v19, %v2306_v13  ;;  %3345 = vmatmul.mubr.bf16.gmra.mrb[112].mxu1 %v5706_v18  ;;  %v2016_v13 = vsel %vm1051_vm3, %v2011_v53, %v2015_v10  ;;  %v5786_v19 = vld [vmem:[#allocation2 + $0xa8] sm:$0xff]   ;;  %v2107_v4 = vsel %vm1260_vm2, %v2105_v5, %v2106_v9  ;;  %v2044_v5 = vshll.u32 %v5807_v42, 16 }
 0x129   : > { %v4139_v32 = vadd.f32 %v4138_v15, %v4137_v43  ;;  %v4140_v28 = vpop.f32.mrb[10].mxu1  ;;  %3352 = vmatprep.mubr.bf16.mxu1 %v2004_v41  ;;  %4526 = vmatmul.mubr.bf16.vlgmr.msra.gmra.mrb[112].mxu0 %v5618_v26  ;;  %v2018_v26 = vshrl.u32 %v5767_v21, 16  ;;  %v2027_v15 = vrot.slane %v2025_v20, 1  ;;  %v2030_v62 = vshrl.u32 %v5786_v19, 16 }
 0x12a   : > { %v4141_v40 = vpop.f32.mrb[11].mxu1  ;;  %4529 = vmatprep.mubr.bf16.mxu0 %v2101_v63  ;;  %v2332_v63 = vld [vmem:[%s5661_s21 + $0xf8] sm:$0xff] }
 0x12b   : > { %v5764_v45 = vadd.f32 %v4139_v32, %v2329_v35  ;;  %v4142_v11 = vadd.f32 %v4141_v40, %v4140_v28  ;;  %v2023_v35 = vor.u32 %v2022_v25, %v2018_v26  ;;  %v5795_v32 = vld [vmem:[#allocation2 + $0xb0] ss:$0 sps:$4 sm:$0x11]   ;;  %v2032_v28 = vshll.u32 %v5786_v19, 16 }
 0x12c   : > { %v4071_v2 = vpop.f32.mrb[12].mxu0  ;;  %v2331_v40 = vld [vmem:[%s5661_s21 + $0xf0] sm:$0xff]  ;;  %v2037_v38 = vshll.u32 %v5795_v32, 16 }
 0x12d   : > { %v5770_v22 = vadd.f32 %v4142_v11, %v2330_v30  ;;  %v4072_v12 = vpop.f32.mrb[13].mxu0  ;;  %v2028_v10 = vsel %vm1051_vm3, %v2023_v35, %v2027_v15 }
 0x12e   : > { %v4073_v3 = vadd.f32 %v4072_v12, %v4071_v2  ;;  %v4074_v51 = vpop.f32.mrb[14].mxu0  ;;  %v2034_v2 = vrot.slane %v2032_v28, 1 }
 0x12f   : > { %v4075_v14 = vpop.f32.mrb[15].mxu0 }
 0x130   : > { %v5788_v44 = vadd.f32 %v4073_v3, %v2307_v46  ;;  %v4076_v43 = vadd.f32 %v4075_v14, %v4074_v51  ;;  %3353 = vmatmul.mubr.bf16.gmra.mrb[116].mxu1 %v5721_v6  ;;  %v2035_v12 = vor.u32 %v2034_v2, %v2030_v62  ;;  %v2039_v3 = vrot.slane %v2037_v38, 1  ;;  %v5816_v51 = vld [vmem:[#allocation2 + $0xbc] ss:$0 sps:$4 sm:$0x11]  }
 0x131   : > { %3360 = vmatprep.mubr.bf16.mxu1 %v2016_v13  ;;  %4530 = vmatmul.mubr.bf16.gmra.mrb[116].mxu0 %v2104_v16  ;;  %v2115_v14 = vrot.slane %v5693_v1, 1  ;;  %v2117_v16 = vrot.slane %v5706_v18, 1  ;;  %v2310_v18 = vld [vmem:[%s5661_s21 + $0x48] sm:$0xff] }
 0x132   : > { %v5793_v37 = vadd.f32 %v4076_v43, %v2308_v48  ;;  %4533 = vmatprep.mubr.bf16.mxu0 %v2107_v4  ;;  %v2114_v48 = vrot.slane %v5686_v47, 1  ;;  %v2309_v43 = vld [vmem:[%s5661_s21 + $0x40] sm:$0xff]  ;;  %v2118_v4 = vrot.slane %v5713_v7, 1  ;;  %v2040_v28 = vsel %vm1051_vm3, %v2035_v12, %v2039_v3  ;;  %v5841_v62 = vld [vmem:[#allocation2 + $0xc8] ss:$0 sps:$4 sm:$0x11]  }
 0x133   : > { %v4143_v30 = vpop.f32.mrb[12].mxu1  ;;  %v2049_v47 = vshll.u32 %v5816_v51, 16 }
 0x134   : > { %v4144_v41 = vpop.f32.mrb[13].mxu1  ;;  %v2116_v7 = vsel %vm1260_vm2, %v2114_v48, %v2115_v14  ;;  %v2124_v48 = vrot.slane %v5752_v31, 1 }
 0x135   : > { %v4145_v55 = vadd.f32 %v4144_v41, %v4143_v30  ;;  %v4146_v11 = vpop.f32.mrb[14].mxu1  ;;  %v2042_v30 = vshrl.u32 %v5807_v42, 16  ;;  %v5827_v41 = vld [vmem:[#allocation2 + $0xc0] sm:$0xff]  }
 0x136   : > { %v4147_v53 = vpop.f32.mrb[15].mxu1  ;;  %v2056_v2 = vshll.u32 %v5827_v41, 16 }
 0x137   : > { %v5809_v8 = vadd.f32 %v4145_v55, %v2331_v40  ;;  %v4148_v60 = vadd.f32 %v4147_v53, %v4146_v11  ;;  %v2046_v40 = vrot.slane %v2044_v5, 1 }
 0x138   : > { %3361 = vmatmul.mubr.bf16.gmra.mrb[120].mxu1 %v5745_v29 }
 0x139   : > { %v5813_v46 = vadd.f32 %v4148_v60, %v2332_v63  ;;  %3368 = vmatprep.mubr.bf16.mxu1 %v2028_v10  ;;  %4534 = vmatmul.mubr.bf16.gmra.mrb[120].mxu0 %v2110_v39  ;;  %v2047_v53 = vor.u32 %v2046_v40, %v2042_v30  ;;  %v2051_v10 = vrot.slane %v2049_v47, 1 }
 0x13a   : > { %4537 = vmatprep.mubr.bf16.mxu0 %v2113_v0  ;;  %v2121_v0 = vrot.slane %v5734_v27, 1 }
 0x13b   : > { %v4165_v9 = vpop.f32.mrb[16].mxu1 }
 0x13c   : > { %v4166_v13 = vpop.f32.mrb[17].mxu1  ;;  %v4077_v25 = vpop.f32.mrb[16].mxu0 }
 0x13d   : > { %v4167_v26 = vadd.f32 %v4166_v13, %v4165_v9  ;;  %v4168_v20 = vpop.f32.mrb[18].mxu1  ;;  %v4078_v35 = vpop.f32.mrb[17].mxu0  ;;  %v2311_v9 = vld [vmem:[%s5661_s21 + $0x50] sm:$0xff]  ;;  %v2123_v13 = vrot.slane %v5745_v29, 1  ;;  %v2312_v29 = vld [vmem:[%s5661_s21 + $0x58] sm:$0xff] }
 0x13e   : > { %v4169_v15 = vpop.f32.mrb[19].mxu1  ;;  %v4079_v52 = vadd.f32 %v4078_v35, %v4077_v25  ;;  %v4080_v55 = vpop.f32.mrb[18].mxu0  ;;  %v2052_v25 = vsel %vm1051_vm3, %v2047_v53, %v2051_v10 }
 0x13f   : > { %v5830_v1 = vadd.f32 %v4167_v26, %v5674_v34  ;;  %v4170_v54 = vadd.f32 %v4169_v15, %v4168_v20  ;;  %v4081_v11 = vpop.f32.mrb[19].mxu0  ;;  %v2119_v34 = vsel %vm1260_vm2, %v2117_v16, %v2118_v4  ;;  %v2054_v20 = vshrl.u32 %v5827_v41, 16  ;;  %v5854_v16 = vld [vmem:[#allocation2 + $0xcc] sm:$0xff]  }
 0x140   : > { %3369 = vmatmul.mubr.bf16.gmra.mrb[124].mxu1 %v5767_v21  ;;  %v5835_v23 = vadd.f32 %v4079_v52, %v2309_v43  ;;  %v4082_v63 = vadd.f32 %v4081_v11, %v4080_v55  ;;  %v2058_v43 = vrot.slane %v2056_v2, 1  ;;  %v2125_v52 = vsel %vm1260_vm2, %v2123_v13, %v2124_v48  ;;  %v5868_v55 = vld [vmem:[#allocation2 + $0xd4] ss:$0 sps:$4 sm:$0x11]  }
 0x141   : > { %v5838_v50 = vadd.f32 %v4170_v54, %v5679_v36  ;;  %3376 = vmatprep.mubr.bf16.mxu1 %v2040_v28  ;;  %4538 = vmatmul.mubr.bf16.gmra.mrb[124].mxu0 %v2116_v7  ;;  %v2120_v36 = vrot.slane %v5721_v6, 1  ;;  %v2061_v6 = vshll.u32 %v5841_v62, 16 }
 0x142   : > { %v5844_v38 = vadd.f32 %v4082_v63, %v2310_v18  ;;  %4541 = vmatprep.mubr.bf16.mxu0 %v2119_v34  ;;  %v2068_v18 = vshll.u32 %v5854_v16, 16  ;;  %v2127_v34 = vrot.slane %v5773_v58, 1 }
 0x143   : > { %v4171_v60 = vpop.f32.mrb[20].mxu1  ;;  %v2122_v31 = vsel %vm1260_vm2, %v2120_v36, %v2121_v0  ;;  %v2063_v54 = vrot.slane %v2061_v6, 1  ;;  %v2313_v36 = vld [vmem:[%s5661_s21 + $0x60] sm:$0xff] }
 0x144   : > { %v4172_v39 = vpop.f32.mrb[21].mxu1  ;;  %v4083_v3 = vpop.f32.mrb[20].mxu0 }
 0x145   : > { %v4173_v12 = vadd.f32 %v4172_v39, %v4171_v60  ;;  %v4174_v5 = vpop.f32.mrb[22].mxu1  ;;  %v4084_v14 = vpop.f32.mrb[21].mxu0  ;;  %v2129_v60 = vrot.slane %v5786_v19, 1  ;;  %v2130_v39 = vrot.slane %v5795_v32, 1 }
 0x146   : > { %v4175_v26 = vpop.f32.mrb[23].mxu1  ;;  %v4085_v4 = vadd.f32 %v4084_v14, %v4083_v3  ;;  %v4086_v15 = vpop.f32.mrb[22].mxu0 }
 0x147   : > { %v5857_v27 = vadd.f32 %v4173_v12, %v5719_v17  ;;  %v4176_v35 = vadd.f32 %v4175_v26, %v4174_v5  ;;  %v4087_v28 = vpop.f32.mrb[23].mxu0  ;;  %v2059_v17 = vor.u32 %v2058_v43, %v2054_v20  ;;  %v2066_v5 = vshrl.u32 %v5854_v16, 16  ;;  %v2314_v26 = vld [vmem:[%s5661_s21 + $0x68] sm:$0xff] }
 0x148   : > { %3377 = vmatmul.mubr.bf16.gmra.mrb[128].mxu1 %v5786_v19  ;;  %v5862_v30 = vadd.f32 %v4085_v4, %v2311_v9  ;;  %v4088_v47 = vadd.f32 %v4087_v28, %v4086_v15  ;;  %v2070_v9 = vrot.slane %v2068_v18, 1  ;;  %v2131_v6 = vsel %vm1260_vm2, %v2129_v60, %v2130_v39 }
 0x149   : > { %v5865_v40 = vadd.f32 %v4176_v35, %v5728_v24  ;;  %3384 = vmatprep.mubr.bf16.mxu1 %v2052_v25  ;;  %4542 = vmatmul.mubr.bf16.gmra.mrb[128].mxu0 %v2122_v31  ;;  %v2126_v24 = vrot.slane %v5767_v21, 1  ;;  %v2064_v3 = vsel %vm1051_vm3, %v2059_v17, %v2063_v54  ;;  %v2073_v21 = vshll.u32 %v5868_v55, 16 }
 0x14a   : > { %v5871_v11 = vadd.f32 %v4088_v47, %v2312_v29  ;;  %4545 = vmatprep.mubr.bf16.mxu0 %v2125_v52  ;;  %v2132_v28 = vrot.slane %v5807_v42, 1  ;;  %v2133_v31 = vrot.slane %v5816_v51, 1  ;;  %v2135_v52 = vrot.slane %v5827_v41, 1 }
 0x14b   : > { %v4177_v7 = vpop.f32.mrb[24].mxu1  ;;  %v2128_v32 = vsel %vm1260_vm2, %v2126_v24, %v2127_v34  ;;  %v2075_v4 = vrot.slane %v2073_v21, 1  ;;  %v2136_v17 = vrot.slane %v5841_v62, 1  ;;  %v2315_v24 = vld [vmem:[%s5661_s21 + $0x70] sm:$0xff]  ;;  %v2316_v62 = vld [vmem:[%s5661_s21 + $0x78] sm:$0xff] }
 0x14c   : > { %v4178_v63 = vpop.f32.mrb[25].mxu1  ;;  %v4089_v10 = vpop.f32.mrb[24].mxu0  ;;  %v2134_v51 = vsel %vm1260_vm2, %v2132_v28, %v2133_v31 }
 0x14d   : > { %v4179_v53 = vadd.f32 %v4178_v63, %v4177_v7  ;;  %v4180_v2 = vpop.f32.mrb[26].mxu1  ;;  %v4090_v0 = vpop.f32.mrb[25].mxu0  ;;  %v2137_v39 = vsel %vm1260_vm2, %v2135_v52, %v2136_v17 }
 0x14e   : > { %v4181_v12 = vpop.f32.mrb[27].mxu1  ;;  %v4091_v13 = vadd.f32 %v4090_v0, %v4089_v10  ;;  %v4092_v14 = vpop.f32.mrb[26].mxu0 }
 0x14f   : > { %v5882_v58 = vadd.f32 %v4179_v53, %v5750_v57  ;;  %v4182_v48 = vadd.f32 %v4181_v12, %v4180_v2  ;;  %v4093_v19 = vpop.f32.mrb[27].mxu0  ;;  %v2071_v57 = vor.u32 %v2070_v9, %v2066_v5 }
 0x150   : > { %3385 = vmatmul.mubr.bf16.gmra.mrb[132].mxu1 %v5807_v42  ;;  %v5887_v25 = vadd.f32 %v4091_v13, %v2313_v36  ;;  %v4094_v43 = vadd.f32 %v4093_v19, %v4092_v14  ;;  %v2317_v14 = vld [vmem:[%s5661_s21 + $0x80] sm:$0xff] }
 0x151   : > { %v5890_v20 = vadd.f32 %v4182_v48, %v5756_v59  ;;  %3392 = vmatprep.mubr.bf16.mxu1 %v2064_v3  ;;  %4546 = vmatmul.mubr.bf16.gmra.mrb[132].mxu0 %v2128_v32  ;;  %v2076_v7 = vsel %vm1051_vm3, %v2071_v57, %v2075_v4 }
 0x152   : > { %v5893_v35 = vadd.f32 %v4094_v43, %v2314_v26  ;;  %4549 = vmatprep.mubr.bf16.mxu0 %v2131_v6 }
 0x153   : > { %v4183_v15 = vpop.f32.mrb[28].mxu1 }
 0x154   : > { %v4184_v29 = vpop.f32.mrb[29].mxu1  ;;  %v4095_v54 = vpop.f32.mrb[28].mxu0 }
 0x155   : > { %v4185_v47 = vadd.f32 %v4184_v29, %v4183_v15  ;;  %v4186_v59 = vpop.f32.mrb[30].mxu1  ;;  %v4096_v34 = vpop.f32.mrb[29].mxu0 }
 0x156   : > { %v4187_v18 = vpop.f32.mrb[31].mxu1  ;;  %v4097_v42 = vadd.f32 %v4096_v34, %v4095_v54  ;;  %v4098_v10 = vpop.f32.mrb[30].mxu0 }
 0x157   : > { %v5901_v63 = vadd.f32 %v4185_v47, %v5788_v44  ;;  %v4188_v53 = vadd.f32 %v4187_v18, %v4186_v59  ;;  %v4099_v60 = vpop.f32.mrb[31].mxu0 }
 0x158   : > { %3393 = vmatmul.mubr.bf16.gmra.mrb[136].mxu1 %v5827_v41  ;;  %v5911_v44 = vadd.f32 %v4097_v42, %v2315_v24  ;;  %v4100_v36 = vadd.f32 %v4099_v60, %v4098_v10  ;;  %v2138_v41 = vrot.slane %v5854_v16, 1 }
 0x159   : > { %v5907_v2 = vadd.f32 %v4188_v53, %v5793_v37  ;;  %3400 = vmatprep.mubr.bf16.mxu1 %v2076_v7  ;;  %4550 = vmatmul.mubr.bf16.gmra.mrb[136].mxu0 %v2134_v51  ;;  %v2139_v37 = vrot.slane %v5868_v55, 1  ;;  %v2318_v55 = vld [vmem:[%s5661_s21 + $0x88] sm:$0xff]  ;;  %v2320_v53 = vld [vmem:[%s5661_s21 + $0x98] sm:$0xff] }
 0x15a   : > { %v5913_v12 = vadd.f32 %v4100_v36, %v2316_v62  ;;  %4553 = vmatprep.mubr.bf16.mxu0 %v2137_v39 }
 0x15b   : > { %v4189_v0 = vpop.f32.mrb[32].mxu1  ;;  %v2140_v6 = vsel %vm1260_vm2, %v2138_v41, %v2139_v37  ;;  %v2321_v37 = vld [vmem:[%s5661_s21 + $0xa0] sm:$0xff] }
 0x15c   : > { %v4190_v3 = vpop.f32.mrb[33].mxu1  ;;  %v4101_v21 = vpop.f32.mrb[32].mxu0 }
 0x15d   : > { %v4191_v5 = vadd.f32 %v4190_v3, %v4189_v0  ;;  %v4192_v9 = vpop.f32.mrb[34].mxu1  ;;  %v4102_v26 = vpop.f32.mrb[33].mxu0 }
 0x15e   : > { %v4193_v13 = vpop.f32.mrb[35].mxu1  ;;  %v4103_v32 = vadd.f32 %v4102_v26, %v4101_v21  ;;  %v4104_v43 = vpop.f32.mrb[34].mxu0 }
 0x15f   : > { %v5918_v48 = vadd.f32 %v4191_v5, %v5835_v23  ;;  %v4194_v19 = vadd.f32 %v4193_v13, %v4192_v9  ;;  %v4105_v4 = vpop.f32.mrb[35].mxu0 }
 0x160   : > { %3401 = vmatmul.mubr.bf16.gmra.mrb[140].mxu1 %v5854_v16  ;;  %v5927_v15 = vadd.f32 %v4103_v32, %v2317_v14  ;;  %v4106_v29 = vadd.f32 %v4105_v4, %v4104_v43  ;;  %v2322_v14 = vld [vmem:[%s5661_s21 + $0xa8] sm:$0xff] }
 0x161   : > { %v5924_v57 = vadd.f32 %v4194_v19, %v5844_v38  ;;  %4554 = vmatmul.mubr.bf16.gmra.mrb[140].mxu0 %v2140_v6  ;;  %v2319_v38 = vld [vmem:[%s5661_s21 + $0x90] sm:$0xff] }
 0x162   : > { %v5929_v28 = vadd.f32 %v4106_v29, %v2318_v55 }
 0x163   : > { %v4195_v23 = vpop.f32.mrb[36].mxu1 }
 0x164   : > { %v4196_v31 = vpop.f32.mrb[37].mxu1  ;;  %v4107_v16 = vpop.f32.mrb[36].mxu0 }
 0x165   : > { %v4197_v47 = vadd.f32 %v4196_v31, %v4195_v23  ;;  %v4198_v59 = vpop.f32.mrb[38].mxu1  ;;  %v4108_v54 = vpop.f32.mrb[37].mxu0 }
 0x166   : > { %v4199_v52 = vpop.f32.mrb[39].mxu1  ;;  %v4109_v7 = vadd.f32 %v4108_v54, %v4107_v16  ;;  %v4110_v24 = vpop.f32.mrb[38].mxu0  ;;  %v2324_v54 = vld [vmem:[%s5661_s21 + $0xb8] sm:$0xff] }
 0x167   : > { %v5932_v17 = vadd.f32 %v4197_v47, %v5862_v30  ;;  %v4200_v18 = vadd.f32 %v4199_v52, %v4198_v59  ;;  %v4111_v42 = vpop.f32.mrb[39].mxu0  ;;  %v2323_v47 = vld [vmem:[%s5661_s21 + $0xb0] sm:$0xff] }
 0x168   : > { %v2872_v10 = vadd.f32 %v4109_v7, %v2319_v38  ;;  %v4112_v51 = vadd.f32 %v4111_v42, %v4110_v24 }
 0x169   : > { %v5936_v34 = vadd.f32 %v4200_v18, %v5871_v11 }
 0x16a   : > { %v5939_v60 = vadd.f32 %v4112_v51, %v2320_v53 }
 0x16b   : > { %v4201_v62 = vpop.f32.mrb[40].mxu1 }
 0x16c   : > { %v4202_v39 = vpop.f32.mrb[41].mxu1  ;;  %v4113_v0 = vpop.f32.mrb[40].mxu0 }
 0x16d   : > { %v4203_v30 = vadd.f32 %v4202_v39, %v4201_v62  ;;  %v4204_v36 = vpop.f32.mrb[42].mxu1  ;;  %v4114_v5 = vpop.f32.mrb[41].mxu0 }
 0x16e   : > { %v4205_v3 = vpop.f32.mrb[43].mxu1  ;;  %v4115_v9 = vadd.f32 %v4114_v5, %v4113_v0  ;;  %v4116_v21 = vpop.f32.mrb[42].mxu0 }
 0x16f   : > { %v5942_v41 = vadd.f32 %v4203_v30, %v5887_v25  ;;  %v4206_v11 = vadd.f32 %v4205_v3, %v4204_v36  ;;  %v4117_v26 = vpop.f32.mrb[43].mxu0 }
 0x170   : > { %v2880_v19 = vadd.f32 %v4115_v9, %v2321_v37  ;;  %v4118_v32 = vadd.f32 %v4117_v26, %v4116_v21 }
 0x171   : > { %v5946_v13 = vadd.f32 %v4206_v11, %v5893_v35 }
 0x172   : > { %v2883_v6 = vadd.f32 %v4118_v32, %v2322_v14 }
 0x173   : > { %v4207_v43 = vpop.f32.mrb[44].mxu1 }
 0x174   : > { %v4208_v55 = vpop.f32.mrb[45].mxu1  ;;  %v4119_v29 = vpop.f32.mrb[44].mxu0 }
 0x175   : > { %v4209_v4 = vadd.f32 %v4208_v55, %v4207_v43  ;;  %v4210_v25 = vpop.f32.mrb[46].mxu1  ;;  %v4120_v59 = vpop.f32.mrb[45].mxu0 }
 0x176   : > { %v4211_v23 = vpop.f32.mrb[47].mxu1  ;;  %v4121_v35 = vadd.f32 %v4120_v59, %v4119_v29  ;;  %v4122_v52 = vpop.f32.mrb[46].mxu0 }
 0x177   : > { %v5950_v31 = vadd.f32 %v4209_v4, %v5911_v44  ;;  %v4212_v16 = vadd.f32 %v4211_v23, %v4210_v25  ;;  %v4123_v18 = vpop.f32.mrb[47].mxu0 }
 0x178   : > { %v2888_v7 = vadd.f32 %v4121_v35, %v2323_v47  ;;  %v4124_v24 = vadd.f32 %v4123_v18, %v4122_v52 }
 0x179   : > { %v5954_v38 = vadd.f32 %v4212_v16, %v5913_v12 }
 0x17a   : > { %v2891_v42 = vadd.f32 %v4124_v24, %v2324_v54 }
 0x17b   : > { %v4213_v53 = vpop.f32.mrb[48].mxu1 }
 0x17c   : > { %v4214_v51 = vpop.f32.mrb[49].mxu1  ;;  %v4277_v30 = vpop.f32.mrb[48].mxu0 }
 0x17d   : > { %v4215_v62 = vadd.f32 %v4214_v51, %v4213_v53  ;;  %v4216_v39 = vpop.f32.mrb[50].mxu1  ;;  %v4278_v0 = vpop.f32.mrb[49].mxu0 }
 0x17e   : > { %v4217_v44 = vpop.f32.mrb[51].mxu1  ;;  %v4279_v37 = vadd.f32 %v4278_v0, %v4277_v30  ;;  %v4280_v5 = vpop.f32.mrb[50].mxu0 }
 0x17f   : > { %v5958_v36 = vadd.f32 %v4215_v62, %v5927_v15  ;;  %v4218_v3 = vadd.f32 %v4217_v44, %v4216_v39  ;;  %v4281_v11 = vpop.f32.mrb[51].mxu0 }
 0x180   : > { %v5964_v9 = vadd.f32 %v4279_v37, %v5830_v1  ;;  %v4282_v21 = vadd.f32 %v4281_v11, %v4280_v5 }
 0x181   : > { %v5961_v12 = vadd.f32 %v4218_v3, %v5929_v28 }
 0x182   : > { %v5967_v26 = vadd.f32 %v4282_v21, %v5838_v50 }
 0x183   : > { %v4219_v14 = vpop.f32.mrb[52].mxu1 }
 0x184   : > { %v4220_v32 = vpop.f32.mrb[53].mxu1  ;;  %v4283_v55 = vpop.f32.mrb[52].mxu0 }
 0x185   : > { %v4221_v43 = vadd.f32 %v4220_v32, %v4219_v14  ;;  %v4222_v15 = vpop.f32.mrb[54].mxu1  ;;  %v4284_v29 = vpop.f32.mrb[53].mxu0 }
 0x186   : > { %v4223_v4 = vpop.f32.mrb[55].mxu1  ;;  %v4285_v28 = vadd.f32 %v4284_v29, %v4283_v55  ;;  %v4286_v47 = vpop.f32.mrb[54].mxu0 }
 0x187   : > { %v5969_v25 = vadd.f32 %v4221_v43, %v2872_v10  ;;  %v4224_v23 = vadd.f32 %v4223_v4, %v4222_v15  ;;  %v4287_v1 = vpop.f32.mrb[55].mxu0 }
 0x188   : > { %v5975_v16 = vadd.f32 %v4285_v28, %v5857_v27  ;;  %v4288_v50 = vadd.f32 %v4287_v1, %v4286_v47 }
 0x189   : > { %v5972_v59 = vadd.f32 %v4224_v23, %v5939_v60 }
 0x18a   : > { %v5978_v52 = vadd.f32 %v4288_v50, %v5865_v40 }
 0x18b   : > { %v4225_v35 = vpop.f32.mrb[56].mxu1 }
 0x18c   : > { %v4226_v54 = vpop.f32.mrb[57].mxu1  ;;  %v4289_v24 = vpop.f32.mrb[56].mxu0 }
 0x18d   : > { %v4227_v18 = vadd.f32 %v4226_v54, %v4225_v35  ;;  %v4228_v10 = vpop.f32.mrb[58].mxu1  ;;  %v4290_v62 = vpop.f32.mrb[57].mxu0 }
 0x18e   : > { %v4229_v53 = vpop.f32.mrb[59].mxu1  ;;  %v4291_v60 = vadd.f32 %v4290_v62, %v4289_v24  ;;  %v4292_v30 = vpop.f32.mrb[58].mxu0 }
 0x18f   : > { %v5980_v51 = vadd.f32 %v4227_v18, %v2880_v19  ;;  %v4230_v39 = vadd.f32 %v4229_v53, %v4228_v10  ;;  %v4293_v27 = vpop.f32.mrb[59].mxu0 }
 0x190   : > { %v5985_v0 = vadd.f32 %v4291_v60, %v5882_v58  ;;  %v4294_v3 = vadd.f32 %v4293_v27, %v4292_v30 }
 0x191   : > { %v5982_v44 = vadd.f32 %v4230_v39, %v2883_v6 }
 0x192   : > { %v5988_v37 = vadd.f32 %v4294_v3, %v5890_v20 }
 0x193   : > { %v4231_v40 = vpop.f32.mrb[60].mxu1 }
 0x194   : > { %v4232_v5 = vpop.f32.mrb[61].mxu1  ;;  %v4295_v19 = vpop.f32.mrb[60].mxu0 }
 0x195   : > { %v4233_v11 = vadd.f32 %v4232_v5, %v4231_v40  ;;  %v4234_v21 = vpop.f32.mrb[62].mxu1  ;;  %v4296_v43 = vpop.f32.mrb[61].mxu0 }
 0x196   : > { %v4235_v14 = vpop.f32.mrb[63].mxu1  ;;  %v4297_v6 = vadd.f32 %v4296_v43, %v4295_v19  ;;  %v4298_v55 = vpop.f32.mrb[62].mxu0 }
 0x197   : > { %v5990_v32 = vadd.f32 %v4233_v11, %v2888_v7  ;;  %v4236_v15 = vadd.f32 %v4235_v14, %v4234_v21  ;;  %v4299_v58 = vpop.f32.mrb[63].mxu0 }
 0x198   : > { %v5995_v29 = vadd.f32 %v4297_v6, %v5901_v63  ;;  %v4300_v23 = vadd.f32 %v4299_v58, %v4298_v55 }
 0x199   : > { %v5992_v4 = vadd.f32 %v4236_v15, %v2891_v42 }
 0x19a   : > { %v5998_v28 = vadd.f32 %v4300_v23, %v5907_v2 }
 0x19b   : > { %v4237_v20 = vpop.f32.mrb[64].mxu1 }
 0x19c   : > { %v4238_v47 = vpop.f32.mrb[65].mxu1  ;;  %v4301_v7 = vpop.f32.mrb[64].mxu0 }
 0x19d   : > { %v4239_v1 = vadd.f32 %v4238_v47, %v4237_v20  ;;  %v4240_v50 = vpop.f32.mrb[66].mxu1  ;;  %v4302_v18 = vpop.f32.mrb[65].mxu0 }
 0x19e   : > { %v4241_v35 = vpop.f32.mrb[67].mxu1  ;;  %v4303_v10 = vadd.f32 %v4302_v18, %v4301_v7  ;;  %v4304_v24 = vpop.f32.mrb[66].mxu0 }
 0x19f   : > { %v6001_v54 = vadd.f32 %v4239_v1, %v5698_v33  ;;  %v4242_v42 = vadd.f32 %v4241_v35, %v4240_v50  ;;  %v4305_v53 = vpop.f32.mrb[67].mxu0 }
 0x1a0   : > { %v6007_v62 = vadd.f32 %v4303_v10, %v5918_v48  ;;  %v4306_v2 = vadd.f32 %v4305_v53, %v4304_v24 }
 0x1a1   : > { %v6004_v63 = vadd.f32 %v4242_v42, %v5703_v56 }
 0x1a2   : > { %v6010_v60 = vadd.f32 %v4306_v2, %v5924_v57 }
 0x1a3   : > { %v4243_v39 = vpop.f32.mrb[68].mxu1 }
 0x1a4   : > { %v4244_v30 = vpop.f32.mrb[69].mxu1  ;;  %v4307_v3 = vpop.f32.mrb[68].mxu0 }
 0x1a5   : > { %v4245_v27 = vadd.f32 %v4244_v30, %v4243_v39  ;;  %v4246_v33 = vpop.f32.mrb[70].mxu1  ;;  %v4308_v11 = vpop.f32.mrb[69].mxu0 }
 0x1a6   : > { %v4247_v40 = vpop.f32.mrb[71].mxu1  ;;  %v4309_v21 = vadd.f32 %v4308_v11, %v4307_v3  ;;  %v4310_v19 = vpop.f32.mrb[70].mxu0 }
 0x1a7   : > { %v6013_v5 = vadd.f32 %v4245_v27, %v5737_v49  ;;  %v4248_v56 = vadd.f32 %v4247_v40, %v4246_v33  ;;  %v4311_v14 = vpop.f32.mrb[71].mxu0 }
 0x1a8   : > { %v6019_v43 = vadd.f32 %v4309_v21, %v5932_v17  ;;  %v4312_v57 = vadd.f32 %v4311_v14, %v4310_v19 }
 0x1a9   : > { %v6016_v48 = vadd.f32 %v4248_v56, %v5739_v61 }
 0x1aa   : > { %v6022_v6 = vadd.f32 %v4312_v57, %v5936_v34 }
 0x1ab   : > { %v4249_v15 = vpop.f32.mrb[72].mxu1 }
 0x1ac   : > { %v4250_v55 = vpop.f32.mrb[73].mxu1  ;;  %v4313_v23 = vpop.f32.mrb[72].mxu0 }
 0x1ad   : > { %v4251_v58 = vadd.f32 %v4250_v55, %v4249_v15  ;;  %v4252_v49 = vpop.f32.mrb[74].mxu1  ;;  %v4314_v1 = vpop.f32.mrb[73].mxu0 }
 0x1ae   : > { %v4253_v20 = vpop.f32.mrb[75].mxu1  ;;  %v4315_v50 = vadd.f32 %v4314_v1, %v4313_v23  ;;  %v4316_v7 = vpop.f32.mrb[74].mxu0 }
 0x1af   : > { %v6025_v47 = vadd.f32 %v4251_v58, %v5764_v45  ;;  %v4254_v61 = vadd.f32 %v4253_v20, %v4252_v49  ;;  %v4317_v35 = vpop.f32.mrb[75].mxu0 }
 0x1b0   : > { %v6031_v18 = vadd.f32 %v4315_v50, %v5942_v41  ;;  %v4318_v34 = vadd.f32 %v4317_v35, %v4316_v7 }
 0x1b1   : > { %v6028_v17 = vadd.f32 %v4254_v61, %v5770_v22 }
 0x1b2   : > { %v6034_v10 = vadd.f32 %v4318_v34, %v5946_v13 }
 0x1b3   : > { %v4255_v42 = vpop.f32.mrb[76].mxu1 }
 0x1b4   : > { %v4256_v24 = vpop.f32.mrb[77].mxu1  ;;  %v4319_v2 = vpop.f32.mrb[76].mxu0 }
 0x1b5   : > { %v4257_v53 = vadd.f32 %v4256_v24, %v4255_v42  ;;  %v4258_v45 = vpop.f32.mrb[78].mxu1  ;;  %v4320_v27 = vpop.f32.mrb[77].mxu0 }
 0x1b6   : > { %v4259_v39 = vpop.f32.mrb[79].mxu1  ;;  %v4321_v33 = vadd.f32 %v4320_v27, %v4319_v2  ;;  %v4322_v3 = vpop.f32.mrb[78].mxu0 }
 0x1b7   : > { %v6037_v30 = vadd.f32 %v4257_v53, %v5809_v8  ;;  %v4260_v22 = vadd.f32 %v4259_v39, %v4258_v45  ;;  %v4323_v40 = vpop.f32.mrb[79].mxu0 }
 0x1b8   : > { %v6043_v11 = vadd.f32 %v4321_v33, %v5950_v31  ;;  %v4324_v13 = vadd.f32 %v4323_v40, %v4322_v3 }
 0x1b9   : > { %v6040_v41 = vadd.f32 %v4260_v22, %v5813_v46 }
 0x1ba   : > { %v6046_v21 = vadd.f32 %v4324_v13, %v5954_v38 }
 0x1bb   : > { %v4389_v56 = vpop.f32.mrb[80].mxu1 }
 0x1bc   : > { %v4390_v19 = vpop.f32.mrb[81].mxu1  ;;  %v4325_v57 = vpop.f32.mrb[80].mxu0 }
 0x1bd   : > { %v4391_v14 = vadd.f32 %v4390_v19, %v4389_v56  ;;  %v4392_v8 = vpop.f32.mrb[82].mxu1  ;;  %v4326_v55 = vpop.f32.mrb[81].mxu0 }
 0x1be   : > { %v4393_v15 = vpop.f32.mrb[83].mxu1  ;;  %v4327_v46 = vadd.f32 %v4326_v55, %v4325_v57  ;;  %v4328_v23 = vpop.f32.mrb[82].mxu0 }
 0x1bf   : > { %v4394_v58 = vadd.f32 %v4393_v15, %v4392_v8  ;;  %v6049_v49 = vadd.f32 %v4391_v14, %v5964_v9  ;;  %v4329_v20 = vpop.f32.mrb[83].mxu0 }
 0x1c0   : > { %v6055_v1 = vadd.f32 %v4327_v46, %v5958_v36  ;;  %v4330_v38 = vadd.f32 %v4329_v20, %v4328_v23 }
 0x1c1   : > { %v6052_v31 = vadd.f32 %v4394_v58, %v5967_v26 }
 0x1c2   : > { %v6058_v50 = vadd.f32 %v4330_v38, %v5961_v12 }
 0x1c3   : > { %v4395_v61 = vpop.f32.mrb[84].mxu1 }
 0x1c4   : > { %v4396_v7 = vpop.f32.mrb[85].mxu1  ;;  %v4331_v42 = vpop.f32.mrb[84].mxu0 }
 0x1c5   : > { %v4397_v35 = vadd.f32 %v4396_v7, %v4395_v61  ;;  %v4398_v34 = vpop.f32.mrb[86].mxu1  ;;  %v4332_v24 = vpop.f32.mrb[85].mxu0 }
 0x1c6   : > { %v4399_v9 = vpop.f32.mrb[87].mxu1  ;;  %v4333_v26 = vadd.f32 %v4332_v24, %v4331_v42  ;;  %v4334_v2 = vpop.f32.mrb[86].mxu0 }
 0x1c7   : > { %v4400_v53 = vadd.f32 %v4399_v9, %v4398_v34  ;;  %v6061_v45 = vadd.f32 %v4397_v35, %v5975_v16  ;;  %v4335_v39 = vpop.f32.mrb[87].mxu0 }
 0x1c8   : > { %v6067_v27 = vadd.f32 %v4333_v26, %v5969_v25  ;;  %v4336_v12 = vadd.f32 %v4335_v39, %v4334_v2 }
 0x1c9   : > { %v6064_v36 = vadd.f32 %v4400_v53, %v5978_v52 }
 0x1ca   : > { %v6070_v33 = vadd.f32 %v4336_v12, %v5972_v59 }
 0x1cb   : > { %v4401_v22 = vpop.f32.mrb[88].mxu1 }
 0x1cc   : > { %v4402_v3 = vpop.f32.mrb[89].mxu1  ;;  %v4337_v56 = vpop.f32.mrb[88].mxu0 }
 0x1cd   : > { %v4403_v40 = vadd.f32 %v4402_v3, %v4401_v22  ;;  %v4404_v13 = vpop.f32.mrb[90].mxu1  ;;  %v4338_v19 = vpop.f32.mrb[89].mxu0 }
 0x1ce   : > { %v4405_v16 = vpop.f32.mrb[91].mxu1  ;;  %v4339_v52 = vadd.f32 %v4338_v19, %v4337_v56  ;;  %v4340_v57 = vpop.f32.mrb[90].mxu0 }
 0x1cf   : > { %v4406_v14 = vadd.f32 %v4405_v16, %v4404_v13  ;;  %v6073_v8 = vadd.f32 %v4403_v40, %v5985_v0  ;;  %v4341_v15 = vpop.f32.mrb[91].mxu0 }
 0x1d0   : > { %v6079_v55 = vadd.f32 %v4339_v52, %v5980_v51  ;;  %v4342_v59 = vadd.f32 %v4341_v15, %v4340_v57 }
 0x1d1   : > { %v6076_v25 = vadd.f32 %v4406_v14, %v5988_v37 }
 0x1d2   : > { %v6082_v46 = vadd.f32 %v4342_v59, %v5982_v44 }
 0x1d3   : > { %v4407_v58 = vpop.f32.mrb[92].mxu1 }
 0x1d4   : > { %v4408_v23 = vpop.f32.mrb[93].mxu1  ;;  %v4343_v61 = vpop.f32.mrb[92].mxu0 }
 0x1d5   : > { %v4409_v20 = vadd.f32 %v4408_v23, %v4407_v58  ;;  %v4410_v38 = vpop.f32.mrb[94].mxu1  ;;  %v4344_v7 = vpop.f32.mrb[93].mxu0 }
 0x1d6   : > { %v4411_v0 = vpop.f32.mrb[95].mxu1  ;;  %v4345_v37 = vadd.f32 %v4344_v7, %v4343_v61  ;;  %v4346_v42 = vpop.f32.mrb[94].mxu0 }
 0x1d7   : > { %v4412_v35 = vadd.f32 %v4411_v0, %v4410_v38  ;;  %v6085_v34 = vadd.f32 %v4409_v20, %v5995_v29  ;;  %v4347_v9 = vpop.f32.mrb[95].mxu0 }
 0x1d8   : > { %v6091_v24 = vadd.f32 %v4345_v37, %v5990_v32  ;;  %v4348_v44 = vadd.f32 %v4347_v9, %v4346_v42 }
 0x1d9   : > { %v6088_v51 = vadd.f32 %v4412_v35, %v5998_v28 }
 0x1da   : > { %v6094_v26 = vadd.f32 %v4348_v44, %v5992_v4 }
 0x1db   : > { %v4413_v53 = vpop.f32.mrb[96].mxu1 }
 0x1dc   : > { %v4414_v2 = vpop.f32.mrb[97].mxu1  ;;  %v4349_v22 = vpop.f32.mrb[96].mxu0 }
 0x1dd   : > { %v4415_v39 = vadd.f32 %v4414_v2, %v4413_v53  ;;  %v4416_v12 = vpop.f32.mrb[98].mxu1  ;;  %v4350_v3 = vpop.f32.mrb[97].mxu0 }
 0x1de   : > { %v4417_v29 = vpop.f32.mrb[99].mxu1  ;;  %v4351_v28 = vadd.f32 %v4350_v3, %v4349_v22  ;;  %v4352_v56 = vpop.f32.mrb[98].mxu0 }
 0x1df   : > { %v4418_v40 = vadd.f32 %v4417_v29, %v4416_v12  ;;  %v6097_v13 = vadd.f32 %v4415_v39, %v6007_v62  ;;  %v4353_v16 = vpop.f32.mrb[99].mxu0 }
 0x1e0   : > { %v6103_v19 = vadd.f32 %v4351_v28, %v6001_v54  ;;  %v4354_v4 = vadd.f32 %v4353_v16, %v4352_v56 }
 0x1e1   : > { %v6100_v32 = vadd.f32 %v4418_v40, %v6010_v60 }
 0x1e2   : > { %v6106_v52 = vadd.f32 %v4354_v4, %v6004_v63 }
 0x1e3   : > { %v4419_v14 = vpop.f32.mrb[100].mxu1 }
 0x1e4   : > { %v4420_v57 = vpop.f32.mrb[101].mxu1  ;;  %v4355_v58 = vpop.f32.mrb[100].mxu0 }
 0x1e5   : > { %v4421_v15 = vadd.f32 %v4420_v57, %v4419_v14  ;;  %v4422_v59 = vpop.f32.mrb[102].mxu1  ;;  %v4356_v23 = vpop.f32.mrb[101].mxu0 }
 0x1e6   : > { %v4423_v62 = vpop.f32.mrb[103].mxu1  ;;  %v4357_v60 = vadd.f32 %v4356_v23, %v4355_v58  ;;  %v4358_v61 = vpop.f32.mrb[102].mxu0 }
 0x1e7   : > { %v4424_v20 = vadd.f32 %v4423_v62, %v4422_v59  ;;  %v6109_v38 = vadd.f32 %v4421_v15, %v6019_v43  ;;  %v4359_v0 = vpop.f32.mrb[103].mxu0 }
 0x1e8   : > { %v6115_v7 = vadd.f32 %v4357_v60, %v6013_v5  ;;  %v4360_v63 = vadd.f32 %v4359_v0, %v4358_v61 }
 0x1e9   : > { %v6112_v54 = vadd.f32 %v4424_v20, %v6022_v6 }
 0x1ea   : > { %v6118_v37 = vadd.f32 %v4360_v63, %v6016_v48 }
 0x1eb   : > { %v4425_v35 = vpop.f32.mrb[104].mxu1 }
 0x1ec   : > { %v4426_v42 = vpop.f32.mrb[105].mxu1  ;;  %v4361_v53 = vpop.f32.mrb[104].mxu0 }
 0x1ed   : > { %v4427_v9 = vadd.f32 %v4426_v42, %v4425_v35  ;;  %v4428_v44 = vpop.f32.mrb[106].mxu1  ;;  %v4362_v2 = vpop.f32.mrb[105].mxu0 }
 0x1ee   : > { %v4429_v43 = vpop.f32.mrb[107].mxu1  ;;  %v4363_v6 = vadd.f32 %v4362_v2, %v4361_v53  ;;  %v4364_v22 = vpop.f32.mrb[106].mxu0 }
 0x1ef   : > { %v4430_v39 = vadd.f32 %v4429_v43, %v4428_v44  ;;  %v6121_v12 = vadd.f32 %v4427_v9, %v6031_v18  ;;  %v4365_v29 = vpop.f32.mrb[107].mxu0 }
 0x1f0   : > { %v6127_v3 = vadd.f32 %v4363_v6, %v6025_v47  ;;  %v4366_v48 = vadd.f32 %v4365_v29, %v4364_v22 }
 0x1f1   : > { %v6124_v5 = vadd.f32 %v4430_v39, %v6034_v10 }
 0x1f2   : > { %v6130_v28 = vadd.f32 %v4366_v48, %v6028_v17 }
 0x1f3   : > { %v4431_v40 = vpop.f32.mrb[108].mxu1 }
 0x1f4   : > { %v4432_v56 = vpop.f32.mrb[109].mxu1  ;;  %v4367_v18 = vpop.f32.mrb[108].mxu0 }
 0x1f5   : > { %v4433_v16 = vadd.f32 %v4432_v56, %v4431_v40  ;;  %v4434_v4 = vpop.f32.mrb[110].mxu1  ;;  %v4368_v57 = vpop.f32.mrb[109].mxu0 }
 0x1f6   : > { %v4435_v14 = vpop.f32.mrb[111].mxu1  ;;  %v4369_v59 = vadd.f32 %v4368_v57, %v4367_v18  ;;  %v4370_v47 = vpop.f32.mrb[110].mxu0 }
 0x1f7   : > { %v4436_v15 = vadd.f32 %v4435_v14, %v4434_v4  ;;  %v6133_v10 = vadd.f32 %v4433_v16, %v6043_v11  ;;  %v4371_v58 = vpop.f32.mrb[111].mxu0 }
 0x1f8   : > { %v6139_v17 = vadd.f32 %v4369_v59, %v6037_v30  ;;  %v4372_v23 = vadd.f32 %v4371_v58, %v4370_v47 }
 0x1f9   : > { %v6136_v62 = vadd.f32 %v4436_v15, %v6046_v21 }
 0x1fa   : > { %v6143_v60 = vadd.f32 %v4372_v23, %v6040_v41 }
 0x1fb   : > { %v4437_v20 = vpop.f32.mrb[112].mxu1 }
 0x1fc   : > { %v4438_v61 = vpop.f32.mrb[113].mxu1  ;;  %v4527_v63 = vpop.f32.mrb[112].mxu0 }
 0x1fd   : > { %v4439_v11 = vadd.f32 %v4438_v61, %v4437_v20  ;;  %v4440_v0 = vpop.f32.mrb[114].mxu1  ;;  %v3452_v42 = vadd.f32 %v4527_v63, %v6061_v45  ;;  %v3443_v21 = vpop.f32.mrb[113].mxu0 }
 0x1fe   : > { %v4441_v35 = vpop.f32.mrb[115].mxu1  ;;  %v3444_v44 = vadd.f32 %v3443_v21, %v6049_v49  ;;  %v4528_v53 = vpop.f32.mrb[114].mxu0 }
 0x1ff   : > { %v4442_v9 = vadd.f32 %v4441_v35, %v4440_v0  ;;  %v6149_v30 = vadd.f32 %v4439_v11, %v6055_v1  ;;  %v3572_v43 = vmax.f32 %v3452_v42, 0.0  ;;  %v3455_v41 = vadd.f32 %v4528_v53, %v6064_v36  ;;  %v3446_v2 = vpop.f32.mrb[115].mxu0 }
 0x200   : > { %v3570_v6 = vmax.f32 %v3444_v44, 0.0  ;;  %v3447_v22 = vadd.f32 %v3446_v2, %v6052_v31 }
 0x201   : > { %v6154_v39 = vadd.f32 %v4442_v9, %v6058_v50  ;;  %3604 = vst [vmem:[%s6157_s26 + $0x10] sm:$0xff] %v3572_v43  ;;  %v3573_v1 = vmax.f32 %v3455_v41, 0.0 }
 0x202   : > { %3602 = vst [vmem:[%s6157_s26] sm:$0xff] %v3570_v6  ;;  %v3571_v45 = vmax.f32 %v3447_v22, 0.0 }
 0x203   : > { %v4443_v49 = vpop.f32.mrb[116].mxu1  ;;  %3605 = vst [vmem:[%s6157_s26 + $0x18] sm:$0xff] %v3573_v1 }
 0x204   : > { %v4444_v29 = vpop.f32.mrb[117].mxu1  ;;  %3603 = vst [vmem:[%s6157_s26 + $0x8] sm:$0xff] %v3571_v45  ;;  %v4531_v50 = vpop.f32.mrb[116].mxu0 }
 0x205   : > { %v4445_v36 = vadd.f32 %v4444_v29, %v4443_v49  ;;  %v4446_v48 = vpop.f32.mrb[118].mxu1  ;;  %v3468_v31 = vadd.f32 %v4531_v50, %v6085_v34  ;;  %v3459_v56 = vpop.f32.mrb[117].mxu0 }
 0x206   : > { %v4447_v40 = vpop.f32.mrb[119].mxu1  ;;  %v3460_v18 = vadd.f32 %v3459_v56, %v6073_v8  ;;  %v4532_v14 = vpop.f32.mrb[118].mxu0 }
 0x207   : > { %v4448_v16 = vadd.f32 %v4447_v40, %v4446_v48  ;;  %v6165_v4 = vadd.f32 %v4445_v36, %v6067_v27  ;;  %v3576_v57 = vmax.f32 %v3468_v31, 0.0  ;;  %v3471_v15 = vadd.f32 %v4532_v14, %v6088_v51  ;;  %v3462_v59 = vpop.f32.mrb[119].mxu0 }
 0x208   : > { %v3574_v58 = vmax.f32 %v3460_v18, 0.0  ;;  %v3463_v34 = vadd.f32 %v3462_v59, %v6076_v25 }
 0x209   : > { %v6170_v47 = vadd.f32 %v4448_v16, %v6070_v33  ;;  %3608 = vst [vmem:[%s6157_s26 + $0x30] sm:$0xff] %v3576_v57  ;;  %v3577_v23 = vmax.f32 %v3471_v15, 0.0 }
 0x20a   : > { %3606 = vst [vmem:[%s6157_s26 + $0x20] sm:$0xff] %v3574_v58  ;;  %v3575_v27 = vmax.f32 %v3463_v34, 0.0 }
 0x20b   : > { %v4449_v20 = vpop.f32.mrb[120].mxu1  ;;  %3609 = vst [vmem:[%s6157_s26 + $0x38] sm:$0xff] %v3577_v23 }
 0x20c   : > { %v4450_v61 = vpop.f32.mrb[121].mxu1  ;;  %3607 = vst [vmem:[%s6157_s26 + $0x28] sm:$0xff] %v3575_v27  ;;  %v4535_v0 = vpop.f32.mrb[120].mxu0 }
 0x20d   : > { %v4451_v8 = vadd.f32 %v4450_v61, %v4449_v20  ;;  %v4452_v11 = vpop.f32.mrb[122].mxu1  ;;  %v3484_v33 = vadd.f32 %v4535_v0, %v6109_v38  ;;  %v3475_v63 = vpop.f32.mrb[121].mxu0 }
 0x20e   : > { %v4453_v51 = vpop.f32.mrb[123].mxu1  ;;  %v3476_v42 = vadd.f32 %v3475_v63, %v6097_v13  ;;  %v4536_v21 = vpop.f32.mrb[122].mxu0 }
 0x20f   : > { %v4454_v35 = vadd.f32 %v4453_v51, %v4452_v11  ;;  %v6179_v25 = vadd.f32 %v4451_v8, %v6079_v55  ;;  %v3580_v9 = vmax.f32 %v3484_v33, 0.0  ;;  %v3487_v44 = vadd.f32 %v4536_v21, %v6112_v54  ;;  %v3478_v53 = vpop.f32.mrb[123].mxu0 }
 0x210   : > { %v3578_v41 = vmax.f32 %v3476_v42, 0.0  ;;  %v3479_v38 = vadd.f32 %v3478_v53, %v6100_v32 }
 0x211   : > { %v6184_v43 = vadd.f32 %v4454_v35, %v6082_v46  ;;  %3612 = vst [vmem:[%s6157_s26 + $0x50] sm:$0xff] %v3580_v9  ;;  %v3581_v2 = vmax.f32 %v3487_v44, 0.0 }
 0x212   : > { %3610 = vst [vmem:[%s6157_s26 + $0x40] sm:$0xff] %v3578_v41  ;;  %v3579_v55 = vmax.f32 %v3479_v38, 0.0 }
 0x213   : > { %v4455_v6 = vpop.f32.mrb[124].mxu1  ;;  %3613 = vst [vmem:[%s6157_s26 + $0x58] sm:$0xff] %v3581_v2 }
 0x214   : > { %v4456_v22 = vpop.f32.mrb[125].mxu1  ;;  %3611 = vst [vmem:[%s6157_s26 + $0x48] sm:$0xff] %v3579_v55  ;;  %v4539_v49 = vpop.f32.mrb[124].mxu0 }
 0x215   : > { %v4457_v13 = vadd.f32 %v4456_v22, %v4455_v6  ;;  %v4458_v1 = vpop.f32.mrb[126].mxu1  ;;  %v3500_v46 = vadd.f32 %v4539_v49, %v6133_v10  ;;  %v3491_v45 = vpop.f32.mrb[125].mxu0 }
 0x216   : > { %v4459_v54 = vpop.f32.mrb[127].mxu1  ;;  %v3492_v36 = vadd.f32 %v3491_v45, %v6121_v12  ;;  %v4540_v48 = vpop.f32.mrb[126].mxu0 }
 0x217   : > { %v4460_v29 = vadd.f32 %v4459_v54, %v4458_v1  ;;  %v3371_v32 = vadd.f32 %v4457_v13, %v6091_v24  ;;  %v3584_v50 = vmax.f32 %v3500_v46, 0.0  ;;  %v3503_v40 = vadd.f32 %v4540_v48, %v6136_v62  ;;  %v3494_v31 = vpop.f32.mrb[127].mxu0 }
 0x218   : > { %v3582_v16 = vmax.f32 %v3492_v36, 0.0  ;;  %v3495_v18 = vadd.f32 %v3494_v31, %v6124_v5 }
 0x219   : > { %v3374_v56 = vadd.f32 %v4460_v29, %v6094_v26  ;;  %3616 = vst [vmem:[%s6157_s26 + $0x70] sm:$0xff] %v3584_v50  ;;  %v3585_v10 = vmax.f32 %v3503_v40, 0.0 }
 0x21a   : > { %3614 = vst [vmem:[%s6157_s26 + $0x60] sm:$0xff] %v3582_v16  ;;  %v3583_v57 = vmax.f32 %v3495_v18, 0.0 }
 0x21b   : > { %v4461_v14 = vpop.f32.mrb[128].mxu1  ;;  %3617 = vst [vmem:[%s6157_s26 + $0x78] sm:$0xff] %v3585_v10 }
 0x21c   : > { %v4462_v15 = vpop.f32.mrb[129].mxu1  ;;  %3615 = vst [vmem:[%s6157_s26 + $0x68] sm:$0xff] %v3583_v57  ;;  %v4543_v59 = vpop.f32.mrb[128].mxu0 }
 0x21d   : > { %v4463_v24 = vadd.f32 %v4462_v15, %v4461_v14  ;;  %v4464_v12 = vpop.f32.mrb[130].mxu1  ;;  %v3516_v62 = vadd.f32 %v4543_v59, %v6165_v4  ;;  %v3507_v26 = vpop.f32.mrb[129].mxu0 }
 0x21e   : > { %v4465_v58 = vpop.f32.mrb[131].mxu1  ;;  %v3508_v23 = vadd.f32 %v3507_v26, %v6149_v30  ;;  %v4544_v20 = vpop.f32.mrb[130].mxu0 }
 0x21f   : > { %v4466_v34 = vadd.f32 %v4465_v58, %v4464_v12  ;;  %v3379_v5 = vadd.f32 %v4463_v24, %v6103_v19  ;;  %v3588_v27 = vmax.f32 %v3516_v62, 0.0  ;;  %v3519_v61 = vadd.f32 %v4544_v20, %v6170_v47  ;;  %v3510_v8 = vpop.f32.mrb[131].mxu0 }
 0x220   : > { %v3586_v0 = vmax.f32 %v3508_v23, 0.0  ;;  %v3511_v51 = vadd.f32 %v3510_v8, %v6154_v39 }
 0x221   : > { %v3382_v11 = vadd.f32 %v4466_v34, %v6106_v52  ;;  %3620 = vst [vmem:[%s6157_s26 + $0x90] sm:$0xff] %v3588_v27  ;;  %v3589_v4 = vmax.f32 %v3519_v61, 0.0 }
 0x222   : > { %3618 = vst [vmem:[%s6157_s26 + $0x80] sm:$0xff] %v3586_v0  ;;  %v3587_v63 = vmax.f32 %v3511_v51, 0.0 }
 0x223   : > { %v4467_v33 = vpop.f32.mrb[132].mxu1  ;;  %3621 = vst [vmem:[%s6157_s26 + $0x98] sm:$0xff] %v3589_v4 }
 0x224   : > { %v4468_v35 = vpop.f32.mrb[133].mxu1  ;;  %3619 = vst [vmem:[%s6157_s26 + $0x88] sm:$0xff] %v3587_v63  ;;  %v4547_v42 = vpop.f32.mrb[132].mxu0 }
 0x225   : > { %v4469_v19 = vadd.f32 %v4468_v35, %v4467_v33  ;;  %v4470_v30 = vpop.f32.mrb[134].mxu1  ;;  %v3532_v47 = vadd.f32 %v4547_v42, %v3371_v32  ;;  %v3523_v9 = vpop.f32.mrb[133].mxu0 }
 0x226   : > { %v4471_v21 = vpop.f32.mrb[135].mxu1  ;;  %v3524_v44 = vadd.f32 %v3523_v9, %v6179_v25  ;;  %v4548_v53 = vpop.f32.mrb[134].mxu0 }
 0x227   : > { %v4472_v52 = vadd.f32 %v4471_v21, %v4470_v30  ;;  %v3387_v39 = vadd.f32 %v4469_v19, %v6115_v7  ;;  %v3592_v41 = vmax.f32 %v3532_v47, 0.0  ;;  %v3535_v38 = vadd.f32 %v4548_v53, %v3374_v56  ;;  %v3526_v2 = vpop.f32.mrb[135].mxu0 }
 0x228   : > { %v3590_v55 = vmax.f32 %v3524_v44, 0.0  ;;  %v3527_v22 = vadd.f32 %v3526_v2, %v6184_v43 }
 0x229   : > { %v3390_v6 = vadd.f32 %v4472_v52, %v6118_v37  ;;  %3624 = vst [vmem:[%s6157_s26 + $0xb0] sm:$0xff] %v3592_v41  ;;  %v3593_v13 = vmax.f32 %v3535_v38, 0.0 }
 0x22a   : > { %3622 = vst [vmem:[%s6157_s26 + $0xa0] sm:$0xff] %v3590_v55  ;;  %v3591_v49 = vmax.f32 %v3527_v22, 0.0 }
 0x22b   : > { %v4473_v1 = vpop.f32.mrb[136].mxu1  ;;  %3625 = vst [vmem:[%s6157_s26 + $0xb8] sm:$0xff] %v3593_v13 }
 0x22c   : > { %v4474_v54 = vpop.f32.mrb[137].mxu1  ;;  %3623 = vst [vmem:[%s6157_s26 + $0xa8] sm:$0xff] %v3591_v49  ;;  %v4551_v25 = vpop.f32.mrb[136].mxu0 }
 0x22d   : > { %v4475_v7 = vadd.f32 %v4474_v54, %v4473_v1  ;;  %v4476_v46 = vpop.f32.mrb[138].mxu1  ;;  %v3548_v29 = vadd.f32 %v4551_v25, %v3387_v39  ;;  %v3539_v32 = vpop.f32.mrb[137].mxu0 }
 0x22e   : > { %v4477_v45 = vpop.f32.mrb[139].mxu1  ;;  %v3540_v36 = vadd.f32 %v3539_v32, %v3379_v5  ;;  %v4552_v48 = vpop.f32.mrb[138].mxu0 }
 0x22f   : > { %v4478_v37 = vadd.f32 %v4477_v45, %v4476_v46  ;;  %v3395_v43 = vadd.f32 %v4475_v7, %v6127_v3  ;;  %v3596_v50 = vmax.f32 %v3548_v29, 0.0  ;;  %v3551_v40 = vadd.f32 %v4552_v48, %v3390_v6  ;;  %v3542_v31 = vpop.f32.mrb[139].mxu0 }
 0x230   : > { %v3594_v16 = vmax.f32 %v3540_v36, 0.0  ;;  %v3543_v18 = vadd.f32 %v3542_v31, %v3382_v11 }
 0x231   : > { %v3398_v56 = vadd.f32 %v4478_v37, %v6130_v28  ;;  %3628 = vst [vmem:[%s6157_s26 + $0xd0] sm:$0xff] %v3596_v50  ;;  %v3597_v10 = vmax.f32 %v3551_v40, 0.0 }
 0x232   : > { %3626 = vst [vmem:[%s6157_s26 + $0xc0] sm:$0xff] %v3594_v16  ;;  %v3595_v57 = vmax.f32 %v3543_v18, 0.0 }
 0x233   : > { %v4479_v14 = vpop.f32.mrb[140].mxu1  ;;  %3629 = vst [vmem:[%s6157_s26 + $0xd8] sm:$0xff] %v3597_v10 }
 0x234   : > { %v4480_v15 = vpop.f32.mrb[141].mxu1  ;;  %3627 = vst [vmem:[%s6157_s26 + $0xc8] sm:$0xff] %v3595_v57  ;;  %v4555_v12 = vpop.f32.mrb[140].mxu0 }
 0x235   : > { %v4481_v3 = vadd.f32 %v4480_v15, %v4479_v14  ;;  %v4482_v24 = vpop.f32.mrb[142].mxu1  ;;  %v3555_v28 = vpop.f32.mrb[141].mxu0 }
 0x236   : > { %v4483_v59 = vpop.f32.mrb[143].mxu1  ;;  %v3556_v26 = vadd.f32 %v3555_v28, %v3395_v43  ;;  %v4556_v34 = vpop.f32.mrb[142].mxu0 }
 0x237   : > { %v3403_v58 = vadd.f32 %v4481_v3, %v6139_v17  ;;  %v4484_v62 = vadd.f32 %v4483_v59, %v4482_v24  ;;  %v3558_v20 = vpop.f32.mrb[143].mxu0 }
 0x238   : > { %v3598_v27 = vmax.f32 %v3556_v26, 0.0  ;;  %v3559_v61 = vadd.f32 %v3558_v20, %v3398_v56 }
 0x239   : > { %v3564_v5 = vadd.f32 %v4555_v12, %v3403_v58  ;;  %v3406_v23 = vadd.f32 %v4484_v62, %v6143_v60 }
 0x23a   : > { %3630 = vst [vmem:[%s6157_s26 + $0xe0] sm:$0xff] %v3598_v27  ;;  %v3599_v17 = vmax.f32 %v3559_v61, 0.0 }
 0x23b   : > { %v3600_v8 = vmax.f32 %v3564_v5, 0.0  ;;  %v3567_v11 = vadd.f32 %v4556_v34, %v3406_v23 }
 0x23c   : > { %3631 = vst [vmem:[%s6157_s26 + $0xe8] sm:$0xff] %v3599_v17 }
 0x23d   : > { %3632 = vst [vmem:[%s6157_s26 + $0xf0] sm:$0xff] %v3600_v8  ;;  %v3601_v60 = vmax.f32 %v3567_v11, 0.0 }
 0x23f   : > { %3633 = vst [vmem:[%s6157_s26 + $0xf8] sm:$0xff] %v3601_v60 }
 0x240   : > { %4820 = shalt.err (!%p4817_p5)
}
 0x241   : > { %s4821_s9 = scalar_lea.hbm %s6233_s30, 4096  ;;  %s4825_s18 = scalar_lea.hbm %s6291_s3, 8192 }
 0x242   : > { %p4822_p6 = scmp.ne.s32.totalorder %s6233_s30, %s4821_s9  ;;  %p4826_p10 = scmp.lt.u32.totalorder %s6233_s30, %s6291_s3 }
 0x243   : > { %p4827_p11 = scmp.lt.u32.totalorder %s4825_s18, %s4821_s9  ;;  %p4829_p13 = scmp.lt.u32.totalorder %s4821_s9, %s6233_s30 }
 0x244   : > { %p4823_p7 = pnand %p4822_p6, %p4951_p4 }
 0x245   : > { %p4828_p12 = por %p4827_p11, %p4826_p10 }
 0x246   : > { %p4824_p9 = pneg %p4823_p7 }
 0x247   : > { %p4830_p0 = por %p4829_p13, %p4828_p12 }
 0x249   : > { %p4831_p1 = pnand %p4830_p0, %p4824_p9 }
 0x24b   : > { %4834 = shalt.err (!%p4831_p1)
}
 0x24c   : > { %s4889_s23 = smov 128   ;;  %s4890_s26 = smov 8  }
 0x24d   : > { %4573 = dma.vmem_to_hbm [thread:$0]  (%p4951_p4), %s6235_s28, 4096, %s6233_s30, %s6242_s15, %s4889_s23, %s4889_s23, %s4890_s26  }
 0x24e PF: > { %p4579_p2 = scmp.ge.s32.totalorder %s4885_s17, 2  ;;  %s3666_s27 = sand.u32 1, %s4865_s12  }
 0x24f   : > { %s3667_s29 = scalar_lea.sflag [#allocation4], %s3666_s27 }
 0x250   : > { %p4576_p3 = pnand %p4579_p2, %p4958_p8 }
 0x252   : > { %4860 = dma.done.wait (!%p4576_p3), %s3667_s29, 4096  }
 0x253   : > { %4862 = vsyncadd (!%p4576_p3), %s3667_s29, 4294963200  ;;  %s16_s17 = sadd.s32 1, %s4885_s17   ;;  %s6300_s12 = smov %s4869_s13 }
 0x254   : > { %p13_p5 = scmp.ge.s32.totalorder %s16_s17, 4   ;;  %s6301_s13 = smov %s4873_s14 }
 0x255   : > { %s6302_s14 = smov %s4964_s25  ;;  %s6303_s15 = smov %s4881_s16 }
 0x256   : > { %s6304_s16 = smov %s6306_s20  ;;  %15 = sbr.rel (!%p13_p5) target bundleno = 4 (0x4), region = 74 }
 0x25d   :  { %3672 = vsyncpa [#allocation4], 1 }
 0x25e   :  { %3674 = vsyncpa [#allocation4 + $0x1], 1 }

</bundles_post_ra>
